<compile_context>
chip_gen: v6e
topology: v6e:2x2x1
jax: 0.10.0
libtpu: 0.0.40
codegen_flags: <defaults>
</compile_context>

<pallas_src>
import functools

import jax
import jax.numpy as jnp
from jax.experimental import pallas as pl
from jax.experimental.pallas import tpu as pltpu

BN_EPS = 1e-5
VMEM_LIMIT = 32 * 1024 * 1024  # explicit scoped-VMEM budget (safe on v5e/v6e/v7x)


# -----------------------------------------------------------------------------
# Small helpers
# -----------------------------------------------------------------------------

def _round_up(x, m):
    return ((x + m - 1) // m) * m


def _tile_and_pad(n, max_tile, align):
    """Return (padded_n, tile) with tile | padded_n, tile <= max_tile, align | tile."""
    p = _round_up(n, align)
    if p <= max_tile:
        return p, p
    return _round_up(n, max_tile), max_tile


# -----------------------------------------------------------------------------
# Pallas kernels
# -----------------------------------------------------------------------------

def _gemm_bias_kernel(p_ref, w_ref, b_ref, o_ref, acc_ref, *, leaky):
    """Tiled conv-as-GEMM: bf16 inputs, f32 accumulation, bias(+LeakyReLU) epilogue.
    Grid is (N/tn, M/tm, K/tk); K is the innermost reduction axis."""
    kk = pl.program_id(2)

    @pl.when(kk == 0)
    def _():
        acc_ref[...] = jnp.zeros_like(acc_ref)

    acc_ref[...] += jnp.dot(p_ref[...], w_ref[...],
                            preferred_element_type=jnp.float32)

    @pl.when(kk == pl.num_programs(2) - 1)
    def _():
        r = acc_ref[...] + b_ref[...]
        if leaky:
            r = jnp.where(r > 0, r, 0.1 * r)
        o_ref[...] = r


def _gemm_stats_kernel(p_ref, w_ref, o_ref, sum_ref, ssq_ref, acc_ref):
    """Tiled conv-as-GEMM with train-mode BN statistics fused into the epilogue.
    Grid is (N/tn, M/tm, K/tk) with the N axis outermost, so the per-channel
    (1, tn) sum / sum-of-squares outputs stay VMEM-resident across all M and K
    steps of a given N tile and accumulate correctly (no extra HBM pass)."""
    i = pl.program_id(1)
    kk = pl.program_id(2)

    @pl.when(kk == 0)
    def _():
        acc_ref[...] = jnp.zeros_like(acc_ref)

    @pl.when((kk == 0) & (i == 0))
    def _():
        sum_ref[...] = jnp.zeros_like(sum_ref)
        ssq_ref[...] = jnp.zeros_like(ssq_ref)

    acc_ref[...] += jnp.dot(p_ref[...], w_ref[...],
                            preferred_element_type=jnp.float32)

    @pl.when(kk == pl.num_programs(2) - 1)
    def _():
        r = acc_ref[...]                       # conv output (pre-BN, no bias)
        o_ref[...] = r
        sum_ref[...] += jnp.sum(r, axis=0, keepdims=True)
        ssq_ref[...] += jnp.sum(r * r, axis=0, keepdims=True)


def _bn_apply_kernel(x_ref, scale_ref, shift_ref, o_ref, *, leaky):
    """x * scale + shift (train-mode BN, folded) + optional LeakyReLU(0.1)."""
    r = x_ref[...] * scale_ref[...] + shift_ref[...]
    if leaky:
        r = jnp.where(r > 0, r, 0.1 * r)
    o_ref[...] = r


def _add_kernel(a_ref, b_ref, o_ref):
    o_ref[...] = a_ref[...] + b_ref[...]


def _yolo_elt_kernel(p_ref, o_ref):
    """Elementwise YOLO head transform on (bbox_pad, M) — long axis on lanes.
       row 0,1 -> sigmoid (x, y); row 2 -> exp(w); row 3 -> raw h (unused);
       row 4  -> sigmoid (conf); rows 5: -> sigmoid (classes)."""
    p = p_ref[...]
    row = jax.lax.broadcasted_iota(jnp.int32, p.shape, 0)
    sig = jax.nn.sigmoid(p)
    out = jnp.where((row == 0) | (row == 1) | (row >= 4), sig, p)
    out = jnp.where(row == 2, jnp.exp(p), out)
    o_ref[...] = out


# -----------------------------------------------------------------------------
# Layer wrappers (activations are NHWC between layers)
# -----------------------------------------------------------------------------

def conv_block(x, weight, g, b, *, stride, pad, use_bn, leaky):
    """Conv2d (+ train-mode BN)(+ LeakyReLU) on an NHWC input via direct-order
    im2col + tiled bf16 Pallas GEMM with f32 accumulation (BN stats fused)."""
    N, H, W, C = x.shape
    Cout, Cin, k, _ = weight.shape
    Ho = (H + 2 * pad - k) // stride + 1
    Wo = (W + 2 * pad - k) // stride + 1

    # im2col directly in (N, Ho, Wo, kh, kw, C) order — no NCHW round trip.
    # TODO(synk): implicit in-kernel im2col via strided DMA (memory_space=pl.ANY +
    # make_async_copy) would remove the k*k HBM read amplification entirely.
    xp = jnp.pad(x, ((0, 0), (pad, pad), (pad, pad), (0, 0)))
    cols = [xp[:, kh:kh + stride * Ho:stride, kw:kw + stride * Wo:stride, :]
            for kh in range(k) for kw in range(k)]
    patches = jnp.stack(cols, axis=3).reshape(N * Ho * Wo, k * k * C)
    wmat = weight.transpose(2, 3, 1, 0).reshape(k * k * Cin, Cout)  # (kh,kw,Cin)-major K

    M, K = patches.shape
    # Tile sizes: lane-dense output (Cout padded to 128), bf16-friendly sublanes.
    Npad = _round_up(Cout, 128)
    tn = 256 if Npad % 256 == 0 else 128
    Mpad, tm = _tile_and_pad(M, 512, 16)
    Kpad, tk = _tile_and_pad(K, 512, 128)

    patches_p = jnp.pad(patches, ((0, Mpad - M), (0, Kpad - K))).astype(jnp.bfloat16)
    wmat_p = jnp.pad(wmat, ((0, Kpad - K), (0, Npad - Cout))).astype(jnp.bfloat16)

    grid = (Npad // tn, Mpad // tm, Kpad // tk)        # N outermost, K innermost
    p_spec = pl.BlockSpec((tm, tk), lambda j, i, kk: (i, kk))
    w_spec = pl.BlockSpec((tk, tn), lambda j, i, kk: (kk, j))
    o_spec = pl.BlockSpec((tm, tn), lambda j, i, kk: (i, j))
    v_spec = pl.BlockSpec((1, tn), lambda j, i, kk: (0, j))   # per-channel vectors

    if not use_bn:
        bias_p = jnp.pad(b, (0, Npad - Cout)).reshape(1, Npad).astype(jnp.float32)
        out = pl.pallas_call(
            functools.partial(_gemm_bias_kernel, leaky=leaky),
            out_shape=jax.ShapeDtypeStruct((Mpad, Npad), jnp.float32),
            grid=grid,
            in_specs=[p_spec, w_spec, v_spec],
            out_specs=o_spec,
            scratch_shapes=[pltpu.VMEM((tm, tn), jnp.float32)],
            compiler_params=pltpu.CompilerParams(
                dimension_semantics=("parallel", "parallel", "arbitrary"),
                vmem_limit_bytes=VMEM_LIMIT),
        )(patches_p, wmat_p, bias_p)
        return out[:M, :Cout].reshape(N, Ho, Wo, Cout)   # NHWC

    # BN path: GEMM with per-channel sum / sum-of-squares fused into the epilogue.
    # Padded M rows are exactly zero (zero patches, no bias) so they contribute
    # nothing to the statistics; divide by the *real* M (PyTorch train-mode BN
    # uses biased variance over N*H*W).
    gemm, s, ss = pl.pallas_call(
        _gemm_stats_kernel,
        out_shape=(jax.ShapeDtypeStruct((Mpad, Npad), jnp.float32),
                   jax.ShapeDtypeStruct((1, Npad), jnp.float32),
                   jax.ShapeDtypeStruct((1, Npad), jnp.float32)),
        grid=grid,
        in_specs=[p_spec, w_spec],
        out_specs=(o_spec, v_spec, v_spec),
        scratch_shapes=[pltpu.VMEM((tm, tn), jnp.float32)],
        compiler_params=pltpu.CompilerParams(
            dimension_semantics=("parallel", "arbitrary", "arbitrary"),
            vmem_limit_bytes=VMEM_LIMIT),
    )(patches_p, wmat_p)

    mean = s / float(M)
    var = ss / float(M) - mean * mean
    gamma_p = jnp.pad(g, (0, Npad - Cout)).reshape(1, Npad).astype(jnp.float32)
    beta_p = jnp.pad(b, (0, Npad - Cout)).reshape(1, Npad).astype(jnp.float32)
    scale = gamma_p * jax.lax.rsqrt(var + BN_EPS)
    shift = beta_p - mean * scale

    out = pl.pallas_call(
        functools.partial(_bn_apply_kernel, leaky=leaky),
        out_shape=jax.ShapeDtypeStruct((Mpad, Npad), jnp.float32),
        grid=(Mpad // tm,),
        in_specs=[pl.BlockSpec((tm, Npad), lambda i: (i, 0)),
                  pl.BlockSpec((1, Npad), lambda i: (0, 0)),
                  pl.BlockSpec((1, Npad), lambda i: (0, 0))],
        out_specs=pl.BlockSpec((tm, Npad), lambda i: (i, 0)),
        compiler_params=pltpu.CompilerParams(
            dimension_semantics=("parallel",),
            vmem_limit_bytes=VMEM_LIMIT),
    )(gemm, scale, shift)

    return out[:M, :Cout].reshape(N, Ho, Wo, Cout)        # NHWC


def shortcut_add(a, b):
    """Elementwise residual add, flattened to a lane-dense (rows, 1024) layout."""
    # TODO(synk): could be fused into the preceding conv's BN-apply epilogue, but
    # the pre-residual activation may be routed to by later layers, so keep it
    # as a separate kernel for general configs.
    shape, total = a.shape, a.size
    LANES = 1024
    rows = -(-total // LANES)
    Rpad, br = _tile_and_pad(rows, 256, 8)
    af = jnp.pad(a.reshape(-1), (0, Rpad * LANES - total)).reshape(Rpad, LANES)
    bf = jnp.pad(b.reshape(-1), (0, Rpad * LANES - total)).reshape(Rpad, LANES)
    out = pl.pallas_call(
        _add_kernel,
        out_shape=jax.ShapeDtypeStruct((Rpad, LANES), a.dtype),
        grid=(Rpad // br,),
        in_specs=[pl.BlockSpec((br, LANES), lambda i: (i, 0)),
                  pl.BlockSpec((br, LANES), lambda i: (i, 0))],
        out_specs=pl.BlockSpec((br, LANES), lambda i: (i, 0)),
        compiler_params=pltpu.CompilerParams(
            dimension_semantics=("parallel",),
            vmem_limit_bytes=VMEM_LIMIT),
    )(af, bf)
    return out.reshape(-1)[:total].reshape(shape)


def upsample_nearest(x, scale):            # NHWC
    x = jnp.repeat(x, scale, axis=1)
    x = jnp.repeat(x, scale, axis=2)
    return x


def yolo_layer(x_nhwc, anchors, num_classes, img_dim, anchor_idxs):
    B, G, _, _ = x_nhwc.shape
    A = len(anchors)
    bbox = 5 + num_classes

    # stride / grids are fixed at init time (YOLOLayer._get_stride / _init_grids)
    if anchor_idxs[0] == A * 2:
        init_stride = 32
    elif anchor_idxs[0] == A:
        init_stride = 16
    else:
        init_stride = 8
    nG = int(img_dim / init_stride)
    base = jnp.broadcast_to(jnp.arange(nG, dtype=jnp.float32)[None, :], (nG, nG))
    grid_x = base.reshape(1, 1, nG, nG)
    grid_y = base.T.reshape(1, 1, nG, nG)
    scaled_anchors = jnp.array(
        [(aw / init_stride, ah / init_stride) for aw, ah in anchors], dtype=jnp.float32)

    # NHWC (B,G,G,A*bbox) -> (B,A,G,G,bbox): same values as the NCHW reference path.
    pred = x_nhwc.reshape(B, G, G, A, bbox).transpose(0, 3, 1, 2, 4)

    # Lane-dense elementwise transform: long axis (B*A*G*G) on the 128-lane dim.
    # TODO(synk): could be fused into the preceding 1x1 conv's GEMM epilogue.
    M = B * A * G * G
    Rpad = _round_up(bbox, 8)
    Mpad, tmile = _tile_and_pad(M, 512, 128)
    flat = jnp.pad(pred.reshape(M, bbox).T.astype(jnp.float32),
                   ((0, Rpad - bbox), (0, Mpad - M)))
    t = pl.pallas_call(
        _yolo_elt_kernel,
        out_shape=jax.ShapeDtypeStruct((Rpad, Mpad), jnp.float32),
        grid=(Mpad // tmile,),
        in_specs=[pl.BlockSpec((Rpad, tmile), lambda i: (0, i))],
        out_specs=pl.BlockSpec((Rpad, tmile), lambda i: (0, i)),
        compiler_params=pltpu.CompilerParams(
            dimension_semantics=("parallel",),
            vmem_limit_bytes=VMEM_LIMIT),
    )(flat)
    t = t[:bbox, :M].T.reshape(B, A, G, G, bbox)

    sx, sy, ew = t[..., 0], t[..., 1], t[..., 2]
    conf = t[..., 4]
    cls = t[..., 5:]

    box_x = sx + jnp.broadcast_to(grid_x, (B, A, G, G))
    box_y = sy + jnp.broadcast_to(grid_y, (B, A, G, G))
    # Reproduces the reference's exact broadcasting: exp(w) * scaled_anchors.repeat(B,1,1,1)
    anchors_rep = jnp.broadcast_to(scaled_anchors.reshape(1, 1, A, 2), (B, 1, A, 2))
    wh = ew * anchors_rep
    box_wh = jnp.broadcast_to(wh, (B, A, G, G, 2))

    pred_boxes = jnp.concatenate([box_x[..., None], box_y[..., None], box_wh], axis=-1)
    return jnp.concatenate(
        [pred_boxes.reshape(B, -1, 4),
         conf.reshape(B, -1, 1),
         cls.reshape(B, -1, num_classes)], axis=-1)


# -----------------------------------------------------------------------------
# Synthetic Darknet config (stands in for the parsed .cfg file)
# -----------------------------------------------------------------------------

MODULE_DEFS = [
    {'type': 'net', 'channels': '4', 'height': '16'},
    {'type': 'convolutional', 'batch_normalize': '1', 'filters': '8',  'size': '3', 'stride': '1', 'pad': '1', 'activation': 'leaky'},
    {'type': 'convolutional', 'batch_normalize': '1', 'filters': '16', 'size': '3', 'stride': '2', 'pad': '1', 'activation': 'leaky'},
    {'type': 'convolutional', 'batch_normalize': '1', 'filters': '16', 'size': '1', 'stride': '1', 'pad': '1', 'activation': 'leaky'},
    {'type': 'shortcut', 'from': '-2', 'activation': 'linear'},
    {'type': 'convolutional', 'batch_normalize': '1', 'filters': '16', 'size': '3', 'stride': '2', 'pad': '1', 'activation': 'leaky'},
    {'type': 'upsample', 'stride': '2'},
    {'type': 'route', 'layers': '-1,-3'},
    {'type': 'convolutional', 'batch_normalize': '1', 'filters': '16', 'size': '3', 'stride': '2', 'pad': '1', 'activation': 'leaky'},
    {'type': 'convolutional', 'batch_normalize': '1', 'filters': '16', 'size': '3', 'stride': '2', 'pad': '1', 'activation': 'leaky'},
    {'type': 'convolutional', 'batch_normalize': '0', 'filters': '14', 'size': '1', 'stride': '1', 'pad': '1', 'activation': 'linear'},
    {'type': 'yolo', 'mask': '0,1', 'anchors': '10,13,16,30,33,23', 'classes': '2', 'num': '3'},
]


def init_params(module_defs, key):
    in_ch = int(module_defs[0]['channels'])
    output_filters = [in_ch]
    params = {}
    for i, mdef in enumerate(module_defs[1:]):
        t = mdef['type']
        if t == 'convolutional':
            bn = int(mdef['batch_normalize'])
            f = int(mdef['filters'])
            k = int(mdef['size'])
            cin = output_filters[-1]
            key, kw, k1, k2 = jax.random.split(key, 4)
            w = 0.1 * jax.random.normal(kw, (f, cin, k, k), jnp.float32)
            if bn:
                g = 1.0 + 0.05 * jax.random.normal(k1, (f,), jnp.float32)   # BN gamma
                b = 0.05 * jax.random.normal(k2, (f,), jnp.float32)         # BN beta
            else:
                g = jnp.ones((f,), jnp.float32)                              # unused
                b = 0.05 * jax.random.normal(k1, (f,), jnp.float32)          # conv bias
            params[i] = {'w': w, 'g': g, 'b': b}
            output_filters.append(f)
        elif t == 'route':
            layers = [int(v) for v in mdef['layers'].split(',')]
            output_filters.append(sum(output_filters[li] for li in layers))
        else:  # upsample, shortcut, yolo
            output_filters.append(output_filters[-1])
    return params


def darknet_forward(x_nchw, params, module_defs):
    img_size = int(module_defs[0]['height'])
    out = jnp.transpose(x_nchw, (0, 2, 3, 1))     # NCHW -> NHWC once, at the input
    layer_outputs = []
    yolo_outputs = []
    for i, mdef in enumerate(module_defs[1:]):
        t = mdef['type']
        if t == 'convolutional':
            p = params[i]
            k = int(mdef['size'])
            pad = (k - 1) // 2 if int(mdef['pad']) else 0
            out = conv_block(out, p['w'], p['g'], p['b'],
                             stride=int(mdef['stride']), pad=pad,
                             use_bn=bool(int(mdef['batch_normalize'])),
                             leaky=(mdef['activation'] == 'leaky'))
        elif t == 'upsample':
            out = upsample_nearest(out, int(mdef['stride']))
        elif t == 'route':
            layers = [int(v) for v in mdef['layers'].split(',')]
            out = jnp.concatenate(
                [layer_outputs[li] for li in layers if li < len(layer_outputs)], axis=3)
        elif t == 'shortcut':
            li = int(mdef['from'])
            if li < len(layer_outputs):
                out = shortcut_add(layer_outputs[-1], layer_outputs[li])
        elif t == 'yolo':
            anchor_idxs = [int(v) for v in mdef['mask'].split(',')]
            a = [float(v) for v in mdef['anchors'].split(',')]
            anchors = [(a[j], a[j + 1]) for j in range(0, len(a), 2)]
            anchors = [anchors[j] for j in anchor_idxs]
            out = yolo_layer(out, anchors, int(mdef['classes']), img_size, anchor_idxs)
        layer_outputs.append(out)
        if t == 'yolo':
            yolo_outputs.append(out)
    if yolo_outputs:
        return yolo_outputs[-1]
    return jnp.transpose(layer_outputs[-1], (0, 3, 1, 2))   # back to NCHW if no YOLO head


if __name__ == "__main__":
    key = jax.random.PRNGKey(0)
    key, kx = jax.random.split(key)
    x = jax.random.normal(kx, (2, 4, 16, 16), jnp.float32)   # NCHW input
    params = init_params(MODULE_DEFS, key)

    forward = jax.jit(lambda xx, pp: darknet_forward(xx, pp, MODULE_DEFS))
    out = forward(x, params)
    out = jax.block_until_ready(out)
    assert out.shape == (2, 8, 7), out.shape            # (B, num_anchors*G*G, 5+classes)
    assert bool(jnp.all(jnp.isfinite(out)))
    print("KERNEL_OK")
</pallas_src>

<mosaic_0001>
module attributes {stable_mosaic.version = 11 : i64} {
  func.func @_gemm_stats_kernel(%arg0: i32, %arg1: i32, %arg2: i32, %arg3: memref<512x128xbf16, #tpu.memory_space<vmem>>, %arg4: memref<128x128xbf16, #tpu.memory_space<vmem>>, %arg5: memref<512x128xf32, #tpu.memory_space<vmem>>, %arg6: memref<1x128xf32, #tpu.memory_space<vmem>>, %arg7: memref<1x128xf32, #tpu.memory_space<vmem>>, %arg8: memref<512x128xf32, #tpu.memory_space<vmem>>) attributes {dimension_semantics = [#tpu.dimension_semantics<parallel>, #tpu.dimension_semantics<arbitrary>, #tpu.dimension_semantics<arbitrary>], iteration_bounds = array<i64: 1, 1, 1>, scalar_prefetch = 0 : i64, scratch_operands = 1 : i64, tpu.core_type = #tpu.core_type<tc>, window_params = [{transform_indices = @transform_0, window_bounds = array<i64: 512, 128>}, {transform_indices = @transform_1, window_bounds = array<i64: 128, 128>}, {transform_indices = @transform_2, window_bounds = array<i64: 512, 128>}, {transform_indices = @transform_3, window_bounds = array<i64: 1, 128>}, {transform_indices = @transform_4, window_bounds = array<i64: 1, 128>}]} {
    %c0_i32 = arith.constant 0 : i32
    %0 = arith.cmpi eq, %arg2, %c0_i32 : i32
    %1 = arith.extui %0 : i1 to i32
    %c0_i32_0 = arith.constant 0 : i32
    %2 = arith.cmpi ne, %1, %c0_i32_0 : i32
    scf.if %2 {
      %cst_13 = arith.constant 0.000000e+00 : f32
      %17 = vector.broadcast %cst_13 : f32 to vector<512x128xf32>
      %c0_14 = arith.constant 0 : index
      %c0_15 = arith.constant 0 : index
      %18 = vector.load %arg8[%c0_14, %c0_15] : memref<512x128xf32, #tpu.memory_space<vmem>>, vector<512x128xf32>
      tpu.vector_store %arg8[%c0_14, %c0_15], %17 {strides = array<i32>} : memref<512x128xf32, #tpu.memory_space<vmem>>, vector<512x128xf32>,
    } else {
    }
    %c0_i32_1 = arith.constant 0 : i32
    %3 = arith.cmpi eq, %arg2, %c0_i32_1 : i32
    %c0_i32_2 = arith.constant 0 : i32
    %4 = arith.cmpi eq, %arg1, %c0_i32_2 : i32
    %5 = arith.andi %3, %4 : i1
    %6 = arith.extui %5 : i1 to i32
    %c0_i32_3 = arith.constant 0 : i32
    %7 = arith.cmpi ne, %6, %c0_i32_3 : i32
    scf.if %7 {
      %cst_13 = arith.constant 0.000000e+00 : f32
      %17 = vector.broadcast %cst_13 : f32 to vector<1x128xf32>
      %c0_14 = arith.constant 0 : index
      %c0_15 = arith.constant 0 : index
      %18 = vector.load %arg6[%c0_14, %c0_15] : memref<1x128xf32, #tpu.memory_space<vmem>>, vector<1x128xf32>
      tpu.vector_store %arg6[%c0_14, %c0_15], %17 {strides = array<i32>} : memref<1x128xf32, #tpu.memory_space<vmem>>, vector<1x128xf32>,
      %cst_16 = arith.constant 0.000000e+00 : f32
      %19 = vector.broadcast %cst_16 : f32 to vector<1x128xf32>
      %c0_17 = arith.constant 0 : index
      %c0_18 = arith.constant 0 : index
      %20 = vector.load %arg7[%c0_17, %c0_18] : memref<1x128xf32, #tpu.memory_space<vmem>>, vector<1x128xf32>
      tpu.vector_store %arg7[%c0_17, %c0_18], %19 {strides = array<i32>} : memref<1x128xf32, #tpu.memory_space<vmem>>, vector<1x128xf32>,
    } else {
    }
    %c0 = arith.constant 0 : index
    %c0_4 = arith.constant 0 : index
    %8 = vector.load %arg8[%c0, %c0_4] : memref<512x128xf32, #tpu.memory_space<vmem>>, vector<512x128xf32>
    %c0_5 = arith.constant 0 : index
    %c0_6 = arith.constant 0 : index
    %9 = vector.load %arg3[%c0_5, %c0_6] : memref<512x128xbf16, #tpu.memory_space<vmem>>, vector<512x128xbf16>
    %c0_7 = arith.constant 0 : index
    %c0_8 = arith.constant 0 : index
    %10 = vector.load %arg4[%c0_7, %c0_8] : memref<128x128xbf16, #tpu.memory_space<vmem>>, vector<128x128xbf16>
    %cst = arith.constant dense<0.000000e+00> : vector<512x128xf32>
    %11 = tpu.matmul %9, %10, %cst {dimension_numbers = #tpu.dot_dimension_numbers<[1], [0], [0], [1], [0, 0, 1, 1], [], []>} : vector<512x128xbf16>, vector<128x128xbf16>, vector<512x128xf32> -> vector<512x128xf32>
    %12 = arith.addf %8, %11 : vector<512x128xf32>
    %c0_9 = arith.constant 0 : index
    %c0_10 = arith.constant 0 : index
    %13 = vector.load %arg8[%c0_9, %c0_10] : memref<512x128xf32, #tpu.memory_space<vmem>>, vector<512x128xf32>
    tpu.vector_store %arg8[%c0_9, %c0_10], %12 {strides = array<i32>} : memref<512x128xf32, #tpu.memory_space<vmem>>, vector<512x128xf32>,
    %c0_i32_11 = arith.constant 0 : i32
    %14 = arith.cmpi eq, %arg2, %c0_i32_11 : i32
    %15 = arith.extui %14 : i1 to i32
    %c0_i32_12 = arith.constant 0 : i32
    %16 = arith.cmpi ne, %15, %c0_i32_12 : i32
    scf.if %16 {
      %c0_13 = arith.constant 0 : index
      %c0_14 = arith.constant 0 : index
      %17 = vector.load %arg8[%c0_13, %c0_14] : memref<512x128xf32, #tpu.memory_space<vmem>>, vector<512x128xf32>
      %c0_15 = arith.constant 0 : index
      %c0_16 = arith.constant 0 : index
      %18 = vector.load %arg5[%c0_15, %c0_16] : memref<512x128xf32, #tpu.memory_space<vmem>>, vector<512x128xf32>
      tpu.vector_store %arg5[%c0_15, %c0_16], %17 {strides = array<i32>} : memref<512x128xf32, #tpu.memory_space<vmem>>, vector<512x128xf32>,
      %c0_17 = arith.constant 0 : index
      %c0_18 = arith.constant 0 : index
      %19 = vector.load %arg6[%c0_17, %c0_18] : memref<1x128xf32, #tpu.memory_space<vmem>>, vector<1x128xf32>
      %cst_19 = arith.constant dense<0.000000e+00> : vector<128xf32>
      %20 = vector.multi_reduction <add>, %17, %cst_19 [0] : vector<512x128xf32> to vector<128xf32>
      %21 = vector.shape_cast %20 : vector<128xf32> to vector<1x128xf32>
      %22 = arith.addf %19, %21 : vector<1x128xf32>
      %c0_20 = arith.constant 0 : index
      %c0_21 = arith.constant 0 : index
      %23 = vector.load %arg6[%c0_20, %c0_21] : memref<1x128xf32, #tpu.memory_space<vmem>>, vector<1x128xf32>
      tpu.vector_store %arg6[%c0_20, %c0_21], %22 {strides = array<i32>} : memref<1x128xf32, #tpu.memory_space<vmem>>, vector<1x128xf32>,
      %c0_22 = arith.constant 0 : index
      %c0_23 = arith.constant 0 : index
      %24 = vector.load %arg7[%c0_22, %c0_23] : memref<1x128xf32, #tpu.memory_space<vmem>>, vector<1x128xf32>
      %25 = arith.mulf %17, %17 : vector<512x128xf32>
      %cst_24 = arith.constant dense<0.000000e+00> : vector<128xf32>
      %26 = vector.multi_reduction <add>, %25, %cst_24 [0] : vector<512x128xf32> to vector<128xf32>
      %27 = vector.shape_cast %26 : vector<128xf32> to vector<1x128xf32>
      %28 = arith.addf %24, %27 : vector<1x128xf32>
      %c0_25 = arith.constant 0 : index
      %c0_26 = arith.constant 0 : index
      %29 = vector.load %arg7[%c0_25, %c0_26] : memref<1x128xf32, #tpu.memory_space<vmem>>, vector<1x128xf32>
      tpu.vector_store %arg7[%c0_25, %c0_26], %28 {strides = array<i32>} : memref<1x128xf32, #tpu.memory_space<vmem>>, vector<1x128xf32>,
    } else {
    }
    return
  }
  func.func @transform_0(%arg0: i32, %arg1: i32, %arg2: i32) -> (i32, i32) {
    %c0_i32 = arith.constant 0 : i32
    return %arg1, %arg2 : i32, i32
  }
  func.func @transform_1(%arg0: i32, %arg1: i32, %arg2: i32) -> (i32, i32) {
    %c0_i32 = arith.constant 0 : i32
    return %arg2, %arg0 : i32, i32
  }
  func.func @transform_2(%arg0: i32, %arg1: i32, %arg2: i32) -> (i32, i32) {
    %c0_i32 = arith.constant 0 : i32
    return %arg1, %arg0 : i32, i32
  }
  func.func @transform_3(%arg0: i32, %arg1: i32, %arg2: i32) -> (i32, i32) {
    %c0_i32 = arith.constant 0 : i32
    %c0_i32_0 = arith.constant 0 : i32
    return %c0_i32, %arg0 : i32, i32
  }
  func.func @transform_4(%arg0: i32, %arg1: i32, %arg2: i32) -> (i32, i32) {
    %c0_i32 = arith.constant 0 : i32
    %c0_i32_0 = arith.constant 0 : i32
    return %c0_i32, %arg0 : i32, i32
  }
}

module attributes {stable_mosaic.version = 11 : i64} {
  func.func @_bn_apply_kernel(%arg0: i32, %arg1: memref<512x128xf32, #tpu.memory_space<vmem>>, %arg2: memref<1x128xf32, #tpu.memory_space<vmem>>, %arg3: memref<1x128xf32, #tpu.memory_space<vmem>>, %arg4: memref<512x128xf32, #tpu.memory_space<vmem>>) attributes {dimension_semantics = [#tpu.dimension_semantics<parallel>], iteration_bounds = array<i64: 1>, scalar_prefetch = 0 : i64, scratch_operands = 0 : i64, tpu.core_type = #tpu.core_type<tc>, window_params = [{transform_indices = @transform_0, window_bounds = array<i64: 512, 128>}, {pipeline_mode = #tpu.pipeline_mode<synchronous>, transform_indices = @transform_1, window_bounds = array<i64: 1, 128>}, {pipeline_mode = #tpu.pipeline_mode<synchronous>, transform_indices = @transform_2, window_bounds = array<i64: 1, 128>}, {transform_indices = @transform_3, window_bounds = array<i64: 512, 128>}]} {
    %c0 = arith.constant 0 : index
    %c0_0 = arith.constant 0 : index
    %0 = vector.load %arg1[%c0, %c0_0] : memref<512x128xf32, #tpu.memory_space<vmem>>, vector<512x128xf32>
    %c0_1 = arith.constant 0 : index
    %c0_2 = arith.constant 0 : index
    %1 = vector.load %arg2[%c0_1, %c0_2] : memref<1x128xf32, #tpu.memory_space<vmem>>, vector<1x128xf32>
    %2 = vector.broadcast %1 : vector<1x128xf32> to vector<512x128xf32>
    %3 = arith.mulf %0, %2 : vector<512x128xf32>
    %c0_3 = arith.constant 0 : index
    %c0_4 = arith.constant 0 : index
    %4 = vector.load %arg3[%c0_3, %c0_4] : memref<1x128xf32, #tpu.memory_space<vmem>>, vector<1x128xf32>
    %5 = vector.broadcast %4 : vector<1x128xf32> to vector<512x128xf32>
    %6 = arith.addf %3, %5 : vector<512x128xf32>
    %cst = arith.constant 0.000000e+00 : f32
    %7 = vector.broadcast %cst : f32 to vector<512x128xf32>
    %8 = arith.cmpf ogt, %6, %7 : vector<512x128xf32>
    %cst_5 = arith.constant 1.000000e-01 : f32
    %9 = vector.broadcast %cst_5 : f32 to vector<512x128xf32>
    %10 = arith.mulf %9, %6 : vector<512x128xf32>
    %11 = arith.select %8, %6, %10 : vector<512x128xi1>, vector<512x128xf32>
    %c0_6 = arith.constant 0 : index
    %c0_7 = arith.constant 0 : index
    %12 = vector.load %arg4[%c0_6, %c0_7] : memref<512x128xf32, #tpu.memory_space<vmem>>, vector<512x128xf32>
    tpu.vector_store %arg4[%c0_6, %c0_7], %11 {strides = array<i32>} : memref<512x128xf32, #tpu.memory_space<vmem>>, vector<512x128xf32>,
    return
  }
  func.func @transform_0(%arg0: i32) -> (i32, i32) {
    %c0_i32 = arith.constant 0 : i32
    %c0_i32_0 = arith.constant 0 : i32
    return %arg0, %c0_i32 : i32, i32
  }
  func.func @transform_1(%arg0: i32) -> (i32, i32) {
    %c0_i32 = arith.constant 0 : i32
    %c0_i32_0 = arith.constant 0 : i32
    %c0_i32_1 = arith.constant 0 : i32
    return %c0_i32, %c0_i32_0 : i32, i32
  }
  func.func @transform_2(%arg0: i32) -> (i32, i32) {
    %c0_i32 = arith.constant 0 : i32
    %c0_i32_0 = arith.constant 0 : i32
    %c0_i32_1 = arith.constant 0 : i32
    return %c0_i32, %c0_i32_0 : i32, i32
  }
  func.func @transform_3(%arg0: i32) -> (i32, i32) {
    %c0_i32 = arith.constant 0 : i32
    %c0_i32_0 = arith.constant 0 : i32
    return %arg0, %c0_i32 : i32, i32
  }
}

module attributes {stable_mosaic.version = 11 : i64} {
  func.func @_gemm_stats_kernel(%arg0: i32, %arg1: i32, %arg2: i32, %arg3: memref<128x128xbf16, #tpu.memory_space<vmem>>, %arg4: memref<128x128xbf16, #tpu.memory_space<vmem>>, %arg5: memref<128x128xf32, #tpu.memory_space<vmem>>, %arg6: memref<1x128xf32, #tpu.memory_space<vmem>>, %arg7: memref<1x128xf32, #tpu.memory_space<vmem>>, %arg8: memref<128x128xf32, #tpu.memory_space<vmem>>) attributes {dimension_semantics = [#tpu.dimension_semantics<parallel>, #tpu.dimension_semantics<arbitrary>, #tpu.dimension_semantics<arbitrary>], iteration_bounds = array<i64: 1, 1, 1>, scalar_prefetch = 0 : i64, scratch_operands = 1 : i64, tpu.core_type = #tpu.core_type<tc>, window_params = [{transform_indices = @transform_0, window_bounds = array<i64: 128, 128>}, {transform_indices = @transform_1, window_bounds = array<i64: 128, 128>}, {transform_indices = @transform_2, window_bounds = array<i64: 128, 128>}, {transform_indices = @transform_3, window_bounds = array<i64: 1, 128>}, {transform_indices = @transform_4, window_bounds = array<i64: 1, 128>}]} {
    %c0_i32 = arith.constant 0 : i32
    %0 = arith.cmpi eq, %arg2, %c0_i32 : i32
    %1 = arith.extui %0 : i1 to i32
    %c0_i32_0 = arith.constant 0 : i32
    %2 = arith.cmpi ne, %1, %c0_i32_0 : i32
    scf.if %2 {
      %cst_13 = arith.constant 0.000000e+00 : f32
      %17 = vector.broadcast %cst_13 : f32 to vector<128x128xf32>
      %c0_14 = arith.constant 0 : index
      %c0_15 = arith.constant 0 : index
      %18 = vector.load %arg8[%c0_14, %c0_15] : memref<128x128xf32, #tpu.memory_space<vmem>>, vector<128x128xf32>
      tpu.vector_store %arg8[%c0_14, %c0_15], %17 {strides = array<i32>} : memref<128x128xf32, #tpu.memory_space<vmem>>, vector<128x128xf32>,
    } else {
    }
    %c0_i32_1 = arith.constant 0 : i32
    %3 = arith.cmpi eq, %arg2, %c0_i32_1 : i32
    %c0_i32_2 = arith.constant 0 : i32
    %4 = arith.cmpi eq, %arg1, %c0_i32_2 : i32
    %5 = arith.andi %3, %4 : i1
    %6 = arith.extui %5 : i1 to i32
    %c0_i32_3 = arith.constant 0 : i32
    %7 = arith.cmpi ne, %6, %c0_i32_3 : i32
    scf.if %7 {
      %cst_13 = arith.constant 0.000000e+00 : f32
      %17 = vector.broadcast %cst_13 : f32 to vector<1x128xf32>
      %c0_14 = arith.constant 0 : index
      %c0_15 = arith.constant 0 : index
      %18 = vector.load %arg6[%c0_14, %c0_15] : memref<1x128xf32, #tpu.memory_space<vmem>>, vector<1x128xf32>
      tpu.vector_store %arg6[%c0_14, %c0_15], %17 {strides = array<i32>} : memref<1x128xf32, #tpu.memory_space<vmem>>, vector<1x128xf32>,
      %cst_16 = arith.constant 0.000000e+00 : f32
      %19 = vector.broadcast %cst_16 : f32 to vector<1x128xf32>
      %c0_17 = arith.constant 0 : index
      %c0_18 = arith.constant 0 : index
      %20 = vector.load %arg7[%c0_17, %c0_18] : memref<1x128xf32, #tpu.memory_space<vmem>>, vector<1x128xf32>
      tpu.vector_store %arg7[%c0_17, %c0_18], %19 {strides = array<i32>} : memref<1x128xf32, #tpu.memory_space<vmem>>, vector<1x128xf32>,
    } else {
    }
    %c0 = arith.constant 0 : index
    %c0_4 = arith.constant 0 : index
    %8 = vector.load %arg8[%c0, %c0_4] : memref<128x128xf32, #tpu.memory_space<vmem>>, vector<128x128xf32>
    %c0_5 = arith.constant 0 : index
    %c0_6 = arith.constant 0 : index
    %9 = vector.load %arg3[%c0_5, %c0_6] : memref<128x128xbf16, #tpu.memory_space<vmem>>, vector<128x128xbf16>
    %c0_7 = arith.constant 0 : index
    %c0_8 = arith.constant 0 : index
    %10 = vector.load %arg4[%c0_7, %c0_8] : memref<128x128xbf16, #tpu.memory_space<vmem>>, vector<128x128xbf16>
    %cst = arith.constant dense<0.000000e+00> : vector<128x128xf32>
    %11 = tpu.matmul %9, %10, %cst {dimension_numbers = #tpu.dot_dimension_numbers<[1], [0], [0], [1], [0, 0, 1, 1], [], []>} : vector<128x128xbf16>, vector<128x128xbf16>, vector<128x128xf32> -> vector<128x128xf32>
    %12 = arith.addf %8, %11 : vector<128x128xf32>
    %c0_9 = arith.constant 0 : index
    %c0_10 = arith.constant 0 : index
    %13 = vector.load %arg8[%c0_9, %c0_10] : memref<128x128xf32, #tpu.memory_space<vmem>>, vector<128x128xf32>
    tpu.vector_store %arg8[%c0_9, %c0_10], %12 {strides = array<i32>} : memref<128x128xf32, #tpu.memory_space<vmem>>, vector<128x128xf32>,
    %c0_i32_11 = arith.constant 0 : i32
    %14 = arith.cmpi eq, %arg2, %c0_i32_11 : i32
    %15 = arith.extui %14 : i1 to i32
    %c0_i32_12 = arith.constant 0 : i32
    %16 = arith.cmpi ne, %15, %c0_i32_12 : i32
    scf.if %16 {
      %c0_13 = arith.constant 0 : index
      %c0_14 = arith.constant 0 : index
      %17 = vector.load %arg8[%c0_13, %c0_14] : memref<128x128xf32, #tpu.memory_space<vmem>>, vector<128x128xf32>
      %c0_15 = arith.constant 0 : index
      %c0_16 = arith.constant 0 : index
      %18 = vector.load %arg5[%c0_15, %c0_16] : memref<128x128xf32, #tpu.memory_space<vmem>>, vector<128x128xf32>
      tpu.vector_store %arg5[%c0_15, %c0_16], %17 {strides = array<i32>} : memref<128x128xf32, #tpu.memory_space<vmem>>, vector<128x128xf32>,
      %c0_17 = arith.constant 0 : index
      %c0_18 = arith.constant 0 : index
      %19 = vector.load %arg6[%c0_17, %c0_18] : memref<1x128xf32, #tpu.memory_space<vmem>>, vector<1x128xf32>
      %cst_19 = arith.constant dense<0.000000e+00> : vector<128xf32>
      %20 = vector.multi_reduction <add>, %17, %cst_19 [0] : vector<128x128xf32> to vector<128xf32>
      %21 = vector.shape_cast %20 : vector<128xf32> to vector<1x128xf32>
      %22 = arith.addf %19, %21 : vector<1x128xf32>
      %c0_20 = arith.constant 0 : index
      %c0_21 = arith.constant 0 : index
      %23 = vector.load %arg6[%c0_20, %c0_21] : memref<1x128xf32, #tpu.memory_space<vmem>>, vector<1x128xf32>
      tpu.vector_store %arg6[%c0_20, %c0_21], %22 {strides = array<i32>} : memref<1x128xf32, #tpu.memory_space<vmem>>, vector<1x128xf32>,
      %c0_22 = arith.constant 0 : index
      %c0_23 = arith.constant 0 : index
      %24 = vector.load %arg7[%c0_22, %c0_23] : memref<1x128xf32, #tpu.memory_space<vmem>>, vector<1x128xf32>
      %25 = arith.mulf %17, %17 : vector<128x128xf32>
      %cst_24 = arith.constant dense<0.000000e+00> : vector<128xf32>
      %26 = vector.multi_reduction <add>, %25, %cst_24 [0] : vector<128x128xf32> to vector<128xf32>
      %27 = vector.shape_cast %26 : vector<128xf32> to vector<1x128xf32>
      %28 = arith.addf %24, %27 : vector<1x128xf32>
      %c0_25 = arith.constant 0 : index
      %c0_26 = arith.constant 0 : index
      %29 = vector.load %arg7[%c0_25, %c0_26] : memref<1x128xf32, #tpu.memory_space<vmem>>, vector<1x128xf32>
      tpu.vector_store %arg7[%c0_25, %c0_26], %28 {strides = array<i32>} : memref<1x128xf32, #tpu.memory_space<vmem>>, vector<1x128xf32>,
    } else {
    }
    return
  }
  func.func @transform_0(%arg0: i32, %arg1: i32, %arg2: i32) -> (i32, i32) {
    %c0_i32 = arith.constant 0 : i32
    return %arg1, %arg2 : i32, i32
  }
  func.func @transform_1(%arg0: i32, %arg1: i32, %arg2: i32) -> (i32, i32) {
    %c0_i32 = arith.constant 0 : i32
    return %arg2, %arg0 : i32, i32
  }
  func.func @transform_2(%arg0: i32, %arg1: i32, %arg2: i32) -> (i32, i32) {
    %c0_i32 = arith.constant 0 : i32
    return %arg1, %arg0 : i32, i32
  }
  func.func @transform_3(%arg0: i32, %arg1: i32, %arg2: i32) -> (i32, i32) {
    %c0_i32 = arith.constant 0 : i32
    %c0_i32_0 = arith.constant 0 : i32
    return %c0_i32, %arg0 : i32, i32
  }
  func.func @transform_4(%arg0: i32, %arg1: i32, %arg2: i32) -> (i32, i32) {
    %c0_i32 = arith.constant 0 : i32
    %c0_i32_0 = arith.constant 0 : i32
    return %c0_i32, %arg0 : i32, i32
  }
}

module attributes {stable_mosaic.version = 11 : i64} {
  func.func @_bn_apply_kernel(%arg0: i32, %arg1: memref<128x128xf32, #tpu.memory_space<vmem>>, %arg2: memref<1x128xf32, #tpu.memory_space<vmem>>, %arg3: memref<1x128xf32, #tpu.memory_space<vmem>>, %arg4: memref<128x128xf32, #tpu.memory_space<vmem>>) attributes {dimension_semantics = [#tpu.dimension_semantics<parallel>], iteration_bounds = array<i64: 1>, scalar_prefetch = 0 : i64, scratch_operands = 0 : i64, tpu.core_type = #tpu.core_type<tc>, window_params = [{transform_indices = @transform_0, window_bounds = array<i64: 128, 128>}, {pipeline_mode = #tpu.pipeline_mode<synchronous>, transform_indices = @transform_1, window_bounds = array<i64: 1, 128>}, {pipeline_mode = #tpu.pipeline_mode<synchronous>, transform_indices = @transform_2, window_bounds = array<i64: 1, 128>}, {transform_indices = @transform_3, window_bounds = array<i64: 128, 128>}]} {
    %c0 = arith.constant 0 : index
    %c0_0 = arith.constant 0 : index
    %0 = vector.load %arg1[%c0, %c0_0] : memref<128x128xf32, #tpu.memory_space<vmem>>, vector<128x128xf32>
    %c0_1 = arith.constant 0 : index
    %c0_2 = arith.constant 0 : index
    %1 = vector.load %arg2[%c0_1, %c0_2] : memref<1x128xf32, #tpu.memory_space<vmem>>, vector<1x128xf32>
    %2 = vector.broadcast %1 : vector<1x128xf32> to vector<128x128xf32>
    %3 = arith.mulf %0, %2 : vector<128x128xf32>
    %c0_3 = arith.constant 0 : index
    %c0_4 = arith.constant 0 : index
    %4 = vector.load %arg3[%c0_3, %c0_4] : memref<1x128xf32, #tpu.memory_space<vmem>>, vector<1x128xf32>
    %5 = vector.broadcast %4 : vector<1x128xf32> to vector<128x128xf32>
    %6 = arith.addf %3, %5 : vector<128x128xf32>
    %cst = arith.constant 0.000000e+00 : f32
    %7 = vector.broadcast %cst : f32 to vector<128x128xf32>
    %8 = arith.cmpf ogt, %6, %7 : vector<128x128xf32>
    %cst_5 = arith.constant 1.000000e-01 : f32
    %9 = vector.broadcast %cst_5 : f32 to vector<128x128xf32>
    %10 = arith.mulf %9, %6 : vector<128x128xf32>
    %11 = arith.select %8, %6, %10 : vector<128x128xi1>, vector<128x128xf32>
    %c0_6 = arith.constant 0 : index
    %c0_7 = arith.constant 0 : index
    %12 = vector.load %arg4[%c0_6, %c0_7] : memref<128x128xf32, #tpu.memory_space<vmem>>, vector<128x128xf32>
    tpu.vector_store %arg4[%c0_6, %c0_7], %11 {strides = array<i32>} : memref<128x128xf32, #tpu.memory_space<vmem>>, vector<128x128xf32>,
    return
  }
  func.func @transform_0(%arg0: i32) -> (i32, i32) {
    %c0_i32 = arith.constant 0 : i32
    %c0_i32_0 = arith.constant 0 : i32
    return %arg0, %c0_i32 : i32, i32
  }
  func.func @transform_1(%arg0: i32) -> (i32, i32) {
    %c0_i32 = arith.constant 0 : i32
    %c0_i32_0 = arith.constant 0 : i32
    %c0_i32_1 = arith.constant 0 : i32
    return %c0_i32, %c0_i32_0 : i32, i32
  }
  func.func @transform_2(%arg0: i32) -> (i32, i32) {
    %c0_i32 = arith.constant 0 : i32
    %c0_i32_0 = arith.constant 0 : i32
    %c0_i32_1 = arith.constant 0 : i32
    return %c0_i32, %c0_i32_0 : i32, i32
  }
  func.func @transform_3(%arg0: i32) -> (i32, i32) {
    %c0_i32 = arith.constant 0 : i32
    %c0_i32_0 = arith.constant 0 : i32
    return %arg0, %c0_i32 : i32, i32
  }
}

module attributes {stable_mosaic.version = 11 : i64} {
  func.func @_add_kernel(%arg0: i32, %arg1: memref<8x1024xf32, #tpu.memory_space<vmem>>, %arg2: memref<8x1024xf32, #tpu.memory_space<vmem>>, %arg3: memref<8x1024xf32, #tpu.memory_space<vmem>>) attributes {dimension_semantics = [#tpu.dimension_semantics<parallel>], iteration_bounds = array<i64: 1>, scalar_prefetch = 0 : i64, scratch_operands = 0 : i64, tpu.core_type = #tpu.core_type<tc>, window_params = [{transform_indices = @transform_0, window_bounds = array<i64: 8, 1024>}, {transform_indices = @transform_1, window_bounds = array<i64: 8, 1024>}, {transform_indices = @transform_2, window_bounds = array<i64: 8, 1024>}]} {
    %c0 = arith.constant 0 : index
    %c0_0 = arith.constant 0 : index
    %0 = vector.load %arg1[%c0, %c0_0] : memref<8x1024xf32, #tpu.memory_space<vmem>>, vector<8x1024xf32>
    %c0_1 = arith.constant 0 : index
    %c0_2 = arith.constant 0 : index
    %1 = vector.load %arg2[%c0_1, %c0_2] : memref<8x1024xf32, #tpu.memory_space<vmem>>, vector<8x1024xf32>
    %2 = arith.addf %0, %1 : vector<8x1024xf32>
    %c0_3 = arith.constant 0 : index
    %c0_4 = arith.constant 0 : index
    %3 = vector.load %arg3[%c0_3, %c0_4] : memref<8x1024xf32, #tpu.memory_space<vmem>>, vector<8x1024xf32>
    tpu.vector_store %arg3[%c0_3, %c0_4], %2 {strides = array<i32>} : memref<8x1024xf32, #tpu.memory_space<vmem>>, vector<8x1024xf32>,
    return
  }
  func.func @transform_0(%arg0: i32) -> (i32, i32) {
    %c0_i32 = arith.constant 0 : i32
    %c0_i32_0 = arith.constant 0 : i32
    return %arg0, %c0_i32 : i32, i32
  }
  func.func @transform_1(%arg0: i32) -> (i32, i32) {
    %c0_i32 = arith.constant 0 : i32
    %c0_i32_0 = arith.constant 0 : i32
    return %arg0, %c0_i32 : i32, i32
  }
  func.func @transform_2(%arg0: i32) -> (i32, i32) {
    %c0_i32 = arith.constant 0 : i32
    %c0_i32_0 = arith.constant 0 : i32
    return %arg0, %c0_i32 : i32, i32
  }
}

module attributes {stable_mosaic.version = 11 : i64} {
  func.func @_gemm_stats_kernel(%arg0: i32, %arg1: i32, %arg2: i32, %arg3: memref<32x256xbf16, #tpu.memory_space<vmem>>, %arg4: memref<256x128xbf16, #tpu.memory_space<vmem>>, %arg5: memref<32x128xf32, #tpu.memory_space<vmem>>, %arg6: memref<1x128xf32, #tpu.memory_space<vmem>>, %arg7: memref<1x128xf32, #tpu.memory_space<vmem>>, %arg8: memref<32x128xf32, #tpu.memory_space<vmem>>) attributes {dimension_semantics = [#tpu.dimension_semantics<parallel>, #tpu.dimension_semantics<arbitrary>, #tpu.dimension_semantics<arbitrary>], iteration_bounds = array<i64: 1, 1, 1>, scalar_prefetch = 0 : i64, scratch_operands = 1 : i64, tpu.core_type = #tpu.core_type<tc>, window_params = [{transform_indices = @transform_0, window_bounds = array<i64: 32, 256>}, {transform_indices = @transform_1, window_bounds = array<i64: 256, 128>}, {transform_indices = @transform_2, window_bounds = array<i64: 32, 128>}, {transform_indices = @transform_3, window_bounds = array<i64: 1, 128>}, {transform_indices = @transform_4, window_bounds = array<i64: 1, 128>}]} {
    %c0_i32 = arith.constant 0 : i32
    %0 = arith.cmpi eq, %arg2, %c0_i32 : i32
    %1 = arith.extui %0 : i1 to i32
    %c0_i32_0 = arith.constant 0 : i32
    %2 = arith.cmpi ne, %1, %c0_i32_0 : i32
    scf.if %2 {
      %cst_13 = arith.constant 0.000000e+00 : f32
      %17 = vector.broadcast %cst_13 : f32 to vector<32x128xf32>
      %c0_14 = arith.constant 0 : index
      %c0_15 = arith.constant 0 : index
      %18 = vector.load %arg8[%c0_14, %c0_15] : memref<32x128xf32, #tpu.memory_space<vmem>>, vector<32x128xf32>
      tpu.vector_store %arg8[%c0_14, %c0_15], %17 {strides = array<i32>} : memref<32x128xf32, #tpu.memory_space<vmem>>, vector<32x128xf32>,
    } else {
    }
    %c0_i32_1 = arith.constant 0 : i32
    %3 = arith.cmpi eq, %arg2, %c0_i32_1 : i32
    %c0_i32_2 = arith.constant 0 : i32
    %4 = arith.cmpi eq, %arg1, %c0_i32_2 : i32
    %5 = arith.andi %3, %4 : i1
    %6 = arith.extui %5 : i1 to i32
    %c0_i32_3 = arith.constant 0 : i32
    %7 = arith.cmpi ne, %6, %c0_i32_3 : i32
    scf.if %7 {
      %cst_13 = arith.constant 0.000000e+00 : f32
      %17 = vector.broadcast %cst_13 : f32 to vector<1x128xf32>
      %c0_14 = arith.constant 0 : index
      %c0_15 = arith.constant 0 : index
      %18 = vector.load %arg6[%c0_14, %c0_15] : memref<1x128xf32, #tpu.memory_space<vmem>>, vector<1x128xf32>
      tpu.vector_store %arg6[%c0_14, %c0_15], %17 {strides = array<i32>} : memref<1x128xf32, #tpu.memory_space<vmem>>, vector<1x128xf32>,
      %cst_16 = arith.constant 0.000000e+00 : f32
      %19 = vector.broadcast %cst_16 : f32 to vector<1x128xf32>
      %c0_17 = arith.constant 0 : index
      %c0_18 = arith.constant 0 : index
      %20 = vector.load %arg7[%c0_17, %c0_18] : memref<1x128xf32, #tpu.memory_space<vmem>>, vector<1x128xf32>
      tpu.vector_store %arg7[%c0_17, %c0_18], %19 {strides = array<i32>} : memref<1x128xf32, #tpu.memory_space<vmem>>, vector<1x128xf32>,
    } else {
    }
    %c0 = arith.constant 0 : index
    %c0_4 = arith.constant 0 : index
    %8 = vector.load %arg8[%c0, %c0_4] : memref<32x128xf32, #tpu.memory_space<vmem>>, vector<32x128xf32>
    %c0_5 = arith.constant 0 : index
    %c0_6 = arith.constant 0 : index
    %9 = vector.load %arg3[%c0_5, %c0_6] : memref<32x256xbf16, #tpu.memory_space<vmem>>, vector<32x256xbf16>
    %c0_7 = arith.constant 0 : index
    %c0_8 = arith.constant 0 : index
    %10 = vector.load %arg4[%c0_7, %c0_8] : memref<256x128xbf16, #tpu.memory_space<vmem>>, vector<256x128xbf16>
    %cst = arith.constant dense<0.000000e+00> : vector<32x128xf32>
    %11 = tpu.matmul %9, %10, %cst {dimension_numbers = #tpu.dot_dimension_numbers<[1], [0], [0], [1], [0, 0, 1, 1], [], []>} : vector<32x256xbf16>, vector<256x128xbf16>, vector<32x128xf32> -> vector<32x128xf32>
    %12 = arith.addf %8, %11 : vector<32x128xf32>
    %c0_9 = arith.constant 0 : index
    %c0_10 = arith.constant 0 : index
    %13 = vector.load %arg8[%c0_9, %c0_10] : memref<32x128xf32, #tpu.memory_space<vmem>>, vector<32x128xf32>
    tpu.vector_store %arg8[%c0_9, %c0_10], %12 {strides = array<i32>} : memref<32x128xf32, #tpu.memory_space<vmem>>, vector<32x128xf32>,
    %c0_i32_11 = arith.constant 0 : i32
    %14 = arith.cmpi eq, %arg2, %c0_i32_11 : i32
    %15 = arith.extui %14 : i1 to i32
    %c0_i32_12 = arith.constant 0 : i32
    %16 = arith.cmpi ne, %15, %c0_i32_12 : i32
    scf.if %16 {
      %c0_13 = arith.constant 0 : index
      %c0_14 = arith.constant 0 : index
      %17 = vector.load %arg8[%c0_13, %c0_14] : memref<32x128xf32, #tpu.memory_space<vmem>>, vector<32x128xf32>
      %c0_15 = arith.constant 0 : index
      %c0_16 = arith.constant 0 : index
      %18 = vector.load %arg5[%c0_15, %c0_16] : memref<32x128xf32, #tpu.memory_space<vmem>>, vector<32x128xf32>
      tpu.vector_store %arg5[%c0_15, %c0_16], %17 {strides = array<i32>} : memref<32x128xf32, #tpu.memory_space<vmem>>, vector<32x128xf32>,
      %c0_17 = arith.constant 0 : index
      %c0_18 = arith.constant 0 : index
      %19 = vector.load %arg6[%c0_17, %c0_18] : memref<1x128xf32, #tpu.memory_space<vmem>>, vector<1x128xf32>
      %cst_19 = arith.constant dense<0.000000e+00> : vector<128xf32>
      %20 = vector.multi_reduction <add>, %17, %cst_19 [0] : vector<32x128xf32> to vector<128xf32>
      %21 = vector.shape_cast %20 : vector<128xf32> to vector<1x128xf32>
      %22 = arith.addf %19, %21 : vector<1x128xf32>
      %c0_20 = arith.constant 0 : index
      %c0_21 = arith.constant 0 : index
      %23 = vector.load %arg6[%c0_20, %c0_21] : memref<1x128xf32, #tpu.memory_space<vmem>>, vector<1x128xf32>
      tpu.vector_store %arg6[%c0_20, %c0_21], %22 {strides = array<i32>} : memref<1x128xf32, #tpu.memory_space<vmem>>, vector<1x128xf32>,
      %c0_22 = arith.constant 0 : index
      %c0_23 = arith.constant 0 : index
      %24 = vector.load %arg7[%c0_22, %c0_23] : memref<1x128xf32, #tpu.memory_space<vmem>>, vector<1x128xf32>
      %25 = arith.mulf %17, %17 : vector<32x128xf32>
      %cst_24 = arith.constant dense<0.000000e+00> : vector<128xf32>
      %26 = vector.multi_reduction <add>, %25, %cst_24 [0] : vector<32x128xf32> to vector<128xf32>
      %27 = vector.shape_cast %26 : vector<128xf32> to vector<1x128xf32>
      %28 = arith.addf %24, %27 : vector<1x128xf32>
      %c0_25 = arith.constant 0 : index
      %c0_26 = arith.constant 0 : index
      %29 = vector.load %arg7[%c0_25, %c0_26] : memref<1x128xf32, #tpu.memory_space<vmem>>, vector<1x128xf32>
      tpu.vector_store %arg7[%c0_25, %c0_26], %28 {strides = array<i32>} : memref<1x128xf32, #tpu.memory_space<vmem>>, vector<1x128xf32>,
    } else {
    }
    return
  }
  func.func @transform_0(%arg0: i32, %arg1: i32, %arg2: i32) -> (i32, i32) {
    %c0_i32 = arith.constant 0 : i32
    return %arg1, %arg2 : i32, i32
  }
  func.func @transform_1(%arg0: i32, %arg1: i32, %arg2: i32) -> (i32, i32) {
    %c0_i32 = arith.constant 0 : i32
    return %arg2, %arg0 : i32, i32
  }
  func.func @transform_2(%arg0: i32, %arg1: i32, %arg2: i32) -> (i32, i32) {
    %c0_i32 = arith.constant 0 : i32
    return %arg1, %arg0 : i32, i32
  }
  func.func @transform_3(%arg0: i32, %arg1: i32, %arg2: i32) -> (i32, i32) {
    %c0_i32 = arith.constant 0 : i32
    %c0_i32_0 = arith.constant 0 : i32
    return %c0_i32, %arg0 : i32, i32
  }
  func.func @transform_4(%arg0: i32, %arg1: i32, %arg2: i32) -> (i32, i32) {
    %c0_i32 = arith.constant 0 : i32
    %c0_i32_0 = arith.constant 0 : i32
    return %c0_i32, %arg0 : i32, i32
  }
}

module attributes {stable_mosaic.version = 11 : i64} {
  func.func @_bn_apply_kernel(%arg0: i32, %arg1: memref<32x128xf32, #tpu.memory_space<vmem>>, %arg2: memref<1x128xf32, #tpu.memory_space<vmem>>, %arg3: memref<1x128xf32, #tpu.memory_space<vmem>>, %arg4: memref<32x128xf32, #tpu.memory_space<vmem>>) attributes {dimension_semantics = [#tpu.dimension_semantics<parallel>], iteration_bounds = array<i64: 1>, scalar_prefetch = 0 : i64, scratch_operands = 0 : i64, tpu.core_type = #tpu.core_type<tc>, window_params = [{transform_indices = @transform_0, window_bounds = array<i64: 32, 128>}, {pipeline_mode = #tpu.pipeline_mode<synchronous>, transform_indices = @transform_1, window_bounds = array<i64: 1, 128>}, {pipeline_mode = #tpu.pipeline_mode<synchronous>, transform_indices = @transform_2, window_bounds = array<i64: 1, 128>}, {transform_indices = @transform_3, window_bounds = array<i64: 32, 128>}]} {
    %c0 = arith.constant 0 : index
    %c0_0 = arith.constant 0 : index
    %0 = vector.load %arg1[%c0, %c0_0] : memref<32x128xf32, #tpu.memory_space<vmem>>, vector<32x128xf32>
    %c0_1 = arith.constant 0 : index
    %c0_2 = arith.constant 0 : index
    %1 = vector.load %arg2[%c0_1, %c0_2] : memref<1x128xf32, #tpu.memory_space<vmem>>, vector<1x128xf32>
    %2 = vector.broadcast %1 : vector<1x128xf32> to vector<32x128xf32>
    %3 = arith.mulf %0, %2 : vector<32x128xf32>
    %c0_3 = arith.constant 0 : index
    %c0_4 = arith.constant 0 : index
    %4 = vector.load %arg3[%c0_3, %c0_4] : memref<1x128xf32, #tpu.memory_space<vmem>>, vector<1x128xf32>
    %5 = vector.broadcast %4 : vector<1x128xf32> to vector<32x128xf32>
    %6 = arith.addf %3, %5 : vector<32x128xf32>
    %cst = arith.constant 0.000000e+00 : f32
    %7 = vector.broadcast %cst : f32 to vector<32x128xf32>
    %8 = arith.cmpf ogt, %6, %7 : vector<32x128xf32>
    %cst_5 = arith.constant 1.000000e-01 : f32
    %9 = vector.broadcast %cst_5 : f32 to vector<32x128xf32>
    %10 = arith.mulf %9, %6 : vector<32x128xf32>
    %11 = arith.select %8, %6, %10 : vector<32x128xi1>, vector<32x128xf32>
    %c0_6 = arith.constant 0 : index
    %c0_7 = arith.constant 0 : index
    %12 = vector.load %arg4[%c0_6, %c0_7] : memref<32x128xf32, #tpu.memory_space<vmem>>, vector<32x128xf32>
    tpu.vector_store %arg4[%c0_6, %c0_7], %11 {strides = array<i32>} : memref<32x128xf32, #tpu.memory_space<vmem>>, vector<32x128xf32>,
    return
  }
  func.func @transform_0(%arg0: i32) -> (i32, i32) {
    %c0_i32 = arith.constant 0 : i32
    %c0_i32_0 = arith.constant 0 : i32
    return %arg0, %c0_i32 : i32, i32
  }
  func.func @transform_1(%arg0: i32) -> (i32, i32) {
    %c0_i32 = arith.constant 0 : i32
    %c0_i32_0 = arith.constant 0 : i32
    %c0_i32_1 = arith.constant 0 : i32
    return %c0_i32, %c0_i32_0 : i32, i32
  }
  func.func @transform_2(%arg0: i32) -> (i32, i32) {
    %c0_i32 = arith.constant 0 : i32
    %c0_i32_0 = arith.constant 0 : i32
    %c0_i32_1 = arith.constant 0 : i32
    return %c0_i32, %c0_i32_0 : i32, i32
  }
  func.func @transform_3(%arg0: i32) -> (i32, i32) {
    %c0_i32 = arith.constant 0 : i32
    %c0_i32_0 = arith.constant 0 : i32
    return %arg0, %c0_i32 : i32, i32
  }
}

module attributes {stable_mosaic.version = 11 : i64} {
  func.func @_gemm_stats_kernel(%arg0: i32, %arg1: i32, %arg2: i32, %arg3: memref<32x384xbf16, #tpu.memory_space<vmem>>, %arg4: memref<384x128xbf16, #tpu.memory_space<vmem>>, %arg5: memref<32x128xf32, #tpu.memory_space<vmem>>, %arg6: memref<1x128xf32, #tpu.memory_space<vmem>>, %arg7: memref<1x128xf32, #tpu.memory_space<vmem>>, %arg8: memref<32x128xf32, #tpu.memory_space<vmem>>) attributes {dimension_semantics = [#tpu.dimension_semantics<parallel>, #tpu.dimension_semantics<arbitrary>, #tpu.dimension_semantics<arbitrary>], iteration_bounds = array<i64: 1, 1, 1>, scalar_prefetch = 0 : i64, scratch_operands = 1 : i64, tpu.core_type = #tpu.core_type<tc>, window_params = [{transform_indices = @transform_0, window_bounds = array<i64: 32, 384>}, {transform_indices = @transform_1, window_bounds = array<i64: 384, 128>}, {transform_indices = @transform_2, window_bounds = array<i64: 32, 128>}, {transform_indices = @transform_3, window_bounds = array<i64: 1, 128>}, {transform_indices = @transform_4, window_bounds = array<i64: 1, 128>}]} {
    %c0_i32 = arith.constant 0 : i32
    %0 = arith.cmpi eq, %arg2, %c0_i32 : i32
    %1 = arith.extui %0 : i1 to i32
    %c0_i32_0 = arith.constant 0 : i32
    %2 = arith.cmpi ne, %1, %c0_i32_0 : i32
    scf.if %2 {
      %cst_13 = arith.constant 0.000000e+00 : f32
      %17 = vector.broadcast %cst_13 : f32 to vector<32x128xf32>
      %c0_14 = arith.constant 0 : index
      %c0_15 = arith.constant 0 : index
      %18 = vector.load %arg8[%c0_14, %c0_15] : memref<32x128xf32, #tpu.memory_space<vmem>>, vector<32x128xf32>
      tpu.vector_store %arg8[%c0_14, %c0_15], %17 {strides = array<i32>} : memref<32x128xf32, #tpu.memory_space<vmem>>, vector<32x128xf32>,
    } else {
    }
    %c0_i32_1 = arith.constant 0 : i32
    %3 = arith.cmpi eq, %arg2, %c0_i32_1 : i32
    %c0_i32_2 = arith.constant 0 : i32
    %4 = arith.cmpi eq, %arg1, %c0_i32_2 : i32
    %5 = arith.andi %3, %4 : i1
    %6 = arith.extui %5 : i1 to i32
    %c0_i32_3 = arith.constant 0 : i32
    %7 = arith.cmpi ne, %6, %c0_i32_3 : i32
    scf.if %7 {
      %cst_13 = arith.constant 0.000000e+00 : f32
      %17 = vector.broadcast %cst_13 : f32 to vector<1x128xf32>
      %c0_14 = arith.constant 0 : index
      %c0_15 = arith.constant 0 : index
      %18 = vector.load %arg6[%c0_14, %c0_15] : memref<1x128xf32, #tpu.memory_space<vmem>>, vector<1x128xf32>
      tpu.vector_store %arg6[%c0_14, %c0_15], %17 {strides = array<i32>} : memref<1x128xf32, #tpu.memory_space<vmem>>, vector<1x128xf32>,
      %cst_16 = arith.constant 0.000000e+00 : f32
      %19 = vector.broadcast %cst_16 : f32 to vector<1x128xf32>
      %c0_17 = arith.constant 0 : index
      %c0_18 = arith.constant 0 : index
      %20 = vector.load %arg7[%c0_17, %c0_18] : memref<1x128xf32, #tpu.memory_space<vmem>>, vector<1x128xf32>
      tpu.vector_store %arg7[%c0_17, %c0_18], %19 {strides = array<i32>} : memref<1x128xf32, #tpu.memory_space<vmem>>, vector<1x128xf32>,
    } else {
    }
    %c0 = arith.constant 0 : index
    %c0_4 = arith.constant 0 : index
    %8 = vector.load %arg8[%c0, %c0_4] : memref<32x128xf32, #tpu.memory_space<vmem>>, vector<32x128xf32>
    %c0_5 = arith.constant 0 : index
    %c0_6 = arith.constant 0 : index
    %9 = vector.load %arg3[%c0_5, %c0_6] : memref<32x384xbf16, #tpu.memory_space<vmem>>, vector<32x384xbf16>
    %c0_7 = arith.constant 0 : index
    %c0_8 = arith.constant 0 : index
    %10 = vector.load %arg4[%c0_7, %c0_8] : memref<384x128xbf16, #tpu.memory_space<vmem>>, vector<384x128xbf16>
    %cst = arith.constant dense<0.000000e+00> : vector<32x128xf32>
    %11 = tpu.matmul %9, %10, %cst {dimension_numbers = #tpu.dot_dimension_numbers<[1], [0], [0], [1], [0, 0, 1, 1], [], []>} : vector<32x384xbf16>, vector<384x128xbf16>, vector<32x128xf32> -> vector<32x128xf32>
    %12 = arith.addf %8, %11 : vector<32x128xf32>
    %c0_9 = arith.constant 0 : index
    %c0_10 = arith.constant 0 : index
    %13 = vector.load %arg8[%c0_9, %c0_10] : memref<32x128xf32, #tpu.memory_space<vmem>>, vector<32x128xf32>
    tpu.vector_store %arg8[%c0_9, %c0_10], %12 {strides = array<i32>} : memref<32x128xf32, #tpu.memory_space<vmem>>, vector<32x128xf32>,
    %c0_i32_11 = arith.constant 0 : i32
    %14 = arith.cmpi eq, %arg2, %c0_i32_11 : i32
    %15 = arith.extui %14 : i1 to i32
    %c0_i32_12 = arith.constant 0 : i32
    %16 = arith.cmpi ne, %15, %c0_i32_12 : i32
    scf.if %16 {
      %c0_13 = arith.constant 0 : index
      %c0_14 = arith.constant 0 : index
      %17 = vector.load %arg8[%c0_13, %c0_14] : memref<32x128xf32, #tpu.memory_space<vmem>>, vector<32x128xf32>
      %c0_15 = arith.constant 0 : index
      %c0_16 = arith.constant 0 : index
      %18 = vector.load %arg5[%c0_15, %c0_16] : memref<32x128xf32, #tpu.memory_space<vmem>>, vector<32x128xf32>
      tpu.vector_store %arg5[%c0_15, %c0_16], %17 {strides = array<i32>} : memref<32x128xf32, #tpu.memory_space<vmem>>, vector<32x128xf32>,
      %c0_17 = arith.constant 0 : index
      %c0_18 = arith.constant 0 : index
      %19 = vector.load %arg6[%c0_17, %c0_18] : memref<1x128xf32, #tpu.memory_space<vmem>>, vector<1x128xf32>
      %cst_19 = arith.constant dense<0.000000e+00> : vector<128xf32>
      %20 = vector.multi_reduction <add>, %17, %cst_19 [0] : vector<32x128xf32> to vector<128xf32>
      %21 = vector.shape_cast %20 : vector<128xf32> to vector<1x128xf32>
      %22 = arith.addf %19, %21 : vector<1x128xf32>
      %c0_20 = arith.constant 0 : index
      %c0_21 = arith.constant 0 : index
      %23 = vector.load %arg6[%c0_20, %c0_21] : memref<1x128xf32, #tpu.memory_space<vmem>>, vector<1x128xf32>
      tpu.vector_store %arg6[%c0_20, %c0_21], %22 {strides = array<i32>} : memref<1x128xf32, #tpu.memory_space<vmem>>, vector<1x128xf32>,
      %c0_22 = arith.constant 0 : index
      %c0_23 = arith.constant 0 : index
      %24 = vector.load %arg7[%c0_22, %c0_23] : memref<1x128xf32, #tpu.memory_space<vmem>>, vector<1x128xf32>
      %25 = arith.mulf %17, %17 : vector<32x128xf32>
      %cst_24 = arith.constant dense<0.000000e+00> : vector<128xf32>
      %26 = vector.multi_reduction <add>, %25, %cst_24 [0] : vector<32x128xf32> to vector<128xf32>
      %27 = vector.shape_cast %26 : vector<128xf32> to vector<1x128xf32>
      %28 = arith.addf %24, %27 : vector<1x128xf32>
      %c0_25 = arith.constant 0 : index
      %c0_26 = arith.constant 0 : index
      %29 = vector.load %arg7[%c0_25, %c0_26] : memref<1x128xf32, #tpu.memory_space<vmem>>, vector<1x128xf32>
      tpu.vector_store %arg7[%c0_25, %c0_26], %28 {strides = array<i32>} : memref<1x128xf32, #tpu.memory_space<vmem>>, vector<1x128xf32>,
    } else {
    }
    return
  }
  func.func @transform_0(%arg0: i32, %arg1: i32, %arg2: i32) -> (i32, i32) {
    %c0_i32 = arith.constant 0 : i32
    return %arg1, %arg2 : i32, i32
  }
  func.func @transform_1(%arg0: i32, %arg1: i32, %arg2: i32) -> (i32, i32) {
    %c0_i32 = arith.constant 0 : i32
    return %arg2, %arg0 : i32, i32
  }
  func.func @transform_2(%arg0: i32, %arg1: i32, %arg2: i32) -> (i32, i32) {
    %c0_i32 = arith.constant 0 : i32
    return %arg1, %arg0 : i32, i32
  }
  func.func @transform_3(%arg0: i32, %arg1: i32, %arg2: i32) -> (i32, i32) {
    %c0_i32 = arith.constant 0 : i32
    %c0_i32_0 = arith.constant 0 : i32
    return %c0_i32, %arg0 : i32, i32
  }
  func.func @transform_4(%arg0: i32, %arg1: i32, %arg2: i32) -> (i32, i32) {
    %c0_i32 = arith.constant 0 : i32
    %c0_i32_0 = arith.constant 0 : i32
    return %c0_i32, %arg0 : i32, i32
  }
}

module attributes {stable_mosaic.version = 11 : i64} {
  func.func @_gemm_stats_kernel(%arg0: i32, %arg1: i32, %arg2: i32, %arg3: memref<16x256xbf16, #tpu.memory_space<vmem>>, %arg4: memref<256x128xbf16, #tpu.memory_space<vmem>>, %arg5: memref<16x128xf32, #tpu.memory_space<vmem>>, %arg6: memref<1x128xf32, #tpu.memory_space<vmem>>, %arg7: memref<1x128xf32, #tpu.memory_space<vmem>>, %arg8: memref<16x128xf32, #tpu.memory_space<vmem>>) attributes {dimension_semantics = [#tpu.dimension_semantics<parallel>, #tpu.dimension_semantics<arbitrary>, #tpu.dimension_semantics<arbitrary>], iteration_bounds = array<i64: 1, 1, 1>, scalar_prefetch = 0 : i64, scratch_operands = 1 : i64, tpu.core_type = #tpu.core_type<tc>, window_params = [{transform_indices = @transform_0, window_bounds = array<i64: 16, 256>}, {transform_indices = @transform_1, window_bounds = array<i64: 256, 128>}, {transform_indices = @transform_2, window_bounds = array<i64: 16, 128>}, {transform_indices = @transform_3, window_bounds = array<i64: 1, 128>}, {transform_indices = @transform_4, window_bounds = array<i64: 1, 128>}]} {
    %c0_i32 = arith.constant 0 : i32
    %0 = arith.cmpi eq, %arg2, %c0_i32 : i32
    %1 = arith.extui %0 : i1 to i32
    %c0_i32_0 = arith.constant 0 : i32
    %2 = arith.cmpi ne, %1, %c0_i32_0 : i32
    scf.if %2 {
      %cst_13 = arith.constant 0.000000e+00 : f32
      %17 = vector.broadcast %cst_13 : f32 to vector<16x128xf32>
      %c0_14 = arith.constant 0 : index
      %c0_15 = arith.constant 0 : index
      %18 = vector.load %arg8[%c0_14, %c0_15] : memref<16x128xf32, #tpu.memory_space<vmem>>, vector<16x128xf32>
      tpu.vector_store %arg8[%c0_14, %c0_15], %17 {strides = array<i32>} : memref<16x128xf32, #tpu.memory_space<vmem>>, vector<16x128xf32>,
    } else {
    }
    %c0_i32_1 = arith.constant 0 : i32
    %3 = arith.cmpi eq, %arg2, %c0_i32_1 : i32
    %c0_i32_2 = arith.constant 0 : i32
    %4 = arith.cmpi eq, %arg1, %c0_i32_2 : i32
    %5 = arith.andi %3, %4 : i1
    %6 = arith.extui %5 : i1 to i32
    %c0_i32_3 = arith.constant 0 : i32
    %7 = arith.cmpi ne, %6, %c0_i32_3 : i32
    scf.if %7 {
      %cst_13 = arith.constant 0.000000e+00 : f32
      %17 = vector.broadcast %cst_13 : f32 to vector<1x128xf32>
      %c0_14 = arith.constant 0 : index
      %c0_15 = arith.constant 0 : index
      %18 = vector.load %arg6[%c0_14, %c0_15] : memref<1x128xf32, #tpu.memory_space<vmem>>, vector<1x128xf32>
      tpu.vector_store %arg6[%c0_14, %c0_15], %17 {strides = array<i32>} : memref<1x128xf32, #tpu.memory_space<vmem>>, vector<1x128xf32>,
      %cst_16 = arith.constant 0.000000e+00 : f32
      %19 = vector.broadcast %cst_16 : f32 to vector<1x128xf32>
      %c0_17 = arith.constant 0 : index
      %c0_18 = arith.constant 0 : index
      %20 = vector.load %arg7[%c0_17, %c0_18] : memref<1x128xf32, #tpu.memory_space<vmem>>, vector<1x128xf32>
      tpu.vector_store %arg7[%c0_17, %c0_18], %19 {strides = array<i32>} : memref<1x128xf32, #tpu.memory_space<vmem>>, vector<1x128xf32>,
    } else {
    }
    %c0 = arith.constant 0 : index
    %c0_4 = arith.constant 0 : index
    %8 = vector.load %arg8[%c0, %c0_4] : memref<16x128xf32, #tpu.memory_space<vmem>>, vector<16x128xf32>
    %c0_5 = arith.constant 0 : index
    %c0_6 = arith.constant 0 : index
    %9 = vector.load %arg3[%c0_5, %c0_6] : memref<16x256xbf16, #tpu.memory_space<vmem>>, vector<16x256xbf16>
    %c0_7 = arith.constant 0 : index
    %c0_8 = arith.constant 0 : index
    %10 = vector.load %arg4[%c0_7, %c0_8] : memref<256x128xbf16, #tpu.memory_space<vmem>>, vector<256x128xbf16>
    %cst = arith.constant dense<0.000000e+00> : vector<16x128xf32>
    %11 = tpu.matmul %9, %10, %cst {dimension_numbers = #tpu.dot_dimension_numbers<[1], [0], [0], [1], [0, 0, 1, 1], [], []>} : vector<16x256xbf16>, vector<256x128xbf16>, vector<16x128xf32> -> vector<16x128xf32>
    %12 = arith.addf %8, %11 : vector<16x128xf32>
    %c0_9 = arith.constant 0 : index
    %c0_10 = arith.constant 0 : index
    %13 = vector.load %arg8[%c0_9, %c0_10] : memref<16x128xf32, #tpu.memory_space<vmem>>, vector<16x128xf32>
    tpu.vector_store %arg8[%c0_9, %c0_10], %12 {strides = array<i32>} : memref<16x128xf32, #tpu.memory_space<vmem>>, vector<16x128xf32>,
    %c0_i32_11 = arith.constant 0 : i32
    %14 = arith.cmpi eq, %arg2, %c0_i32_11 : i32
    %15 = arith.extui %14 : i1 to i32
    %c0_i32_12 = arith.constant 0 : i32
    %16 = arith.cmpi ne, %15, %c0_i32_12 : i32
    scf.if %16 {
      %c0_13 = arith.constant 0 : index
      %c0_14 = arith.constant 0 : index
      %17 = vector.load %arg8[%c0_13, %c0_14] : memref<16x128xf32, #tpu.memory_space<vmem>>, vector<16x128xf32>
      %c0_15 = arith.constant 0 : index
      %c0_16 = arith.constant 0 : index
      %18 = vector.load %arg5[%c0_15, %c0_16] : memref<16x128xf32, #tpu.memory_space<vmem>>, vector<16x128xf32>
      tpu.vector_store %arg5[%c0_15, %c0_16], %17 {strides = array<i32>} : memref<16x128xf32, #tpu.memory_space<vmem>>, vector<16x128xf32>,
      %c0_17 = arith.constant 0 : index
      %c0_18 = arith.constant 0 : index
      %19 = vector.load %arg6[%c0_17, %c0_18] : memref<1x128xf32, #tpu.memory_space<vmem>>, vector<1x128xf32>
      %cst_19 = arith.constant dense<0.000000e+00> : vector<128xf32>
      %20 = vector.multi_reduction <add>, %17, %cst_19 [0] : vector<16x128xf32> to vector<128xf32>
      %21 = vector.shape_cast %20 : vector<128xf32> to vector<1x128xf32>
      %22 = arith.addf %19, %21 : vector<1x128xf32>
      %c0_20 = arith.constant 0 : index
      %c0_21 = arith.constant 0 : index
      %23 = vector.load %arg6[%c0_20, %c0_21] : memref<1x128xf32, #tpu.memory_space<vmem>>, vector<1x128xf32>
      tpu.vector_store %arg6[%c0_20, %c0_21], %22 {strides = array<i32>} : memref<1x128xf32, #tpu.memory_space<vmem>>, vector<1x128xf32>,
      %c0_22 = arith.constant 0 : index
      %c0_23 = arith.constant 0 : index
      %24 = vector.load %arg7[%c0_22, %c0_23] : memref<1x128xf32, #tpu.memory_space<vmem>>, vector<1x128xf32>
      %25 = arith.mulf %17, %17 : vector<16x128xf32>
      %cst_24 = arith.constant dense<0.000000e+00> : vector<128xf32>
      %26 = vector.multi_reduction <add>, %25, %cst_24 [0] : vector<16x128xf32> to vector<128xf32>
      %27 = vector.shape_cast %26 : vector<128xf32> to vector<1x128xf32>
      %28 = arith.addf %24, %27 : vector<1x128xf32>
      %c0_25 = arith.constant 0 : index
      %c0_26 = arith.constant 0 : index
      %29 = vector.load %arg7[%c0_25, %c0_26] : memref<1x128xf32, #tpu.memory_space<vmem>>, vector<1x128xf32>
      tpu.vector_store %arg7[%c0_25, %c0_26], %28 {strides = array<i32>} : memref<1x128xf32, #tpu.memory_space<vmem>>, vector<1x128xf32>,
    } else {
    }
    return
  }
  func.func @transform_0(%arg0: i32, %arg1: i32, %arg2: i32) -> (i32, i32) {
    %c0_i32 = arith.constant 0 : i32
    return %arg1, %arg2 : i32, i32
  }
  func.func @transform_1(%arg0: i32, %arg1: i32, %arg2: i32) -> (i32, i32) {
    %c0_i32 = arith.constant 0 : i32
    return %arg2, %arg0 : i32, i32
  }
  func.func @transform_2(%arg0: i32, %arg1: i32, %arg2: i32) -> (i32, i32) {
    %c0_i32 = arith.constant 0 : i32
    return %arg1, %arg0 : i32, i32
  }
  func.func @transform_3(%arg0: i32, %arg1: i32, %arg2: i32) -> (i32, i32) {
    %c0_i32 = arith.constant 0 : i32
    %c0_i32_0 = arith.constant 0 : i32
    return %c0_i32, %arg0 : i32, i32
  }
  func.func @transform_4(%arg0: i32, %arg1: i32, %arg2: i32) -> (i32, i32) {
    %c0_i32 = arith.constant 0 : i32
    %c0_i32_0 = arith.constant 0 : i32
    return %c0_i32, %arg0 : i32, i32
  }
}

module attributes {stable_mosaic.version = 11 : i64} {
  func.func @_bn_apply_kernel(%arg0: i32, %arg1: memref<16x128xf32, #tpu.memory_space<vmem>>, %arg2: memref<1x128xf32, #tpu.memory_space<vmem>>, %arg3: memref<1x128xf32, #tpu.memory_space<vmem>>, %arg4: memref<16x128xf32, #tpu.memory_space<vmem>>) attributes {dimension_semantics = [#tpu.dimension_semantics<parallel>], iteration_bounds = array<i64: 1>, scalar_prefetch = 0 : i64, scratch_operands = 0 : i64, tpu.core_type = #tpu.core_type<tc>, window_params = [{transform_indices = @transform_0, window_bounds = array<i64: 16, 128>}, {pipeline_mode = #tpu.pipeline_mode<synchronous>, transform_indices = @transform_1, window_bounds = array<i64: 1, 128>}, {pipeline_mode = #tpu.pipeline_mode<synchronous>, transform_indices = @transform_2, window_bounds = array<i64: 1, 128>}, {transform_indices = @transform_3, window_bounds = array<i64: 16, 128>}]} {
    %c0 = arith.constant 0 : index
    %c0_0 = arith.constant 0 : index
    %0 = vector.load %arg1[%c0, %c0_0] : memref<16x128xf32, #tpu.memory_space<vmem>>, vector<16x128xf32>
    %c0_1 = arith.constant 0 : index
    %c0_2 = arith.constant 0 : index
    %1 = vector.load %arg2[%c0_1, %c0_2] : memref<1x128xf32, #tpu.memory_space<vmem>>, vector<1x128xf32>
    %2 = vector.broadcast %1 : vector<1x128xf32> to vector<16x128xf32>
    %3 = arith.mulf %0, %2 : vector<16x128xf32>
    %c0_3 = arith.constant 0 : index
    %c0_4 = arith.constant 0 : index
    %4 = vector.load %arg3[%c0_3, %c0_4] : memref<1x128xf32, #tpu.memory_space<vmem>>, vector<1x128xf32>
    %5 = vector.broadcast %4 : vector<1x128xf32> to vector<16x128xf32>
    %6 = arith.addf %3, %5 : vector<16x128xf32>
    %cst = arith.constant 0.000000e+00 : f32
    %7 = vector.broadcast %cst : f32 to vector<16x128xf32>
    %8 = arith.cmpf ogt, %6, %7 : vector<16x128xf32>
    %cst_5 = arith.constant 1.000000e-01 : f32
    %9 = vector.broadcast %cst_5 : f32 to vector<16x128xf32>
    %10 = arith.mulf %9, %6 : vector<16x128xf32>
    %11 = arith.select %8, %6, %10 : vector<16x128xi1>, vector<16x128xf32>
    %c0_6 = arith.constant 0 : index
    %c0_7 = arith.constant 0 : index
    %12 = vector.load %arg4[%c0_6, %c0_7] : memref<16x128xf32, #tpu.memory_space<vmem>>, vector<16x128xf32>
    tpu.vector_store %arg4[%c0_6, %c0_7], %11 {strides = array<i32>} : memref<16x128xf32, #tpu.memory_space<vmem>>, vector<16x128xf32>,
    return
  }
  func.func @transform_0(%arg0: i32) -> (i32, i32) {
    %c0_i32 = arith.constant 0 : i32
    %c0_i32_0 = arith.constant 0 : i32
    return %arg0, %c0_i32 : i32, i32
  }
  func.func @transform_1(%arg0: i32) -> (i32, i32) {
    %c0_i32 = arith.constant 0 : i32
    %c0_i32_0 = arith.constant 0 : i32
    %c0_i32_1 = arith.constant 0 : i32
    return %c0_i32, %c0_i32_0 : i32, i32
  }
  func.func @transform_2(%arg0: i32) -> (i32, i32) {
    %c0_i32 = arith.constant 0 : i32
    %c0_i32_0 = arith.constant 0 : i32
    %c0_i32_1 = arith.constant 0 : i32
    return %c0_i32, %c0_i32_0 : i32, i32
  }
  func.func @transform_3(%arg0: i32) -> (i32, i32) {
    %c0_i32 = arith.constant 0 : i32
    %c0_i32_0 = arith.constant 0 : i32
    return %arg0, %c0_i32 : i32, i32
  }
}

module attributes {stable_mosaic.version = 11 : i64} {
  func.func @_gemm_bias_kernel(%arg0: i32, %arg1: i32, %arg2: i32, %arg3: memref<16x128xbf16, #tpu.memory_space<vmem>>, %arg4: memref<128x128xbf16, #tpu.memory_space<vmem>>, %arg5: memref<1x128xf32, #tpu.memory_space<vmem>>, %arg6: memref<16x128xf32, #tpu.memory_space<vmem>>, %arg7: memref<16x128xf32, #tpu.memory_space<vmem>>) attributes {dimension_semantics = [#tpu.dimension_semantics<parallel>, #tpu.dimension_semantics<parallel>, #tpu.dimension_semantics<arbitrary>], iteration_bounds = array<i64: 1, 1, 1>, scalar_prefetch = 0 : i64, scratch_operands = 1 : i64, tpu.core_type = #tpu.core_type<tc>, window_params = [{transform_indices = @transform_0, window_bounds = array<i64: 16, 128>}, {transform_indices = @transform_1, window_bounds = array<i64: 128, 128>}, {transform_indices = @transform_2, window_bounds = array<i64: 1, 128>}, {transform_indices = @transform_3, window_bounds = array<i64: 16, 128>}]} {
    %c0_i32 = arith.constant 0 : i32
    %0 = arith.cmpi eq, %arg2, %c0_i32 : i32
    %1 = arith.extui %0 : i1 to i32
    %c0_i32_0 = arith.constant 0 : i32
    %2 = arith.cmpi ne, %1, %c0_i32_0 : i32
    scf.if %2 {
      %cst_10 = arith.constant 0.000000e+00 : f32
      %12 = vector.broadcast %cst_10 : f32 to vector<16x128xf32>
      %c0_11 = arith.constant 0 : index
      %c0_12 = arith.constant 0 : index
      %13 = vector.load %arg7[%c0_11, %c0_12] : memref<16x128xf32, #tpu.memory_space<vmem>>, vector<16x128xf32>
      tpu.vector_store %arg7[%c0_11, %c0_12], %12 {strides = array<i32>} : memref<16x128xf32, #tpu.memory_space<vmem>>, vector<16x128xf32>,
    } else {
    }
    %c0 = arith.constant 0 : index
    %c0_1 = arith.constant 0 : index
    %3 = vector.load %arg7[%c0, %c0_1] : memref<16x128xf32, #tpu.memory_space<vmem>>, vector<16x128xf32>
    %c0_2 = arith.constant 0 : index
    %c0_3 = arith.constant 0 : index
    %4 = vector.load %arg3[%c0_2, %c0_3] : memref<16x128xbf16, #tpu.memory_space<vmem>>, vector<16x128xbf16>
    %c0_4 = arith.constant 0 : index
    %c0_5 = arith.constant 0 : index
    %5 = vector.load %arg4[%c0_4, %c0_5] : memref<128x128xbf16, #tpu.memory_space<vmem>>, vector<128x128xbf16>
    %cst = arith.constant dense<0.000000e+00> : vector<16x128xf32>
    %6 = tpu.matmul %4, %5, %cst {dimension_numbers = #tpu.dot_dimension_numbers<[1], [0], [0], [1], [0, 0, 1, 1], [], []>} : vector<16x128xbf16>, vector<128x128xbf16>, vector<16x128xf32> -> vector<16x128xf32>
    %7 = arith.addf %3, %6 : vector<16x128xf32>
    %c0_6 = arith.constant 0 : index
    %c0_7 = arith.constant 0 : index
    %8 = vector.load %arg7[%c0_6, %c0_7] : memref<16x128xf32, #tpu.memory_space<vmem>>, vector<16x128xf32>
    tpu.vector_store %arg7[%c0_6, %c0_7], %7 {strides = array<i32>} : memref<16x128xf32, #tpu.memory_space<vmem>>, vector<16x128xf32>,
    %c0_i32_8 = arith.constant 0 : i32
    %9 = arith.cmpi eq, %arg2, %c0_i32_8 : i32
    %10 = arith.extui %9 : i1 to i32
    %c0_i32_9 = arith.constant 0 : i32
    %11 = arith.cmpi ne, %10, %c0_i32_9 : i32
    scf.if %11 {
      %c0_10 = arith.constant 0 : index
      %c0_11 = arith.constant 0 : index
      %12 = vector.load %arg7[%c0_10, %c0_11] : memref<16x128xf32, #tpu.memory_space<vmem>>, vector<16x128xf32>
      %c0_12 = arith.constant 0 : index
      %c0_13 = arith.constant 0 : index
      %13 = vector.load %arg5[%c0_12, %c0_13] : memref<1x128xf32, #tpu.memory_space<vmem>>, vector<1x128xf32>
      %14 = vector.broadcast %13 : vector<1x128xf32> to vector<16x128xf32>
      %15 = arith.addf %12, %14 : vector<16x128xf32>
      %c0_14 = arith.constant 0 : index
      %c0_15 = arith.constant 0 : index
      %16 = vector.load %arg6[%c0_14, %c0_15] : memref<16x128xf32, #tpu.memory_space<vmem>>, vector<16x128xf32>
      tpu.vector_store %arg6[%c0_14, %c0_15], %15 {strides = array<i32>} : memref<16x128xf32, #tpu.memory_space<vmem>>, vector<16x128xf32>,
    } else {
    }
    return
  }
  func.func @transform_0(%arg0: i32, %arg1: i32, %arg2: i32) -> (i32, i32) {
    %c0_i32 = arith.constant 0 : i32
    return %arg1, %arg2 : i32, i32
  }
  func.func @transform_1(%arg0: i32, %arg1: i32, %arg2: i32) -> (i32, i32) {
    %c0_i32 = arith.constant 0 : i32
    return %arg2, %arg0 : i32, i32
  }
  func.func @transform_2(%arg0: i32, %arg1: i32, %arg2: i32) -> (i32, i32) {
    %c0_i32 = arith.constant 0 : i32
    %c0_i32_0 = arith.constant 0 : i32
    return %c0_i32, %arg0 : i32, i32
  }
  func.func @transform_3(%arg0: i32, %arg1: i32, %arg2: i32) -> (i32, i32) {
    %c0_i32 = arith.constant 0 : i32
    return %arg1, %arg0 : i32, i32
  }
}

module attributes {stable_mosaic.version = 11 : i64} {
  func.func @_yolo_elt_kernel(%arg0: i32, %arg1: memref<8x128xf32, #tpu.memory_space<vmem>>, %arg2: memref<8x128xf32, #tpu.memory_space<vmem>>) attributes {dimension_semantics = [#tpu.dimension_semantics<parallel>], iteration_bounds = array<i64: 1>, scalar_prefetch = 0 : i64, scratch_operands = 0 : i64, tpu.core_type = #tpu.core_type<tc>, window_params = [{transform_indices = @transform_0, window_bounds = array<i64: 8, 128>}, {transform_indices = @transform_1, window_bounds = array<i64: 8, 128>}]} {
    %c0 = arith.constant 0 : index
    %c0_0 = arith.constant 0 : index
    %0 = vector.load %arg1[%c0, %c0_0] : memref<8x128xf32, #tpu.memory_space<vmem>>, vector<8x128xf32>
    %1 = tpu.iota {dimensions = array<i32: 0>} : vector<8x128xi32>
    %2 = arith.negf %0 : vector<8x128xf32>
    %3 = math.exp %2 : vector<8x128xf32>
    %cst = arith.constant 1.000000e+00 : f32
    %4 = vector.broadcast %cst : f32 to vector<8x128xf32>
    %5 = arith.addf %4, %3 : vector<8x128xf32>
    %6 = arith.divf %4, %5 : vector<8x128xf32>
    %c0_i32 = arith.constant 0 : i32
    %7 = vector.broadcast %c0_i32 : i32 to vector<8x128xi32>
    %8 = arith.cmpi eq, %1, %7 : vector<8x128xi32>
    %c1_i32 = arith.constant 1 : i32
    %9 = vector.broadcast %c1_i32 : i32 to vector<8x128xi32>
    %10 = arith.cmpi eq, %1, %9 : vector<8x128xi32>
    %11 = arith.ori %8, %10 : vector<8x128xi1>
    %c4_i32 = arith.constant 4 : i32
    %12 = vector.broadcast %c4_i32 : i32 to vector<8x128xi32>
    %13 = arith.cmpi sge, %1, %12 : vector<8x128xi32>
    %14 = arith.ori %11, %13 : vector<8x128xi1>
    %15 = arith.select %14, %6, %0 : vector<8x128xi1>, vector<8x128xf32>
    %c2_i32 = arith.constant 2 : i32
    %16 = vector.broadcast %c2_i32 : i32 to vector<8x128xi32>
    %17 = arith.cmpi eq, %1, %16 : vector<8x128xi32>
    %18 = math.exp %0 : vector<8x128xf32>
    %19 = arith.select %17, %18, %15 : vector<8x128xi1>, vector<8x128xf32>
    %c0_1 = arith.constant 0 : index
    %c0_2 = arith.constant 0 : index
    %20 = vector.load %arg2[%c0_1, %c0_2] : memref<8x128xf32, #tpu.memory_space<vmem>>, vector<8x128xf32>
    tpu.vector_store %arg2[%c0_1, %c0_2], %19 {strides = array<i32>} : memref<8x128xf32, #tpu.memory_space<vmem>>, vector<8x128xf32>,
    return
  }
  func.func @transform_0(%arg0: i32) -> (i32, i32) {
    %c0_i32 = arith.constant 0 : i32
    %c0_i32_0 = arith.constant 0 : i32
    return %c0_i32, %arg0 : i32, i32
  }
  func.func @transform_1(%arg0: i32) -> (i32, i32) {
    %c0_i32 = arith.constant 0 : i32
    %c0_i32_0 = arith.constant 0 : i32
    return %c0_i32, %arg0 : i32, i32
  }
}

</mosaic_0001>

<bundles_post_ra>
// kernel: _lambda_.16
= control target key start
LH: loop header
LB: loop body
LE: loop exit
PB: predicated region body
PF: predicated region fallthrough
CT: control target
= control target key end

     0   :  { %s1030_s0 = inlined_call_operand.vmem [shape: f32[512,128], index: 0, kind: input, shape index: {}]   ;;  %s1031_s1 = inlined_call_operand.vmem [shape: f32[1,128], index: 1, kind: input, shape index: {}]   ;;  %s1032_s2 = inlined_call_operand.vmem [shape: f32[1,128], index: 2, kind: input, shape index: {}]   ;;  %s1033_s3 = inlined_call_operand.vmem [shape: f32[512,128], index: 3, kind: output, shape index: {}]  }
   0x1   :  { %v14_v0 = vld [vmem:[%s1030_s0] sm:$0xff]  ;;  %v15_v4 = vld [vmem:[%s1030_s0 + $0x8] sm:$0xff]  ;;  %v16_v5 = vld [vmem:[%s1030_s0 + $0x10] sm:$0xff] }
   0x2   :  { %v508_v1 = vld [vmem:[%s1031_s1] ss:$0 sm:$0xff]  ;;  %v17_v6 = vld [vmem:[%s1030_s0 + $0x18] sm:$0xff]  ;;  %v19_v11 = vld [vmem:[%s1030_s0 + $0x28] sm:$0xff] }
   0x3   :  { %v513_v2 = vld [vmem:[%s1032_s2] ss:$0 sm:$0xff]  ;;  %v85_v3 = vmul.f32 %v508_v1, %v14_v0  ;;  %v86_v7 = vmul.f32 %v508_v1, %v15_v4  ;;  %v87_v8 = vmul.f32 %v508_v1, %v16_v5  ;;  %v88_v9 = vmul.f32 %v508_v1, %v17_v6  ;;  %v20_v12 = vld [vmem:[%s1030_s0 + $0x30] sm:$0xff]  ;;  %v21_v17 = vld [vmem:[%s1030_s0 + $0x38] sm:$0xff] }
   0x4   :  { %v18_v10 = vld [vmem:[%s1030_s0 + $0x20] sm:$0xff]  ;;  %v90_v15 = vmul.f32 %v508_v1, %v19_v11  ;;  %v91_v16 = vmul.f32 %v508_v1, %v20_v12  ;;  %v92_v21 = vmul.f32 %v508_v1, %v21_v17  ;;  %v23_v30 = vld [vmem:[%s1030_s0 + $0x48] sm:$0xff]  ;;  %v24_v31 = vld [vmem:[%s1030_s0 + $0x50] sm:$0xff] }
   0x5   :  { %v156_v13 = vadd.f32 %v513_v2, %v85_v3  ;;  %v89_v14 = vmul.f32 %v508_v1, %v18_v10  ;;  %v157_v18 = vadd.f32 %v513_v2, %v86_v7  ;;  %v158_v19 = vadd.f32 %v513_v2, %v87_v8  ;;  %v22_v25 = vld [vmem:[%s1030_s0 + $0x40] sm:$0xff]  ;;  %v25_v43 = vld [vmem:[%s1030_s0 + $0x58] sm:$0xff]  ;;  %v27_v45 = vld [vmem:[%s1030_s0 + $0x68] sm:$0xff] }
   0x6   :  { %v159_v20 = vadd.f32 %v513_v2, %v88_v9  ;;  %v161_v24 = vadd.f32 %v513_v2, %v90_v15  ;;  %v162_v37 = vadd.f32 %v513_v2, %v91_v16  ;;  %v163_v38 = vadd.f32 %v513_v2, %v92_v21  ;;  %v26_v44 = vld [vmem:[%s1030_s0 + $0x60] sm:$0xff]  ;;  %v28_v56 = vld [vmem:[%s1030_s0 + $0x70] sm:$0xff]  ;;  %v29_v4 = vld [vmem:[%s1030_s0 + $0x78] sm:$0xff] }
   0x7   :  { %vm220_vm0 = vcmp.gt.f32.partialorder %v156_v13, 0.0  ;;  %v284_v22 = vmul.f32 0.1, %v156_v13  ;;  %v160_v23 = vadd.f32 %v513_v2, %v89_v14  ;;  %vm221_vm1 = vcmp.gt.f32.partialorder %v157_v18, 0.0  ;;  %v30_v5 = vld [vmem:[%s1030_s0 + $0x80] sm:$0xff]  ;;  %v31_v9 = vld [vmem:[%s1030_s0 + $0x88] sm:$0xff] }
   0x8   :  { %v285_v26 = vmul.f32 0.1, %v157_v18  ;;  %vm222_vm2 = vcmp.gt.f32.partialorder %v158_v19, 0.0  ;;  %v286_v27 = vmul.f32 0.1, %v158_v19  ;;  %vm223_vm3 = vcmp.gt.f32.partialorder %v159_v20, 0.0 }
   0x9   :  { %v348_v28 = vsel %vm220_vm0, %v156_v13, %v284_v22  ;;  %v287_v29 = vmul.f32 0.1, %v159_v20  ;;  %vm224_vm4 = vcmp.gt.f32.partialorder %v160_v23, 0.0  ;;  %v288_v34 = vmul.f32 0.1, %v160_v23  ;;  %v32_v10 = vld [vmem:[%s1030_s0 + $0x90] sm:$0xff] }
   0xa   :  { %412 = vst [vmem:[%s1033_s3] sm:$0xff] %v348_v28  ;;  %v349_v32 = vsel %vm221_vm1, %v157_v18, %v285_v26  ;;  %v350_v33 = vsel %vm222_vm2, %v158_v19, %v286_v27  ;;  %vm225_vm5 = vcmp.gt.f32.partialorder %v161_v24, 0.0  ;;  %v289_v36 = vmul.f32 0.1, %v161_v24  ;;  %v33_v17 = vld [vmem:[%s1030_s0 + $0x98] sm:$0xff]  ;;  %v34_v18 = vld [vmem:[%s1030_s0 + $0xa0] sm:$0xff] }
   0xb   :  { %413 = vst [vmem:[%s1033_s3 + $0x8] sm:$0xff] %v349_v32  ;;  %414 = vst [vmem:[%s1033_s3 + $0x10] sm:$0xff] %v350_v33  ;;  %v351_v35 = vsel %vm223_vm3, %v159_v20, %v287_v29  ;;  %v352_v39 = vsel %vm224_vm4, %v160_v23, %v288_v34  ;;  %v93_v40 = vmul.f32 %v508_v1, %v22_v25  ;;  %vm226_vm6 = vcmp.gt.f32.partialorder %v162_v37, 0.0  ;;  %v35_v32 = vld [vmem:[%s1030_s0 + $0xa8] sm:$0xff]  ;;  %v36_v33 = vld [vmem:[%s1030_s0 + $0xb0] sm:$0xff] }
   0xc   :  { %415 = vst [vmem:[%s1033_s3 + $0x18] sm:$0xff] %v351_v35  ;;  %v94_v41 = vmul.f32 %v508_v1, %v23_v30  ;;  %v95_v42 = vmul.f32 %v508_v1, %v24_v31  ;;  %416 = vst [vmem:[%s1033_s3 + $0x20] sm:$0xff] %v352_v39  ;;  %v353_v46 = vsel %vm225_vm5, %v161_v24, %v289_v36  ;;  %v290_v47 = vmul.f32 0.1, %v162_v37 }
   0xd   :  { %vm227_vm7 = vcmp.gt.f32.partialorder %v163_v38, 0.0  ;;  %417 = vst [vmem:[%s1033_s3 + $0x28] sm:$0xff] %v353_v46  ;;  %v291_v48 = vmul.f32 0.1, %v163_v38  ;;  %v164_v49 = vadd.f32 %v513_v2, %v93_v40  ;;  %v96_v53 = vmul.f32 %v508_v1, %v25_v43  ;;  %v37_v40 = vld [vmem:[%s1030_s0 + $0xb8] sm:$0xff]  ;;  %v39_v46 = vld [vmem:[%s1030_s0 + $0xc8] sm:$0xff] }
   0xe   :  { %v165_v50 = vadd.f32 %v513_v2, %v94_v41  ;;  %v166_v51 = vadd.f32 %v513_v2, %v95_v42  ;;  %v354_v52 = vsel %vm226_vm6, %v162_v37, %v290_v47  ;;  %v97_v54 = vmul.f32 %v508_v1, %v26_v44  ;;  %v40_v47 = vld [vmem:[%s1030_s0 + $0xd0] sm:$0xff] }
   0xf   :  { %v98_v55 = vmul.f32 %v508_v1, %v27_v45  ;;  %418 = vst [vmem:[%s1033_s3 + $0x30] sm:$0xff] %v354_v52  ;;  %v355_v57 = vsel %vm227_vm7, %v163_v38, %v291_v48  ;;  %vm228_vm8 = vcmp.gt.f32.partialorder %v164_v49, 0.0  ;;  %v292_v58 = vmul.f32 0.1, %v164_v49  ;;  %v38_v45 = vld [vmem:[%s1030_s0 + $0xc0] sm:$0xff] }
  0x10   :  { %vm229_vm9 = vcmp.gt.f32.partialorder %v165_v50, 0.0  ;;  %419 = vst [vmem:[%s1033_s3 + $0x38] sm:$0xff] %v355_v57  ;;  %v293_v59 = vmul.f32 0.1, %v165_v50  ;;  %vm230_vm10 = vcmp.gt.f32.partialorder %v166_v51, 0.0  ;;  %v167_v61 = vadd.f32 %v513_v2, %v96_v53 }
  0x11   :  { %v294_v60 = vmul.f32 0.1, %v166_v51  ;;  %v356_v62 = vsel %vm228_vm8, %v164_v49, %v292_v58  ;;  %v168_v63 = vadd.f32 %v513_v2, %v97_v54  ;;  %v169_v0 = vadd.f32 %v513_v2, %v98_v55  ;;  %v41_v58 = vld [vmem:[%s1030_s0 + $0xd8] sm:$0xff] }
  0x12   :  { %v99_v3 = vmul.f32 %v508_v1, %v28_v56  ;;  %420 = vst [vmem:[%s1033_s3 + $0x40] sm:$0xff] %v356_v62  ;;  %v357_v6 = vsel %vm229_vm9, %v165_v50, %v293_v59  ;;  %vm231_vm11 = vcmp.gt.f32.partialorder %v167_v61, 0.0  ;;  %v295_v8 = vmul.f32 0.1, %v167_v61  ;;  %v42_v59 = vld [vmem:[%s1030_s0 + $0xe0] sm:$0xff] }
  0x13   :  { %v358_v7 = vsel %vm230_vm10, %v166_v51, %v294_v60  ;;  %421 = vst [vmem:[%s1033_s3 + $0x48] sm:$0xff] %v357_v6  ;;  %vm232_vm12 = vcmp.gt.f32.partialorder %v168_v63, 0.0  ;;  %v296_v11 = vmul.f32 0.1, %v168_v63  ;;  %vm233_vm13 = vcmp.gt.f32.partialorder %v169_v0, 0.0 }
  0x14   :  { %422 = vst [vmem:[%s1033_s3 + $0x50] sm:$0xff] %v358_v7  ;;  %v297_v12 = vmul.f32 0.1, %v169_v0  ;;  %v359_v13 = vsel %vm231_vm11, %v167_v61, %v295_v8  ;;  %v170_v14 = vadd.f32 %v513_v2, %v99_v3  ;;  %v100_v15 = vmul.f32 %v508_v1, %v29_v4 }
  0x15   :  { %v101_v16 = vmul.f32 %v508_v1, %v30_v5  ;;  %423 = vst [vmem:[%s1033_s3 + $0x58] sm:$0xff] %v359_v13  ;;  %v360_v19 = vsel %vm232_vm12, %v168_v63, %v296_v11  ;;  %v102_v21 = vmul.f32 %v508_v1, %v31_v9  ;;  %v103_v22 = vmul.f32 %v508_v1, %v32_v10  ;;  %v43_v10 = vld [vmem:[%s1030_s0 + $0xe8] sm:$0xff]  ;;  %v44_v11 = vld [vmem:[%s1030_s0 + $0xf0] sm:$0xff] }
  0x16   :  { %v361_v20 = vsel %vm233_vm13, %v169_v0, %v297_v12  ;;  %424 = vst [vmem:[%s1033_s3 + $0x60] sm:$0xff] %v360_v19  ;;  %vm234_vm14 = vcmp.gt.f32.partialorder %v170_v14, 0.0  ;;  %v298_v23 = vmul.f32 0.1, %v170_v14  ;;  %v171_v24 = vadd.f32 %v513_v2, %v100_v15 }
  0x17   :  { %425 = vst [vmem:[%s1033_s3 + $0x68] sm:$0xff] %v361_v20  ;;  %v172_v25 = vadd.f32 %v513_v2, %v101_v16  ;;  %v173_v26 = vadd.f32 %v513_v2, %v102_v21  ;;  %v174_v27 = vadd.f32 %v513_v2, %v103_v22  ;;  %v104_v28 = vmul.f32 %v508_v1, %v33_v17 }
  0x18   :  { %v105_v29 = vmul.f32 %v508_v1, %v34_v18  ;;  %v362_v30 = vsel %vm234_vm14, %v170_v14, %v298_v23  ;;  %vm235_vm15 = vcmp.gt.f32.partialorder %v171_v24, 0.0  ;;  %v299_v31 = vmul.f32 0.1, %v171_v24  ;;  %v45_v18 = vld [vmem:[%s1030_s0 + $0xf8] sm:$0xff]  ;;  %v46_v23 = vld [vmem:[%s1030_s0 + $0x100] sm:$0xff] }
  0x19   :  { %vm236_vm0 = vcmp.gt.f32.partialorder %v172_v25, 0.0  ;;  %426 = vst [vmem:[%s1033_s3 + $0x70] sm:$0xff] %v362_v30  ;;  %v300_v34 = vmul.f32 0.1, %v172_v25  ;;  %vm237_vm1 = vcmp.gt.f32.partialorder %v173_v26, 0.0  ;;  %vm238_vm2 = vcmp.gt.f32.partialorder %v174_v27, 0.0 }
  0x1a   :  { %v301_v35 = vmul.f32 0.1, %v173_v26  ;;  %v363_v36 = vsel %vm235_vm15, %v171_v24, %v299_v31  ;;  %v302_v37 = vmul.f32 0.1, %v174_v27  ;;  %v175_v38 = vadd.f32 %v513_v2, %v104_v28  ;;  %v47_v24 = vld [vmem:[%s1030_s0 + $0x108] sm:$0xff] }
  0x1b   :  { %v176_v39 = vadd.f32 %v513_v2, %v105_v29  ;;  %427 = vst [vmem:[%s1033_s3 + $0x78] sm:$0xff] %v363_v36  ;;  %v364_v41 = vsel %vm236_vm0, %v172_v25, %v300_v34  ;;  %v106_v43 = vmul.f32 %v508_v1, %v35_v32  ;;  %v107_v44 = vmul.f32 %v508_v1, %v36_v33  ;;  %v48_v25 = vld [vmem:[%s1030_s0 + $0x110] sm:$0xff]  ;;  %v49_v36 = vld [vmem:[%s1030_s0 + $0x118] sm:$0xff] }
  0x1c   :  { %v365_v42 = vsel %vm237_vm1, %v173_v26, %v301_v35  ;;  %428 = vst [vmem:[%s1033_s3 + $0x80] sm:$0xff] %v364_v41  ;;  %v366_v48 = vsel %vm238_vm2, %v174_v27, %v302_v37  ;;  %vm239_vm3 = vcmp.gt.f32.partialorder %v175_v38, 0.0  ;;  %v303_v49 = vmul.f32 0.1, %v175_v38  ;;  %v50_v37 = vld [vmem:[%s1030_s0 + $0x120] sm:$0xff] }
  0x1d   :  { %429 = vst [vmem:[%s1033_s3 + $0x88] sm:$0xff] %v365_v42  ;;  %vm240_vm4 = vcmp.gt.f32.partialorder %v176_v39, 0.0  ;;  %430 = vst [vmem:[%s1033_s3 + $0x90] sm:$0xff] %v366_v48  ;;  %v304_v50 = vmul.f32 0.1, %v176_v39  ;;  %v177_v51 = vadd.f32 %v513_v2, %v106_v43  ;;  %v178_v52 = vadd.f32 %v513_v2, %v107_v44 }
  0x1e   :  { %v108_v53 = vmul.f32 %v508_v1, %v37_v40  ;;  %v367_v54 = vsel %vm239_vm3, %v175_v38, %v303_v49  ;;  %v109_v55 = vmul.f32 %v508_v1, %v38_v45  ;;  %v110_v56 = vmul.f32 %v508_v1, %v39_v46 }
  0x1f   :  { %v111_v57 = vmul.f32 %v508_v1, %v40_v47  ;;  %431 = vst [vmem:[%s1033_s3 + $0x98] sm:$0xff] %v367_v54  ;;  %v368_v60 = vsel %vm240_vm4, %v176_v39, %v304_v50  ;;  %vm241_vm5 = vcmp.gt.f32.partialorder %v177_v51, 0.0  ;;  %v305_v61 = vmul.f32 0.1, %v177_v51  ;;  %v51_v50 = vld [vmem:[%s1030_s0 + $0x128] sm:$0xff] }
  0x20   :  { %vm242_vm6 = vcmp.gt.f32.partialorder %v178_v52, 0.0  ;;  %432 = vst [vmem:[%s1033_s3 + $0xa0] sm:$0xff] %v368_v60  ;;  %v306_v62 = vmul.f32 0.1, %v178_v52  ;;  %v179_v63 = vadd.f32 %v513_v2, %v108_v53  ;;  %v180_v0 = vadd.f32 %v513_v2, %v109_v55 }
  0x21   :  { %v181_v3 = vadd.f32 %v513_v2, %v110_v56  ;;  %v369_v4 = vsel %vm241_vm5, %v177_v51, %v305_v61  ;;  %v182_v5 = vadd.f32 %v513_v2, %v111_v57  ;;  %v112_v6 = vmul.f32 %v508_v1, %v41_v58  ;;  %v52_v51 = vld [vmem:[%s1030_s0 + $0x130] sm:$0xff]  ;;  %v53_v58 = vld [vmem:[%s1030_s0 + $0x138] sm:$0xff] }
  0x22   :  { %v113_v7 = vmul.f32 %v508_v1, %v42_v59  ;;  %433 = vst [vmem:[%s1033_s3 + $0xa8] sm:$0xff] %v369_v4  ;;  %v370_v8 = vsel %vm242_vm6, %v178_v52, %v306_v62  ;;  %vm243_vm7 = vcmp.gt.f32.partialorder %v179_v63, 0.0  ;;  %v307_v9 = vmul.f32 0.1, %v179_v63 }
  0x23   :  { %vm244_vm8 = vcmp.gt.f32.partialorder %v180_v0, 0.0  ;;  %434 = vst [vmem:[%s1033_s3 + $0xb0] sm:$0xff] %v370_v8  ;;  %v308_v12 = vmul.f32 0.1, %v180_v0  ;;  %vm245_vm9 = vcmp.gt.f32.partialorder %v181_v3, 0.0  ;;  %vm246_vm10 = vcmp.gt.f32.partialorder %v182_v5, 0.0 }
  0x24   :  { %v309_v13 = vmul.f32 0.1, %v181_v3  ;;  %v371_v14 = vsel %vm243_vm7, %v179_v63, %v307_v9  ;;  %v310_v15 = vmul.f32 0.1, %v182_v5  ;;  %v183_v16 = vadd.f32 %v513_v2, %v112_v6  ;;  %v54_v63 = vld [vmem:[%s1030_s0 + $0x140] sm:$0xff] }
  0x25   :  { %v184_v17 = vadd.f32 %v513_v2, %v113_v7  ;;  %435 = vst [vmem:[%s1033_s3 + $0xb8] sm:$0xff] %v371_v14  ;;  %v372_v19 = vsel %vm244_vm8, %v180_v0, %v308_v12  ;;  %v114_v21 = vmul.f32 %v508_v1, %v43_v10  ;;  %v115_v22 = vmul.f32 %v508_v1, %v44_v11  ;;  %v55_v0 = vld [vmem:[%s1030_s0 + $0x148] sm:$0xff]  ;;  %v57_v14 = vld [vmem:[%s1030_s0 + $0x158] sm:$0xff] }
  0x26   :  { %v373_v20 = vsel %vm245_vm9, %v181_v3, %v309_v13  ;;  %436 = vst [vmem:[%s1033_s3 + $0xc0] sm:$0xff] %v372_v19  ;;  %v374_v26 = vsel %vm246_vm10, %v182_v5, %v310_v15  ;;  %vm247_vm11 = vcmp.gt.f32.partialorder %v183_v16, 0.0  ;;  %v311_v27 = vmul.f32 0.1, %v183_v16  ;;  %v56_v3 = vld [vmem:[%s1030_s0 + $0x150] sm:$0xff]  ;;  %v58_v15 = vld [vmem:[%s1030_s0 + $0x160] sm:$0xff] }
  0x27   :  { %437 = vst [vmem:[%s1033_s3 + $0xc8] sm:$0xff] %v373_v20  ;;  %vm248_vm12 = vcmp.gt.f32.partialorder %v184_v17, 0.0  ;;  %438 = vst [vmem:[%s1033_s3 + $0xd0] sm:$0xff] %v374_v26  ;;  %v312_v28 = vmul.f32 0.1, %v184_v17  ;;  %v185_v29 = vadd.f32 %v513_v2, %v114_v21  ;;  %v186_v30 = vadd.f32 %v513_v2, %v115_v22 }
  0x28   :  { %v116_v31 = vmul.f32 %v508_v1, %v45_v18  ;;  %v375_v32 = vsel %vm247_vm11, %v183_v16, %v311_v27  ;;  %v117_v33 = vmul.f32 %v508_v1, %v46_v23  ;;  %v118_v34 = vmul.f32 %v508_v1, %v47_v24 }
  0x29   :  { %v119_v35 = vmul.f32 %v508_v1, %v48_v25  ;;  %439 = vst [vmem:[%s1033_s3 + $0xd8] sm:$0xff] %v375_v32  ;;  %v376_v38 = vsel %vm248_vm12, %v184_v17, %v312_v28  ;;  %vm249_vm13 = vcmp.gt.f32.partialorder %v185_v29, 0.0  ;;  %v313_v39 = vmul.f32 0.1, %v185_v29  ;;  %v59_v28 = vld [vmem:[%s1030_s0 + $0x168] sm:$0xff] }
  0x2a   :  { %vm250_vm14 = vcmp.gt.f32.partialorder %v186_v30, 0.0  ;;  %440 = vst [vmem:[%s1033_s3 + $0xe0] sm:$0xff] %v376_v38  ;;  %v314_v40 = vmul.f32 0.1, %v186_v30  ;;  %v187_v41 = vadd.f32 %v513_v2, %v116_v31  ;;  %v188_v42 = vadd.f32 %v513_v2, %v117_v33 }
  0x2b   :  { %v189_v43 = vadd.f32 %v513_v2, %v118_v34  ;;  %v377_v44 = vsel %vm249_vm13, %v185_v29, %v313_v39  ;;  %v190_v45 = vadd.f32 %v513_v2, %v119_v35  ;;  %v120_v46 = vmul.f32 %v508_v1, %v49_v36  ;;  %v60_v29 = vld [vmem:[%s1030_s0 + $0x170] sm:$0xff]  ;;  %v61_v36 = vld [vmem:[%s1030_s0 + $0x178] sm:$0xff] }
  0x2c   :  { %v121_v47 = vmul.f32 %v508_v1, %v50_v37  ;;  %441 = vst [vmem:[%s1033_s3 + $0xe8] sm:$0xff] %v377_v44  ;;  %v378_v48 = vsel %vm250_vm14, %v186_v30, %v314_v40  ;;  %vm251_vm15 = vcmp.gt.f32.partialorder %v187_v41, 0.0  ;;  %v315_v49 = vmul.f32 0.1, %v187_v41 }
  0x2d   :  { %vm252_vm0 = vcmp.gt.f32.partialorder %v188_v42, 0.0  ;;  %442 = vst [vmem:[%s1033_s3 + $0xf0] sm:$0xff] %v378_v48  ;;  %v316_v52 = vmul.f32 0.1, %v188_v42  ;;  %vm253_vm1 = vcmp.gt.f32.partialorder %v189_v43, 0.0  ;;  %vm254_vm2 = vcmp.gt.f32.partialorder %v190_v45, 0.0 }
  0x2e   :  { %v317_v53 = vmul.f32 0.1, %v189_v43  ;;  %v379_v54 = vsel %vm251_vm15, %v187_v41, %v315_v49  ;;  %v318_v55 = vmul.f32 0.1, %v190_v45  ;;  %v191_v56 = vadd.f32 %v513_v2, %v120_v46  ;;  %v62_v41 = vld [vmem:[%s1030_s0 + $0x180] sm:$0xff] }
  0x2f   :  { %v192_v57 = vadd.f32 %v513_v2, %v121_v47  ;;  %443 = vst [vmem:[%s1033_s3 + $0xf8] sm:$0xff] %v379_v54  ;;  %v380_v59 = vsel %vm252_vm0, %v188_v42, %v316_v52  ;;  %v122_v61 = vmul.f32 %v508_v1, %v51_v50  ;;  %v123_v62 = vmul.f32 %v508_v1, %v52_v51  ;;  %v63_v42 = vld [vmem:[%s1030_s0 + $0x188] sm:$0xff]  ;;  %v65_v54 = vld [vmem:[%s1030_s0 + $0x198] sm:$0xff] }
  0x30   :  { %v381_v60 = vsel %vm253_vm1, %v189_v43, %v317_v53  ;;  %444 = vst [vmem:[%s1033_s3 + $0x100] sm:$0xff] %v380_v59  ;;  %v382_v4 = vsel %vm254_vm2, %v190_v45, %v318_v55  ;;  %vm255_vm3 = vcmp.gt.f32.partialorder %v191_v56, 0.0  ;;  %v319_v5 = vmul.f32 0.1, %v191_v56  ;;  %v64_v43 = vld [vmem:[%s1030_s0 + $0x190] sm:$0xff]  ;;  %v66_v55 = vld [vmem:[%s1030_s0 + $0x1a0] sm:$0xff] }
  0x31   :  { %445 = vst [vmem:[%s1033_s3 + $0x108] sm:$0xff] %v381_v60  ;;  %vm256_vm4 = vcmp.gt.f32.partialorder %v192_v57, 0.0  ;;  %446 = vst [vmem:[%s1033_s3 + $0x110] sm:$0xff] %v382_v4  ;;  %v320_v6 = vmul.f32 0.1, %v192_v57  ;;  %v193_v7 = vadd.f32 %v513_v2, %v122_v61  ;;  %v194_v8 = vadd.f32 %v513_v2, %v123_v62 }
  0x32   :  { %v124_v9 = vmul.f32 %v508_v1, %v53_v58  ;;  %v383_v10 = vsel %vm255_vm3, %v191_v56, %v319_v5  ;;  %v125_v11 = vmul.f32 %v508_v1, %v54_v63  ;;  %v126_v12 = vmul.f32 %v508_v1, %v55_v0 }
  0x33   :  { %v127_v13 = vmul.f32 %v508_v1, %v56_v3  ;;  %447 = vst [vmem:[%s1033_s3 + $0x118] sm:$0xff] %v383_v10  ;;  %v384_v16 = vsel %vm256_vm4, %v192_v57, %v320_v6  ;;  %vm257_vm5 = vcmp.gt.f32.partialorder %v193_v7, 0.0  ;;  %v321_v17 = vmul.f32 0.1, %v193_v7  ;;  %v67_v6 = vld [vmem:[%s1030_s0 + $0x1a8] sm:$0xff] }
  0x34   :  { %vm258_vm6 = vcmp.gt.f32.partialorder %v194_v8, 0.0  ;;  %448 = vst [vmem:[%s1033_s3 + $0x120] sm:$0xff] %v384_v16  ;;  %v322_v18 = vmul.f32 0.1, %v194_v8  ;;  %v195_v19 = vadd.f32 %v513_v2, %v124_v9  ;;  %v196_v20 = vadd.f32 %v513_v2, %v125_v11 }
  0x35   :  { %v197_v21 = vadd.f32 %v513_v2, %v126_v12  ;;  %v385_v22 = vsel %vm257_vm5, %v193_v7, %v321_v17  ;;  %v198_v23 = vadd.f32 %v513_v2, %v127_v13  ;;  %v128_v24 = vmul.f32 %v508_v1, %v57_v14  ;;  %v68_v7 = vld [vmem:[%s1030_s0 + $0x1b0] sm:$0xff]  ;;  %v69_v14 = vld [vmem:[%s1030_s0 + $0x1b8] sm:$0xff] }
  0x36   :  { %v129_v25 = vmul.f32 %v508_v1, %v58_v15  ;;  %449 = vst [vmem:[%s1033_s3 + $0x128] sm:$0xff] %v385_v22  ;;  %v386_v26 = vsel %vm258_vm6, %v194_v8, %v322_v18  ;;  %vm259_vm7 = vcmp.gt.f32.partialorder %v195_v19, 0.0  ;;  %v323_v27 = vmul.f32 0.1, %v195_v19 }
  0x37   :  { %vm260_vm8 = vcmp.gt.f32.partialorder %v196_v20, 0.0  ;;  %450 = vst [vmem:[%s1033_s3 + $0x130] sm:$0xff] %v386_v26  ;;  %v324_v30 = vmul.f32 0.1, %v196_v20  ;;  %vm261_vm9 = vcmp.gt.f32.partialorder %v197_v21, 0.0  ;;  %vm262_vm10 = vcmp.gt.f32.partialorder %v198_v23, 0.0 }
  0x38   :  { %v325_v31 = vmul.f32 0.1, %v197_v21  ;;  %v387_v32 = vsel %vm259_vm7, %v195_v19, %v323_v27  ;;  %v326_v33 = vmul.f32 0.1, %v198_v23  ;;  %v199_v34 = vadd.f32 %v513_v2, %v128_v24  ;;  %v70_v19 = vld [vmem:[%s1030_s0 + $0x1c0] sm:$0xff] }
  0x39   :  { %v200_v35 = vadd.f32 %v513_v2, %v129_v25  ;;  %451 = vst [vmem:[%s1033_s3 + $0x138] sm:$0xff] %v387_v32  ;;  %v388_v37 = vsel %vm260_vm8, %v196_v20, %v324_v30  ;;  %v130_v39 = vmul.f32 %v508_v1, %v59_v28  ;;  %v131_v40 = vmul.f32 %v508_v1, %v60_v29  ;;  %v71_v20 = vld [vmem:[%s1030_s0 + $0x1c8] sm:$0xff]  ;;  %v73_v32 = vld [vmem:[%s1030_s0 + $0x1d8] sm:$0xff] }
  0x3a   :  { %v389_v38 = vsel %vm261_vm9, %v197_v21, %v325_v31  ;;  %452 = vst [vmem:[%s1033_s3 + $0x140] sm:$0xff] %v388_v37  ;;  %v390_v44 = vsel %vm262_vm10, %v198_v23, %v326_v33  ;;  %vm263_vm11 = vcmp.gt.f32.partialorder %v199_v34, 0.0  ;;  %v327_v45 = vmul.f32 0.1, %v199_v34  ;;  %v72_v21 = vld [vmem:[%s1030_s0 + $0x1d0] sm:$0xff]  ;;  %v74_v33 = vld [vmem:[%s1030_s0 + $0x1e0] sm:$0xff] }
  0x3b   :  { %453 = vst [vmem:[%s1033_s3 + $0x148] sm:$0xff] %v389_v38  ;;  %vm264_vm12 = vcmp.gt.f32.partialorder %v200_v35, 0.0  ;;  %454 = vst [vmem:[%s1033_s3 + $0x150] sm:$0xff] %v390_v44  ;;  %v328_v46 = vmul.f32 0.1, %v200_v35  ;;  %v201_v47 = vadd.f32 %v513_v2, %v130_v39  ;;  %v202_v48 = vadd.f32 %v513_v2, %v131_v40 }
  0x3c   :  { %v132_v49 = vmul.f32 %v508_v1, %v61_v36  ;;  %v391_v50 = vsel %vm263_vm11, %v199_v34, %v327_v45  ;;  %v133_v51 = vmul.f32 %v508_v1, %v62_v41  ;;  %v134_v52 = vmul.f32 %v508_v1, %v63_v42 }
  0x3d   :  { %v135_v53 = vmul.f32 %v508_v1, %v64_v43  ;;  %455 = vst [vmem:[%s1033_s3 + $0x158] sm:$0xff] %v391_v50  ;;  %v392_v56 = vsel %vm264_vm12, %v200_v35, %v328_v46  ;;  %vm265_vm13 = vcmp.gt.f32.partialorder %v201_v47, 0.0  ;;  %v329_v57 = vmul.f32 0.1, %v201_v47  ;;  %v75_v46 = vld [vmem:[%s1030_s0 + $0x1e8] sm:$0xff] }
  0x3e   :  { %vm266_vm14 = vcmp.gt.f32.partialorder %v202_v48, 0.0  ;;  %456 = vst [vmem:[%s1033_s3 + $0x160] sm:$0xff] %v392_v56  ;;  %v330_v58 = vmul.f32 0.1, %v202_v48  ;;  %v203_v59 = vadd.f32 %v513_v2, %v132_v49  ;;  %v204_v60 = vadd.f32 %v513_v2, %v133_v51 }
  0x3f   :  { %v205_v61 = vadd.f32 %v513_v2, %v134_v52  ;;  %v393_v62 = vsel %vm265_vm13, %v201_v47, %v329_v57  ;;  %v206_v63 = vadd.f32 %v513_v2, %v135_v53  ;;  %v136_v0 = vmul.f32 %v508_v1, %v65_v54  ;;  %v76_v47 = vld [vmem:[%s1030_s0 + $0x1f0] sm:$0xff]  ;;  %v77_v54 = vld [vmem:[%s1030_s0 + $0x1f8] sm:$0xff] }
  0x40   :  { %v137_v3 = vmul.f32 %v508_v1, %v66_v55  ;;  %457 = vst [vmem:[%s1033_s3 + $0x168] sm:$0xff] %v393_v62  ;;  %v394_v4 = vsel %vm266_vm14, %v202_v48, %v330_v58  ;;  %vm267_vm15 = vcmp.gt.f32.partialorder %v203_v59, 0.0  ;;  %v331_v5 = vmul.f32 0.1, %v203_v59 }
  0x41   :  { %vm268_vm0 = vcmp.gt.f32.partialorder %v204_v60, 0.0  ;;  %458 = vst [vmem:[%s1033_s3 + $0x170] sm:$0xff] %v394_v4  ;;  %v332_v8 = vmul.f32 0.1, %v204_v60  ;;  %vm269_vm1 = vcmp.gt.f32.partialorder %v205_v61, 0.0  ;;  %vm270_vm2 = vcmp.gt.f32.partialorder %v206_v63, 0.0 }
  0x42   :  { %v333_v9 = vmul.f32 0.1, %v205_v61  ;;  %v395_v10 = vsel %vm267_vm15, %v203_v59, %v331_v5  ;;  %v334_v11 = vmul.f32 0.1, %v206_v63  ;;  %v207_v12 = vadd.f32 %v513_v2, %v136_v0 }
  0x43   :  { %v208_v13 = vadd.f32 %v513_v2, %v137_v3  ;;  %459 = vst [vmem:[%s1033_s3 + $0x178] sm:$0xff] %v395_v10  ;;  %v396_v15 = vsel %vm268_vm0, %v204_v60, %v332_v8  ;;  %v138_v17 = vmul.f32 %v508_v1, %v67_v6  ;;  %v139_v18 = vmul.f32 %v508_v1, %v68_v7 }
  0x44   :  { %v397_v16 = vsel %vm269_vm1, %v205_v61, %v333_v9  ;;  %460 = vst [vmem:[%s1033_s3 + $0x180] sm:$0xff] %v396_v15  ;;  %v398_v22 = vsel %vm270_vm2, %v206_v63, %v334_v11  ;;  %vm271_vm3 = vcmp.gt.f32.partialorder %v207_v12, 0.0  ;;  %v335_v23 = vmul.f32 0.1, %v207_v12 }
  0x45   :  { %461 = vst [vmem:[%s1033_s3 + $0x188] sm:$0xff] %v397_v16  ;;  %vm272_vm4 = vcmp.gt.f32.partialorder %v208_v13, 0.0  ;;  %462 = vst [vmem:[%s1033_s3 + $0x190] sm:$0xff] %v398_v22  ;;  %v336_v24 = vmul.f32 0.1, %v208_v13  ;;  %v209_v25 = vadd.f32 %v513_v2, %v138_v17  ;;  %v210_v26 = vadd.f32 %v513_v2, %v139_v18 }
  0x46   :  { %v140_v27 = vmul.f32 %v508_v1, %v69_v14  ;;  %v399_v28 = vsel %vm271_vm3, %v207_v12, %v335_v23  ;;  %v141_v29 = vmul.f32 %v508_v1, %v70_v19  ;;  %v142_v30 = vmul.f32 %v508_v1, %v71_v20 }
  0x47   :  { %v143_v31 = vmul.f32 %v508_v1, %v72_v21  ;;  %463 = vst [vmem:[%s1033_s3 + $0x198] sm:$0xff] %v399_v28  ;;  %v400_v34 = vsel %vm272_vm4, %v208_v13, %v336_v24  ;;  %vm273_vm5 = vcmp.gt.f32.partialorder %v209_v25, 0.0  ;;  %v337_v35 = vmul.f32 0.1, %v209_v25 }
  0x48   :  { %vm274_vm6 = vcmp.gt.f32.partialorder %v210_v26, 0.0  ;;  %464 = vst [vmem:[%s1033_s3 + $0x1a0] sm:$0xff] %v400_v34  ;;  %v338_v36 = vmul.f32 0.1, %v210_v26  ;;  %v211_v37 = vadd.f32 %v513_v2, %v140_v27  ;;  %v212_v38 = vadd.f32 %v513_v2, %v141_v29 }
  0x49   :  { %v213_v39 = vadd.f32 %v513_v2, %v142_v30  ;;  %v401_v40 = vsel %vm273_vm5, %v209_v25, %v337_v35  ;;  %v214_v41 = vadd.f32 %v513_v2, %v143_v31  ;;  %v144_v42 = vmul.f32 %v508_v1, %v73_v32 }
  0x4a   :  { %v145_v43 = vmul.f32 %v508_v1, %v74_v33  ;;  %465 = vst [vmem:[%s1033_s3 + $0x1a8] sm:$0xff] %v401_v40  ;;  %v402_v44 = vsel %vm274_vm6, %v210_v26, %v338_v36  ;;  %vm275_vm7 = vcmp.gt.f32.partialorder %v211_v37, 0.0  ;;  %v339_v45 = vmul.f32 0.1, %v211_v37 }
  0x4b   :  { %vm276_vm8 = vcmp.gt.f32.partialorder %v212_v38, 0.0  ;;  %466 = vst [vmem:[%s1033_s3 + $0x1b0] sm:$0xff] %v402_v44  ;;  %v340_v48 = vmul.f32 0.1, %v212_v38  ;;  %vm277_vm9 = vcmp.gt.f32.partialorder %v213_v39, 0.0  ;;  %vm278_vm10 = vcmp.gt.f32.partialorder %v214_v41, 0.0 }
  0x4c   :  { %v341_v49 = vmul.f32 0.1, %v213_v39  ;;  %v403_v50 = vsel %vm275_vm7, %v211_v37, %v339_v45  ;;  %v342_v51 = vmul.f32 0.1, %v214_v41  ;;  %v215_v52 = vadd.f32 %v513_v2, %v144_v42 }
  0x4d   :  { %v216_v53 = vadd.f32 %v513_v2, %v145_v43  ;;  %467 = vst [vmem:[%s1033_s3 + $0x1b8] sm:$0xff] %v403_v50  ;;  %v404_v55 = vsel %vm276_vm8, %v212_v38, %v340_v48  ;;  %v146_v57 = vmul.f32 %v508_v1, %v75_v46  ;;  %v147_v58 = vmul.f32 %v508_v1, %v76_v47 }
  0x4e   :  { %v405_v56 = vsel %vm277_vm9, %v213_v39, %v341_v49  ;;  %468 = vst [vmem:[%s1033_s3 + $0x1c0] sm:$0xff] %v404_v55  ;;  %v406_v59 = vsel %vm278_vm10, %v214_v41, %v342_v51  ;;  %vm279_vm11 = vcmp.gt.f32.partialorder %v215_v52, 0.0  ;;  %v343_v60 = vmul.f32 0.1, %v215_v52 }
  0x4f   :  { %469 = vst [vmem:[%s1033_s3 + $0x1c8] sm:$0xff] %v405_v56  ;;  %vm280_vm12 = vcmp.gt.f32.partialorder %v216_v53, 0.0  ;;  %470 = vst [vmem:[%s1033_s3 + $0x1d0] sm:$0xff] %v406_v59  ;;  %v344_v61 = vmul.f32 0.1, %v216_v53  ;;  %v217_v62 = vadd.f32 %v513_v2, %v146_v57  ;;  %v218_v63 = vadd.f32 %v513_v2, %v147_v58 }
  0x50   :  { %v148_v0 = vmul.f32 %v508_v1, %v77_v54  ;;  %v407_v3 = vsel %vm279_vm11, %v215_v52, %v343_v60 }
  0x51   :  { %471 = vst [vmem:[%s1033_s3 + $0x1d8] sm:$0xff] %v407_v3  ;;  %v408_v4 = vsel %vm280_vm12, %v216_v53, %v344_v61  ;;  %vm281_vm13 = vcmp.gt.f32.partialorder %v217_v62, 0.0  ;;  %v345_v5 = vmul.f32 0.1, %v217_v62  ;;  %vm282_vm14 = vcmp.gt.f32.partialorder %v218_v63, 0.0 }
  0x52   :  { %472 = vst [vmem:[%s1033_s3 + $0x1e0] sm:$0xff] %v408_v4  ;;  %v346_v6 = vmul.f32 0.1, %v218_v63  ;;  %v219_v7 = vadd.f32 %v513_v2, %v148_v0 }
  0x53   :  { %v409_v8 = vsel %vm281_vm13, %v217_v62, %v345_v5 }
  0x54   :  { %473 = vst [vmem:[%s1033_s3 + $0x1e8] sm:$0xff] %v409_v8  ;;  %v410_v1 = vsel %vm282_vm14, %v218_v63, %v346_v6  ;;  %vm283_vm15 = vcmp.gt.f32.partialorder %v219_v7, 0.0  ;;  %v347_v9 = vmul.f32 0.1, %v219_v7 }
  0x55   :  { %474 = vst [vmem:[%s1033_s3 + $0x1f0] sm:$0xff] %v410_v1 }
  0x56   :  { %v411_v10 = vsel %vm283_vm15, %v219_v7, %v347_v9 }
  0x57   :  { %475 = vst [vmem:[%s1033_s3 + $0x1f8] sm:$0xff] %v411_v10 }

// kernel: _lambda_.15
= control target key start
LH: loop header
LB: loop body
LE: loop exit
PB: predicated region body
PF: predicated region fallthrough
CT: control target
= control target key end

     0   :  { %v1459_v42 = vmov 0.0   ;;  %s2007_s1 = inlined_call_operand.vmem [shape: bf16[128,128], index: 1, kind: input, shape index: {}]   ;;  %s2008_s0 = inlined_call_operand.vmem [shape: bf16[512,128], index: 0, kind: input, shape index: {}]   ;;  %s2009_s2 = inlined_call_operand.vmem [shape: f32[512,128], index: 2, kind: output, shape index: {0}]   ;;  %s2010_s3 = inlined_call_operand.vmem [shape: f32[1,128], index: 3, kind: output, shape index: {1}]   ;;  %s2011_s4 = inlined_call_operand.vmem [shape: f32[1,128], index: 4, kind: output, shape index: {2}]  }
   0x1   :  { %v1419_v0 = vld [vmem:[%s2007_s1 + $0x38] sm:$0xff]   ;;  %v1420_v1 = vld [vmem:[%s2007_s1 + $0x30] sm:$0xff]   ;;  %v1421_v2 = vld [vmem:[%s2007_s1 + $0x28] sm:$0xff]   ;;  %88 = vst [vmem:[%s2010_s3] sm:$0x1] %v1459_v42 }
   0x2   :  { %1322 = vmatprep.subr.bf16.mxu0 %v1419_v0  ;;  %1402 = vmatprep.subr.bf16.mxu1 %v1419_v0  ;;  %v1422_v3 = vld [vmem:[%s2007_s1 + $0x20] sm:$0xff]   ;;  %v1423_v5 = vld [vmem:[%s2007_s1 + $0x18] sm:$0xff]   ;;  %v1424_v6 = vld [vmem:[%s2007_s1 + $0x10] sm:$0xff]   ;;  %89 = vst [vmem:[%s2011_s4] sm:$0x1] %v1459_v42 }
   0x3   :  { %1323 = vmatpush3.bf16.msra.mxu0 %v1419_v0  ;;  %1410 = vmatpush3.bf16.msra.mxu1 %v1419_v0  ;;  %v1427_v4 = vld [vmem:[%s2008_s0] sm:$0xff]   ;;  %v1425_v7 = vld [vmem:[%s2007_s1 + $0x8] sm:$0xff]   ;;  %v1429_v11 = vld [vmem:[%s2008_s0 + $0x10] sm:$0xff]  }
   0x4   :  { %1324 = vmatprep.subr.bf16.mxu0 %v1420_v1  ;;  %1403 = vmatprep.subr.bf16.mxu1 %v1420_v1  ;;  %v1426_v8 = vld [vmem:[%s2007_s1] sm:$0xff]   ;;  %v1428_v10 = vld [vmem:[%s2008_s0 + $0x8] sm:$0xff]   ;;  %v1445_v13 = vld [vmem:[%s2008_s0 + $0x90] sm:$0xff]  }
   0x5   :  { %1338 = vmatprep.mubr.bf16.mxu0 %v1427_v4  ;;  %v1443_v9 = vld [vmem:[%s2008_s0 + $0x80] sm:$0xff]   ;;  %v1444_v12 = vld [vmem:[%s2008_s0 + $0x88] sm:$0xff]   ;;  %v1430_v14 = vld [vmem:[%s2008_s0 + $0x18] sm:$0xff]  }
   0x6   :  { %1370 = vmatprep.mubr.bf16.mxu1 %v1443_v9  ;;  %v1431_v15 = vld [vmem:[%s2008_s0 + $0x20] sm:$0xff]   ;;  %v1446_v16 = vld [vmem:[%s2008_s0 + $0x98] sm:$0xff]   ;;  %v1432_v18 = vld [vmem:[%s2008_s0 + $0x28] sm:$0xff]  }
   0x7   :  { %1325 = vmatpush3.bf16.msra.mxu0 %v1420_v1  ;;  %1411 = vmatpush3.bf16.msra.mxu1 %v1420_v1  ;;  %v1447_v17 = vld [vmem:[%s2008_s0 + $0xa0] sm:$0xff]   ;;  %v1448_v19 = vld [vmem:[%s2008_s0 + $0xa8] sm:$0xff]   ;;  %v1433_v20 = vld [vmem:[%s2008_s0 + $0x30] sm:$0xff]  }
   0x8   :  { %1326 = vmatprep.subr.bf16.mxu0 %v1421_v2  ;;  %1404 = vmatprep.subr.bf16.mxu1 %v1421_v2  ;;  %v1449_v21 = vld [vmem:[%s2008_s0 + $0xb0] sm:$0xff]   ;;  %v1434_v22 = vld [vmem:[%s2008_s0 + $0x38] sm:$0xff]   ;;  %v1435_v24 = vld [vmem:[%s2008_s0 + $0x40] sm:$0xff]  }
   0x9   :  { %v1450_v23 = vld [vmem:[%s2008_s0 + $0xb8] sm:$0xff]   ;;  %v1451_v25 = vld [vmem:[%s2008_s0 + $0xc0] sm:$0xff]   ;;  %v1436_v26 = vld [vmem:[%s2008_s0 + $0x48] sm:$0xff]  }
   0xa   :  { %v1452_v27 = vld [vmem:[%s2008_s0 + $0xc8] sm:$0xff]   ;;  %v1437_v28 = vld [vmem:[%s2008_s0 + $0x50] sm:$0xff]   ;;  %v1438_v30 = vld [vmem:[%s2008_s0 + $0x58] sm:$0xff]  }
   0xb   :  { %1327 = vmatpush3.bf16.msra.mxu0 %v1421_v2  ;;  %1412 = vmatpush3.bf16.msra.mxu1 %v1421_v2  ;;  %v1453_v29 = vld [vmem:[%s2008_s0 + $0xd0] sm:$0xff]   ;;  %v1454_v31 = vld [vmem:[%s2008_s0 + $0xd8] sm:$0xff]   ;;  %v1439_v32 = vld [vmem:[%s2008_s0 + $0x60] sm:$0xff]  }
   0xc   :  { %1328 = vmatprep.subr.bf16.mxu0 %v1422_v3  ;;  %1405 = vmatprep.subr.bf16.mxu1 %v1422_v3  ;;  %v1455_v33 = vld [vmem:[%s2008_s0 + $0xe0] sm:$0xff]   ;;  %v1440_v34 = vld [vmem:[%s2008_s0 + $0x68] sm:$0xff]   ;;  %v1441_v36 = vld [vmem:[%s2008_s0 + $0x70] sm:$0xff]  }
   0xd   :  { %v1456_v35 = vld [vmem:[%s2008_s0 + $0xe8] sm:$0xff]   ;;  %v1457_v37 = vld [vmem:[%s2008_s0 + $0xf0] sm:$0xff]   ;;  %v1442_v38 = vld [vmem:[%s2008_s0 + $0x78] sm:$0xff]  }
   0xe   :  { %v1458_v39 = vld [vmem:[%s2008_s0 + $0xf8] sm:$0xff]  }
   0xf   :  { %1329 = vmatpush3.bf16.msra.mxu0 %v1422_v3  ;;  %1413 = vmatpush3.bf16.msra.mxu1 %v1422_v3 }
  0x10   :  { %1330 = vmatprep.subr.bf16.mxu0 %v1423_v5  ;;  %1406 = vmatprep.subr.bf16.mxu1 %v1423_v5 }
  0x13   :  { %1331 = vmatpush3.bf16.msra.mxu0 %v1423_v5  ;;  %1414 = vmatpush3.bf16.msra.mxu1 %v1423_v5 }
  0x14   :  { %1332 = vmatprep.subr.bf16.mxu0 %v1424_v6  ;;  %1407 = vmatprep.subr.bf16.mxu1 %v1424_v6 }
  0x17   :  { %1333 = vmatpush3.bf16.msra.mxu0 %v1424_v6  ;;  %1415 = vmatpush3.bf16.msra.mxu1 %v1424_v6 }
  0x18   :  { %1334 = vmatprep.subr.bf16.mxu0 %v1425_v7  ;;  %1408 = vmatprep.subr.bf16.mxu1 %v1425_v7 }
  0x1b   :  { %1335 = vmatpush3.bf16.msra.mxu0 %v1425_v7  ;;  %1416 = vmatpush3.bf16.msra.mxu1 %v1425_v7 }
  0x1c   :  { %1336 = vmatprep.subr.bf16.mxu0 %v1426_v8  ;;  %1409 = vmatprep.subr.bf16.mxu1 %v1426_v8 }
  0x1f   :  { %1337 = vmatpush3.bf16.msra.mxu0 %v1426_v8  ;;  %1417 = vmatpush3.bf16.msra.mxu1 %v1426_v8 }
  0x22   :  { %1339 = vmatmul.mubr.bf16.vlgmr.msra.gmra.mxu0 %v1428_v10  ;;  %1371 = vmatmul.mubr.bf16.vlgmr.msra.gmra.mxu1 %v1444_v12 }
  0x23   :  { %1342 = vmatprep.mubr.bf16.mxu0 %v1429_v11  ;;  %1374 = vmatprep.mubr.bf16.mxu1 %v1445_v13 }
  0x2a   :  { %1343 = vmatmul.mubr.bf16.gmra.mxu0 %v1430_v14  ;;  %1375 = vmatmul.mubr.bf16.gmra.mxu1 %v1446_v16 }
  0x2b   :  { %1346 = vmatprep.mubr.bf16.mxu0 %v1431_v15  ;;  %1378 = vmatprep.mubr.bf16.mxu1 %v1447_v17 }
  0x32   :  { %1347 = vmatmul.mubr.bf16.gmra.mxu0 %v1432_v18  ;;  %1379 = vmatmul.mubr.bf16.gmra.mxu1 %v1448_v19 }
  0x33   :  { %1350 = vmatprep.mubr.bf16.mxu0 %v1433_v20  ;;  %1382 = vmatprep.mubr.bf16.mxu1 %v1449_v21 }
  0x3a   :  { %1351 = vmatmul.mubr.bf16.gmra.mxu0 %v1434_v22  ;;  %1383 = vmatmul.mubr.bf16.gmra.mxu1 %v1450_v23 }
  0x3b   :  { %1354 = vmatprep.mubr.bf16.mxu0 %v1435_v24  ;;  %1386 = vmatprep.mubr.bf16.mxu1 %v1451_v25 }
  0x42   :  { %1355 = vmatmul.mubr.bf16.gmra.mxu0 %v1436_v26  ;;  %1387 = vmatmul.mubr.bf16.gmra.mxu1 %v1452_v27 }
  0x43   :  { %1358 = vmatprep.mubr.bf16.mxu0 %v1437_v28  ;;  %1390 = vmatprep.mubr.bf16.mxu1 %v1453_v29 }
  0x4a   :  { %1359 = vmatmul.mubr.bf16.gmra.mxu0 %v1438_v30  ;;  %1391 = vmatmul.mubr.bf16.gmra.mxu1 %v1454_v31 }
  0x4b   :  { %1362 = vmatprep.mubr.bf16.mxu0 %v1439_v32  ;;  %1394 = vmatprep.mubr.bf16.mxu1 %v1455_v33 }
  0x52   :  { %1363 = vmatmul.mubr.bf16.gmra.mxu0 %v1440_v34  ;;  %1395 = vmatmul.mubr.bf16.gmra.mxu1 %v1456_v35 }
  0x53   :  { %1366 = vmatprep.mubr.bf16.mxu0 %v1441_v36  ;;  %1398 = vmatprep.mubr.bf16.mxu1 %v1457_v37 }
  0x5a   :  { %1367 = vmatmul.mubr.bf16.gmra.mxu0 %v1442_v38  ;;  %1399 = vmatmul.mubr.bf16.gmra.mxu1 %v1458_v39 }
  0xe2   :  { %v1340_v40 = vpop.f32.mrf.mxu0  ;;  %v1605_v41 = vpop.f32.mrf.mxu1 }
  0xe3   :  { %960 = vst [vmem:[%s2009_s2 + $0x10] sm:$0xff] %v1340_v40  ;;  %992 = vst [vmem:[%s2009_s2 + $0x110] sm:$0xff] %v1605_v41  ;;  %v1097_v54 = vmul.f32 %v1340_v40, %v1340_v40 }
  0xe4   :  { %v508_v43 = vpop.f32.mrf.mxu0  ;;  %v1620_v44 = vpop.f32.mrf.mxu1 }
  0xe5   :  { %958 = vst [vmem:[%s2009_s2] sm:$0xff] %v508_v43  ;;  %990 = vst [vmem:[%s2009_s2 + $0x100] sm:$0xff] %v1620_v44  ;;  %v1095_v49 = vmul.f32 %v508_v43, %v508_v43 }
  0xe6   :  { %v1341_v45 = vpop.f32.mrf.mxu0  ;;  %v1629_v46 = vpop.f32.mrf.mxu1 }
  0xe7   :  { %961 = vst [vmem:[%s2009_s2 + $0x18] sm:$0xff] %v1341_v45  ;;  %993 = vst [vmem:[%s2009_s2 + $0x118] sm:$0xff] %v1629_v46  ;;  %v1098_v59 = vmul.f32 %v1341_v45, %v1341_v45 }
  0xe8   :  { %v511_v47 = vpop.f32.mrf.mxu0  ;;  %v1638_v48 = vpop.f32.mrf.mxu1 }
  0xe9   :  { %959 = vst [vmem:[%s2009_s2 + $0x8] sm:$0xff] %v511_v47  ;;  %v1023_v50 = vadd.f32 %v511_v47, %v508_v43  ;;  %v1096_v51 = vmul.f32 %v511_v47, %v511_v47  ;;  %991 = vst [vmem:[%s2009_s2 + $0x108] sm:$0xff] %v1638_v48 }
  0xea   :  { %v1344_v52 = vpop.f32.mrf.mxu0  ;;  %v1647_v53 = vpop.f32.mrf.mxu1 }
  0xeb   :  { %v1024_v55 = vadd.f32 %v1340_v40, %v1023_v50  ;;  %v1159_v56 = vadd.f32 %v1096_v51, %v1095_v49  ;;  %964 = vst [vmem:[%s2009_s2 + $0x30] sm:$0xff] %v1344_v52  ;;  %996 = vst [vmem:[%s2009_s2 + $0x130] sm:$0xff] %v1647_v53  ;;  %v1101_v10 = vmul.f32 %v1344_v52, %v1344_v52 }
  0xec   :  { %v524_v57 = vpop.f32.mrf.mxu0  ;;  %v1656_v58 = vpop.f32.mrf.mxu1 }
  0xed   :  { %v1160_v60 = vadd.f32 %v1159_v56, %v1097_v54  ;;  %962 = vst [vmem:[%s2009_s2 + $0x20] sm:$0xff] %v524_v57  ;;  %v1025_v61 = vadd.f32 %v1341_v45, %v1024_v55  ;;  %994 = vst [vmem:[%s2009_s2 + $0x120] sm:$0xff] %v1656_v58  ;;  %v1099_v1 = vmul.f32 %v524_v57, %v524_v57 }
  0xee   :  { %v1345_v62 = vpop.f32.mrf.mxu0  ;;  %v1665_v63 = vpop.f32.mrf.mxu1 }
  0xef   :  { %v1026_v0 = vadd.f32 %v1025_v61, %v524_v57  ;;  %v1161_v2 = vadd.f32 %v1160_v60, %v1098_v59  ;;  %965 = vst [vmem:[%s2009_s2 + $0x38] sm:$0xff] %v1345_v62  ;;  %997 = vst [vmem:[%s2009_s2 + $0x138] sm:$0xff] %v1665_v63  ;;  %v1102_v15 = vmul.f32 %v1345_v62, %v1345_v62 }
  0xf0   :  { %v527_v3 = vpop.f32.mrf.mxu0  ;;  %v1674_v4 = vpop.f32.mrf.mxu1 }
  0xf1   :  { %v1162_v5 = vadd.f32 %v1161_v2, %v1099_v1  ;;  %963 = vst [vmem:[%s2009_s2 + $0x28] sm:$0xff] %v527_v3  ;;  %v1027_v6 = vadd.f32 %v1026_v0, %v527_v3  ;;  %v1100_v7 = vmul.f32 %v527_v3, %v527_v3  ;;  %995 = vst [vmem:[%s2009_s2 + $0x128] sm:$0xff] %v1674_v4 }
  0xf2   :  { %v1348_v8 = vpop.f32.mrf.mxu0  ;;  %v1683_v9 = vpop.f32.mrf.mxu1 }
  0xf3   :  { %v1028_v11 = vadd.f32 %v1344_v52, %v1027_v6  ;;  %v1163_v12 = vadd.f32 %v1162_v5, %v1100_v7  ;;  %968 = vst [vmem:[%s2009_s2 + $0x50] sm:$0xff] %v1348_v8  ;;  %1000 = vst [vmem:[%s2009_s2 + $0x150] sm:$0xff] %v1683_v9  ;;  %v1105_v30 = vmul.f32 %v1348_v8, %v1348_v8 }
  0xf4   :  { %v540_v13 = vpop.f32.mrf.mxu0  ;;  %v1692_v14 = vpop.f32.mrf.mxu1 }
  0xf5   :  { %v1164_v16 = vadd.f32 %v1163_v12, %v1101_v10  ;;  %966 = vst [vmem:[%s2009_s2 + $0x40] sm:$0xff] %v540_v13  ;;  %v1029_v17 = vadd.f32 %v1345_v62, %v1028_v11  ;;  %998 = vst [vmem:[%s2009_s2 + $0x140] sm:$0xff] %v1692_v14  ;;  %v1103_v21 = vmul.f32 %v540_v13, %v540_v13 }
  0xf6   :  { %v1349_v18 = vpop.f32.mrf.mxu0  ;;  %v1701_v19 = vpop.f32.mrf.mxu1 }
  0xf7   :  { %v1030_v20 = vadd.f32 %v1029_v17, %v540_v13  ;;  %v1165_v22 = vadd.f32 %v1164_v16, %v1102_v15  ;;  %969 = vst [vmem:[%s2009_s2 + $0x58] sm:$0xff] %v1349_v18  ;;  %1001 = vst [vmem:[%s2009_s2 + $0x158] sm:$0xff] %v1701_v19  ;;  %v1106_v35 = vmul.f32 %v1349_v18, %v1349_v18 }
  0xf8   :  { %v543_v23 = vpop.f32.mrf.mxu0  ;;  %v1710_v24 = vpop.f32.mrf.mxu1 }
  0xf9   :  { %v1166_v25 = vadd.f32 %v1165_v22, %v1103_v21  ;;  %967 = vst [vmem:[%s2009_s2 + $0x48] sm:$0xff] %v543_v23  ;;  %v1031_v26 = vadd.f32 %v1030_v20, %v543_v23  ;;  %v1104_v27 = vmul.f32 %v543_v23, %v543_v23  ;;  %999 = vst [vmem:[%s2009_s2 + $0x148] sm:$0xff] %v1710_v24 }
  0xfa   :  { %v1352_v28 = vpop.f32.mrf.mxu0  ;;  %v1719_v29 = vpop.f32.mrf.mxu1 }
  0xfb   :  { %v1032_v31 = vadd.f32 %v1348_v8, %v1031_v26  ;;  %v1167_v32 = vadd.f32 %v1166_v25, %v1104_v27  ;;  %972 = vst [vmem:[%s2009_s2 + $0x70] sm:$0xff] %v1352_v28  ;;  %1004 = vst [vmem:[%s2009_s2 + $0x170] sm:$0xff] %v1719_v29  ;;  %v1109_v55 = vmul.f32 %v1352_v28, %v1352_v28 }
  0xfc   :  { %v556_v33 = vpop.f32.mrf.mxu0  ;;  %v1728_v34 = vpop.f32.mrf.mxu1 }
  0xfd   :  { %v1168_v36 = vadd.f32 %v1167_v32, %v1105_v30  ;;  %970 = vst [vmem:[%s2009_s2 + $0x60] sm:$0xff] %v556_v33  ;;  %v1033_v37 = vadd.f32 %v1349_v18, %v1032_v31  ;;  %1002 = vst [vmem:[%s2009_s2 + $0x160] sm:$0xff] %v1728_v34  ;;  %v1107_v42 = vmul.f32 %v556_v33, %v556_v33 }
  0xfe   :  { %v1353_v38 = vpop.f32.mrf.mxu0  ;;  %v1737_v39 = vpop.f32.mrf.mxu1 }
  0xff   :  { %v1034_v40 = vadd.f32 %v1033_v37, %v556_v33  ;;  %v1169_v43 = vadd.f32 %v1168_v36, %v1106_v35  ;;  %973 = vst [vmem:[%s2009_s2 + $0x78] sm:$0xff] %v1353_v38  ;;  %1005 = vst [vmem:[%s2009_s2 + $0x178] sm:$0xff] %v1737_v39  ;;  %v1110_v61 = vmul.f32 %v1353_v38, %v1353_v38 }
 0x100   :  { %v559_v45 = vpop.f32.mrf.mxu0  ;;  %v1746_v47 = vpop.f32.mrf.mxu1 }
 0x101   :  { %v1170_v49 = vadd.f32 %v1169_v43, %v1107_v42  ;;  %971 = vst [vmem:[%s2009_s2 + $0x68] sm:$0xff] %v559_v45  ;;  %v1035_v50 = vadd.f32 %v1034_v40, %v559_v45  ;;  %v1108_v51 = vmul.f32 %v559_v45, %v559_v45  ;;  %1003 = vst [vmem:[%s2009_s2 + $0x168] sm:$0xff] %v1746_v47 }
 0x102   :  { %v1356_v52 = vpop.f32.mrf.mxu0  ;;  %v1755_v54 = vpop.f32.mrf.mxu1 }
 0x103   :  { %v1036_v56 = vadd.f32 %v1352_v28, %v1035_v50  ;;  %v1171_v57 = vadd.f32 %v1170_v49, %v1108_v51  ;;  %976 = vst [vmem:[%s2009_s2 + $0x90] sm:$0xff] %v1356_v52  ;;  %1008 = vst [vmem:[%s2009_s2 + $0x190] sm:$0xff] %v1755_v54  ;;  %v1113_v16 = vmul.f32 %v1356_v52, %v1356_v52 }
 0x104   :  { %v572_v59 = vpop.f32.mrf.mxu0  ;;  %v1764_v60 = vpop.f32.mrf.mxu1 }
 0x105   :  { %v1172_v62 = vadd.f32 %v1171_v57, %v1109_v55  ;;  %974 = vst [vmem:[%s2009_s2 + $0x80] sm:$0xff] %v572_v59  ;;  %v1037_v0 = vadd.f32 %v1353_v38, %v1036_v56  ;;  %1006 = vst [vmem:[%s2009_s2 + $0x180] sm:$0xff] %v1764_v60  ;;  %v1111_v5 = vmul.f32 %v572_v59, %v572_v59 }
 0x106   :  { %v1357_v1 = vpop.f32.mrf.mxu0  ;;  %v1773_v2 = vpop.f32.mrf.mxu1 }
 0x107   :  { %v1038_v3 = vadd.f32 %v1037_v0, %v572_v59  ;;  %v1173_v6 = vadd.f32 %v1172_v62, %v1110_v61  ;;  %977 = vst [vmem:[%s2009_s2 + $0x98] sm:$0xff] %v1357_v1  ;;  %1009 = vst [vmem:[%s2009_s2 + $0x198] sm:$0xff] %v1773_v2  ;;  %v1114_v22 = vmul.f32 %v1357_v1, %v1357_v1 }
 0x108   :  { %v575_v7 = vpop.f32.mrf.mxu0  ;;  %v1782_v8 = vpop.f32.mrf.mxu1 }
 0x109   :  { %v1174_v10 = vadd.f32 %v1173_v6, %v1111_v5  ;;  %975 = vst [vmem:[%s2009_s2 + $0x88] sm:$0xff] %v575_v7  ;;  %v1039_v11 = vadd.f32 %v1038_v3, %v575_v7  ;;  %v1112_v12 = vmul.f32 %v575_v7, %v575_v7  ;;  %1007 = vst [vmem:[%s2009_s2 + $0x188] sm:$0xff] %v1782_v8 }
 0x10a   :  { %v1360_v13 = vpop.f32.mrf.mxu0  ;;  %v1791_v15 = vpop.f32.mrf.mxu1 }
 0x10b   :  { %v1040_v17 = vadd.f32 %v1356_v52, %v1039_v11  ;;  %v1175_v18 = vadd.f32 %v1174_v10, %v1112_v12  ;;  %980 = vst [vmem:[%s2009_s2 + $0xb0] sm:$0xff] %v1360_v13  ;;  %1012 = vst [vmem:[%s2009_s2 + $0x1b0] sm:$0xff] %v1791_v15  ;;  %v1117_v42 = vmul.f32 %v1360_v13, %v1360_v13 }
 0x10c   :  { %v588_v20 = vpop.f32.mrf.mxu0  ;;  %v1800_v21 = vpop.f32.mrf.mxu1 }
 0x10d   :  { %v1176_v23 = vadd.f32 %v1175_v18, %v1113_v16  ;;  %978 = vst [vmem:[%s2009_s2 + $0xa0] sm:$0xff] %v588_v20  ;;  %v1041_v25 = vadd.f32 %v1357_v1, %v1040_v17  ;;  %1010 = vst [vmem:[%s2009_s2 + $0x1a0] sm:$0xff] %v1800_v21  ;;  %v1115_v30 = vmul.f32 %v588_v20, %v588_v20 }
 0x10e   :  { %v1361_v26 = vpop.f32.mrf.mxu0  ;;  %v1809_v27 = vpop.f32.mrf.mxu1 }
 0x10f   :  { %v1042_v28 = vadd.f32 %v1041_v25, %v588_v20  ;;  %v1177_v31 = vadd.f32 %v1176_v23, %v1114_v22  ;;  %981 = vst [vmem:[%s2009_s2 + $0xb8] sm:$0xff] %v1361_v26  ;;  %1013 = vst [vmem:[%s2009_s2 + $0x1b8] sm:$0xff] %v1809_v27  ;;  %v1118_v51 = vmul.f32 %v1361_v26, %v1361_v26 }
 0x110   :  { %v591_v32 = vpop.f32.mrf.mxu0  ;;  %v1818_v33 = vpop.f32.mrf.mxu1 }
 0x111   :  { %v1178_v35 = vadd.f32 %v1177_v31, %v1115_v30  ;;  %979 = vst [vmem:[%s2009_s2 + $0xa8] sm:$0xff] %v591_v32  ;;  %v1043_v36 = vadd.f32 %v1042_v28, %v591_v32  ;;  %v1116_v37 = vmul.f32 %v591_v32, %v591_v32  ;;  %1011 = vst [vmem:[%s2009_s2 + $0x1a8] sm:$0xff] %v1818_v33 }
 0x112   :  { %v1364_v38 = vpop.f32.mrf.mxu0  ;;  %v1827_v40 = vpop.f32.mrf.mxu1 }
 0x113   :  { %v1044_v43 = vadd.f32 %v1360_v13, %v1043_v36  ;;  %v1179_v45 = vadd.f32 %v1178_v35, %v1116_v37  ;;  %984 = vst [vmem:[%s2009_s2 + $0xd0] sm:$0xff] %v1364_v38  ;;  %1016 = vst [vmem:[%s2009_s2 + $0x1d0] sm:$0xff] %v1827_v40  ;;  %v1121_v11 = vmul.f32 %v1364_v38, %v1364_v38 }
 0x114   :  { %v604_v49 = vpop.f32.mrf.mxu0  ;;  %v1836_v50 = vpop.f32.mrf.mxu1 }
 0x115   :  { %v1180_v52 = vadd.f32 %v1179_v45, %v1117_v42  ;;  %982 = vst [vmem:[%s2009_s2 + $0xc0] sm:$0xff] %v604_v49  ;;  %v1045_v55 = vadd.f32 %v1361_v26, %v1044_v43  ;;  %1014 = vst [vmem:[%s2009_s2 + $0x1c0] sm:$0xff] %v1836_v50  ;;  %v1119_v61 = vmul.f32 %v604_v49, %v604_v49 }
 0x116   :  { %v1365_v56 = vpop.f32.mrf.mxu0  ;;  %v1845_v57 = vpop.f32.mrf.mxu1 }
 0x117   :  { %v1046_v59 = vadd.f32 %v1045_v55, %v604_v49  ;;  %v1181_v62 = vadd.f32 %v1180_v52, %v1118_v51  ;;  %985 = vst [vmem:[%s2009_s2 + $0xd8] sm:$0xff] %v1365_v56  ;;  %1017 = vst [vmem:[%s2009_s2 + $0x1d8] sm:$0xff] %v1845_v57  ;;  %v1122_v18 = vmul.f32 %v1365_v56, %v1365_v56 }
 0x118   :  { %v607_v0 = vpop.f32.mrf.mxu0  ;;  %v1854_v1 = vpop.f32.mrf.mxu1  ;;  %v1127_v52 = vmul.f32 %v1620_v44, %v1620_v44 }
 0x119   :  { %v1182_v3 = vadd.f32 %v1181_v62, %v1119_v61  ;;  %983 = vst [vmem:[%s2009_s2 + $0xc8] sm:$0xff] %v607_v0  ;;  %v1047_v5 = vadd.f32 %v1046_v59, %v607_v0  ;;  %v1120_v6 = vmul.f32 %v607_v0, %v607_v0  ;;  %1015 = vst [vmem:[%s2009_s2 + $0x1c8] sm:$0xff] %v1854_v1 }
 0x11a   :  { %v1368_v7 = vpop.f32.mrf.mxu0  ;;  %v1863_v10 = vpop.f32.mrf.mxu1  ;;  %v1128_v61 = vmul.f32 %v1638_v48, %v1638_v48  ;;  %v1129_v0 = vmul.f32 %v1605_v41, %v1605_v41 }
 0x11b   :  { %v1048_v12 = vadd.f32 %v1364_v38, %v1047_v5  ;;  %v1183_v13 = vadd.f32 %v1182_v3, %v1120_v6  ;;  %988 = vst [vmem:[%s2009_s2 + $0xf0] sm:$0xff] %v1368_v7  ;;  %1020 = vst [vmem:[%s2009_s2 + $0x1f0] sm:$0xff] %v1863_v10  ;;  %v1125_v38 = vmul.f32 %v1368_v7, %v1368_v7 }
 0x11c   :  { %v620_v16 = vpop.f32.mrf.mxu0  ;;  %v1872_v17 = vpop.f32.mrf.mxu1  ;;  %v1130_v6 = vmul.f32 %v1629_v46, %v1629_v46 }
 0x11d   :  { %v1184_v20 = vadd.f32 %v1183_v13, %v1121_v11  ;;  %986 = vst [vmem:[%s2009_s2 + $0xe0] sm:$0xff] %v620_v16  ;;  %v1049_v22 = vadd.f32 %v1365_v56, %v1048_v12  ;;  %1018 = vst [vmem:[%s2009_s2 + $0x1e0] sm:$0xff] %v1872_v17  ;;  %v1123_v28 = vmul.f32 %v620_v16, %v620_v16 }
 0x11e   :  { %v1369_v23 = vpop.f32.mrf.mxu0  ;;  %v1881_v25 = vpop.f32.mrf.mxu1  ;;  %v1131_v12 = vmul.f32 %v1656_v58, %v1656_v58 }
 0x11f   :  { %v1050_v26 = vadd.f32 %v1049_v22, %v620_v16  ;;  %v1185_v30 = vadd.f32 %v1184_v20, %v1122_v18  ;;  %989 = vst [vmem:[%s2009_s2 + $0xf8] sm:$0xff] %v1369_v23  ;;  %1021 = vst [vmem:[%s2009_s2 + $0x1f8] sm:$0xff] %v1881_v25  ;;  %v1126_v45 = vmul.f32 %v1369_v23, %v1369_v23 }
 0x120   :  { %v623_v31 = vpop.f32.mrf.mxu0  ;;  %v1890_v32 = vpop.f32.mrf.mxu1  ;;  %v1132_v18 = vmul.f32 %v1674_v4, %v1674_v4 }
 0x121   :  { %v1186_v35 = vadd.f32 %v1185_v30, %v1123_v28  ;;  %987 = vst [vmem:[%s2009_s2 + $0xe8] sm:$0xff] %v623_v31  ;;  %v1051_v36 = vadd.f32 %v1050_v26, %v623_v31  ;;  %v1124_v37 = vmul.f32 %v623_v31, %v623_v31  ;;  %1019 = vst [vmem:[%s2009_s2 + $0x1e8] sm:$0xff] %v1890_v32 }
 0x122   :  { %v1135_v28 = vmul.f32 %v1692_v14, %v1692_v14 }
 0x123   :  { %v1052_v42 = vadd.f32 %v1368_v7, %v1051_v36  ;;  %v1187_v43 = vadd.f32 %v1186_v35, %v1124_v37  ;;  %v1136_v35 = vmul.f32 %v1710_v24, %v1710_v24 }
 0x125   :  { %v1053_v49 = vadd.f32 %v1369_v23, %v1052_v42  ;;  %v1188_v51 = vadd.f32 %v1187_v43, %v1125_v38  ;;  %v1139_v43 = vmul.f32 %v1728_v34, %v1728_v34 }
 0x127   :  { %v1189_v55 = vadd.f32 %v1188_v51, %v1126_v45  ;;  %v1054_v56 = vadd.f32 %v1053_v49, %v1620_v44  ;;  %v1140_v51 = vmul.f32 %v1746_v47, %v1746_v47 }
 0x129   :  { %v1055_v59 = vadd.f32 %v1054_v56, %v1638_v48  ;;  %v1190_v62 = vadd.f32 %v1189_v55, %v1127_v52 }
 0x12b   :  { %v1056_v3 = vadd.f32 %v1605_v41, %v1055_v59  ;;  %v1191_v5 = vadd.f32 %v1190_v62, %v1128_v61  ;;  %v1133_v41 = vmul.f32 %v1647_v53, %v1647_v53  ;;  %v1143_v61 = vmul.f32 %v1764_v60, %v1764_v60 }
 0x12d   :  { %v1192_v7 = vadd.f32 %v1191_v5, %v1129_v0  ;;  %v1057_v11 = vadd.f32 %v1629_v46, %v1056_v3  ;;  %v1134_v46 = vmul.f32 %v1665_v63, %v1665_v63  ;;  %v1144_v3 = vmul.f32 %v1782_v8, %v1782_v8 }
 0x12f   :  { %v1058_v44 = vadd.f32 %v1057_v11, %v1656_v58  ;;  %v1193_v13 = vadd.f32 %v1192_v7, %v1130_v6 }
 0x131   :  { %v1194_v48 = vadd.f32 %v1193_v13, %v1131_v12  ;;  %v1059_v16 = vadd.f32 %v1058_v44, %v1674_v4  ;;  %v1147_v44 = vmul.f32 %v1800_v21, %v1800_v21 }
 0x133   :  { %v1060_v20 = vadd.f32 %v1647_v53, %v1059_v16  ;;  %v1195_v22 = vadd.f32 %v1194_v48, %v1132_v18  ;;  %v1137_v53 = vmul.f32 %v1683_v9, %v1683_v9  ;;  %v1148_v48 = vmul.f32 %v1818_v33, %v1818_v33 }
 0x135   :  { %v1196_v23 = vadd.f32 %v1195_v22, %v1133_v41  ;;  %v1061_v26 = vadd.f32 %v1665_v63, %v1060_v20  ;;  %v1138_v63 = vmul.f32 %v1701_v19, %v1701_v19  ;;  %v1151_v22 = vmul.f32 %v1836_v50, %v1836_v50 }
 0x137   :  { %v1062_v58 = vadd.f32 %v1061_v26, %v1692_v14  ;;  %v1197_v30 = vadd.f32 %v1196_v23, %v1134_v46  ;;  %v1152_v26 = vmul.f32 %v1854_v1, %v1854_v1 }
 0x139   :  { %v1198_v31 = vadd.f32 %v1197_v30, %v1135_v28  ;;  %v1063_v4 = vadd.f32 %v1062_v58, %v1710_v24 }
 0x13b   :  { %v1064_v36 = vadd.f32 %v1683_v9, %v1063_v4  ;;  %v1199_v37 = vadd.f32 %v1198_v31, %v1136_v35  ;;  %v1141_v9 = vmul.f32 %v1719_v29, %v1719_v29  ;;  %v1155_v4 = vmul.f32 %v1872_v17, %v1872_v17 }
 0x13d   :  { %v1200_v38 = vadd.f32 %v1199_v37, %v1137_v53  ;;  %v1065_v42 = vadd.f32 %v1701_v19, %v1064_v36  ;;  %v1142_v19 = vmul.f32 %v1737_v39, %v1737_v39  ;;  %v1156_v36 = vmul.f32 %v1890_v32, %v1890_v32 }
 0x13f   :  { %v1066_v14 = vadd.f32 %v1065_v42, %v1728_v34  ;;  %v1201_v45 = vadd.f32 %v1200_v38, %v1138_v63 }
 0x141   :  { %v1202_v49 = vadd.f32 %v1201_v45, %v1139_v43  ;;  %v1067_v24 = vadd.f32 %v1066_v14, %v1746_v47 }
 0x143   :  { %v1068_v52 = vadd.f32 %v1719_v29, %v1067_v24  ;;  %v1203_v55 = vadd.f32 %v1202_v49, %v1140_v51  ;;  %v1145_v29 = vmul.f32 %v1755_v54, %v1755_v54 }
 0x145   :  { %v1204_v56 = vadd.f32 %v1203_v55, %v1141_v9  ;;  %v1069_v59 = vadd.f32 %v1737_v39, %v1068_v52  ;;  %v1146_v39 = vmul.f32 %v1773_v2, %v1773_v2 }
 0x147   :  { %v1070_v34 = vadd.f32 %v1069_v59, %v1764_v60  ;;  %v1205_v62 = vadd.f32 %v1204_v56, %v1142_v19 }
 0x149   :  { %v1206_v0 = vadd.f32 %v1205_v62, %v1143_v61  ;;  %v1071_v47 = vadd.f32 %v1070_v34, %v1782_v8 }
 0x14b   :  { %v1072_v5 = vadd.f32 %v1755_v54, %v1071_v47  ;;  %v1207_v6 = vadd.f32 %v1206_v0, %v1144_v3  ;;  %v1149_v54 = vmul.f32 %v1791_v15, %v1791_v15 }
 0x14d   :  { %v1208_v7 = vadd.f32 %v1207_v6, %v1145_v29  ;;  %v1073_v11 = vadd.f32 %v1773_v2, %v1072_v5  ;;  %v1150_v2 = vmul.f32 %v1809_v27, %v1809_v27 }
 0x14f   :  { %v1074_v60 = vadd.f32 %v1073_v11, %v1800_v21  ;;  %v1209_v12 = vadd.f32 %v1208_v7, %v1146_v39 }
 0x151   :  { %v1210_v13 = vadd.f32 %v1209_v12, %v1147_v44  ;;  %v1075_v8 = vadd.f32 %v1074_v60, %v1818_v33 }
 0x153   :  { %v1076_v16 = vadd.f32 %v1791_v15, %v1075_v8  ;;  %v1211_v18 = vadd.f32 %v1210_v13, %v1148_v48  ;;  %v1153_v15 = vmul.f32 %v1827_v40, %v1827_v40 }
 0x155   :  { %v1212_v41 = vadd.f32 %v1211_v18, %v1149_v54  ;;  %v1077_v20 = vadd.f32 %v1809_v27, %v1076_v16  ;;  %v1154_v27 = vmul.f32 %v1845_v57, %v1845_v57 }
 0x157   :  { %v1078_v21 = vadd.f32 %v1077_v20, %v1836_v50  ;;  %v1213_v46 = vadd.f32 %v1212_v41, %v1150_v2 }
 0x159   :  { %v1214_v23 = vadd.f32 %v1213_v46, %v1151_v22  ;;  %v1079_v33 = vadd.f32 %v1078_v21, %v1854_v1 }
 0x15b   :  { %v1080_v58 = vadd.f32 %v1827_v40, %v1079_v33  ;;  %v1215_v28 = vadd.f32 %v1214_v23, %v1152_v26  ;;  %v1157_v40 = vmul.f32 %v1863_v10, %v1863_v10 }
 0x15d   :  { %v1216_v30 = vadd.f32 %v1215_v28, %v1153_v15  ;;  %v1081_v31 = vadd.f32 %v1845_v57, %v1080_v58  ;;  %v1158_v57 = vmul.f32 %v1881_v25, %v1881_v25 }
 0x15f   :  { %v1082_v50 = vadd.f32 %v1081_v31, %v1872_v17  ;;  %v1217_v35 = vadd.f32 %v1216_v30, %v1154_v27 }
 0x161   :  { %v1218_v53 = vadd.f32 %v1217_v35, %v1155_v4  ;;  %v1083_v1 = vadd.f32 %v1082_v50, %v1890_v32 }
 0x163   :  { %v1084_v37 = vadd.f32 %v1863_v10, %v1083_v1  ;;  %v1219_v63 = vadd.f32 %v1218_v53, %v1156_v36  ;;  %v1022_v10 = vld [vmem:[%s2010_s3] sm:$0x1] }
 0x165   :  { %v1085_v38 = vadd.f32 %v1881_v25, %v1084_v37  ;;  %v1220_v42 = vadd.f32 %v1219_v63, %v1157_v40  ;;  %v1094_v25 = vld [vmem:[%s2011_s4] sm:$0x1] }
 0x167   :  { %v1086_v17 = vrot.slane %v1085_v38, 4  ;;  %v1221_v14 = vadd.f32 %v1220_v42, %v1158_v57 }
 0x169   :  { %v1087_v43 = vadd.f32 %v1086_v17, %v1085_v38  ;;  %v1222_v45 = vrot.slane %v1221_v14, 4 }
 0x16b   :  { %v1088_v49 = vrot.slane %v1087_v43, 2  ;;  %v1223_v24 = vadd.f32 %v1222_v45, %v1221_v14 }
 0x16d   :  { %v1089_v51 = vadd.f32 %v1088_v49, %v1087_v43  ;;  %v1224_v32 = vrot.slane %v1223_v24, 2 }
 0x16f   :  { %v1090_v9 = vrot.slane %v1089_v51, 1  ;;  %v1225_v52 = vadd.f32 %v1224_v32, %v1223_v24 }
 0x171   :  { %v1091_v55 = vadd.f32 %v1090_v9, %v1089_v51  ;;  %v1226_v19 = vrot.slane %v1225_v52, 1 }
 0x173   :  { %v1092_v56 = vadd.f32 %v1091_v55, %v1022_v10  ;;  %v1227_v59 = vadd.f32 %v1226_v19, %v1225_v52 }
 0x175   :  { %1093 = vst [vmem:[%s2010_s3] sm:$0x1] %v1092_v56  ;;  %v1228_v34 = vadd.f32 %v1227_v59, %v1094_v25 }
 0x177   :  { %1229 = vst [vmem:[%s2011_s4] sm:$0x1] %v1228_v34 }

// kernel: _lambda_.17
= control target key start
LH: loop header
LB: loop body
LE: loop exit
PB: predicated region body
PF: predicated region fallthrough
CT: control target
= control target key end

     0   :  { %v523_v16 = vmov 0.0   ;;  %s663_s1 = inlined_call_operand.vmem [shape: bf16[128,128], index: 1, kind: input, shape index: {}]   ;;  %s664_s0 = inlined_call_operand.vmem [shape: bf16[128,128], index: 0, kind: input, shape index: {}]   ;;  %s665_s3 = inlined_call_operand.vmem [shape: f32[1,128], index: 3, kind: output, shape index: {1}]   ;;  %s666_s4 = inlined_call_operand.vmem [shape: f32[1,128], index: 4, kind: output, shape index: {2}]   ;;  %s667_s2 = inlined_call_operand.vmem [shape: f32[128,128], index: 2, kind: output, shape index: {0}]  }
   0x1   :  { %v507_v0 = vld [vmem:[%s663_s1 + $0x38] sm:$0xff]   ;;  %v508_v1 = vld [vmem:[%s663_s1 + $0x30] sm:$0xff]   ;;  %v509_v2 = vld [vmem:[%s663_s1 + $0x28] sm:$0xff]   ;;  %40 = vst [vmem:[%s665_s3] sm:$0x1] %v523_v16 }
   0x2   :  { %458 = vmatprep.subr.bf16.mxu0 %v507_v0  ;;  %490 = vmatprep.subr.bf16.mxu1 %v507_v0  ;;  %v510_v3 = vld [vmem:[%s663_s1 + $0x20] sm:$0xff]   ;;  %v511_v5 = vld [vmem:[%s663_s1 + $0x18] sm:$0xff]   ;;  %v512_v7 = vld [vmem:[%s663_s1 + $0x10] sm:$0xff]   ;;  %41 = vst [vmem:[%s666_s4] sm:$0x1] %v523_v16 }
   0x3   :  { %459 = vmatpush3.bf16.msra.mxu0 %v507_v0  ;;  %498 = vmatpush3.bf16.msra.mxu1 %v507_v0  ;;  %v515_v4 = vld [vmem:[%s664_s0] sm:$0xff]   ;;  %v513_v8 = vld [vmem:[%s663_s1 + $0x8] sm:$0xff]   ;;  %v517_v12 = vld [vmem:[%s664_s0 + $0x10] sm:$0xff]  }
   0x4   :  { %460 = vmatprep.subr.bf16.mxu0 %v508_v1  ;;  %491 = vmatprep.subr.bf16.mxu1 %v508_v1  ;;  %v519_v6 = vld [vmem:[%s664_s0 + $0x20] sm:$0xff]   ;;  %v516_v10 = vld [vmem:[%s664_s0 + $0x8] sm:$0xff]   ;;  %v521_v13 = vld [vmem:[%s664_s0 + $0x30] sm:$0xff]  }
   0x5   :  { %474 = vmatprep.mubr.bf16.mxu0 %v515_v4  ;;  %482 = vmatprep.mubr.bf16.mxu1 %v519_v6  ;;  %v514_v9 = vld [vmem:[%s663_s1] sm:$0xff]   ;;  %v520_v11 = vld [vmem:[%s664_s0 + $0x28] sm:$0xff]   ;;  %v518_v14 = vld [vmem:[%s664_s0 + $0x18] sm:$0xff]  }
   0x6   :  { %v522_v15 = vld [vmem:[%s664_s0 + $0x38] sm:$0xff]  }
   0x7   :  { %461 = vmatpush3.bf16.msra.mxu0 %v508_v1  ;;  %499 = vmatpush3.bf16.msra.mxu1 %v508_v1 }
   0x8   :  { %462 = vmatprep.subr.bf16.mxu0 %v509_v2  ;;  %492 = vmatprep.subr.bf16.mxu1 %v509_v2 }
   0xb   :  { %463 = vmatpush3.bf16.msra.mxu0 %v509_v2  ;;  %500 = vmatpush3.bf16.msra.mxu1 %v509_v2 }
   0xc   :  { %464 = vmatprep.subr.bf16.mxu0 %v510_v3  ;;  %493 = vmatprep.subr.bf16.mxu1 %v510_v3 }
   0xf   :  { %465 = vmatpush3.bf16.msra.mxu0 %v510_v3  ;;  %501 = vmatpush3.bf16.msra.mxu1 %v510_v3 }
  0x10   :  { %466 = vmatprep.subr.bf16.mxu0 %v511_v5  ;;  %494 = vmatprep.subr.bf16.mxu1 %v511_v5 }
  0x13   :  { %467 = vmatpush3.bf16.msra.mxu0 %v511_v5  ;;  %502 = vmatpush3.bf16.msra.mxu1 %v511_v5 }
  0x14   :  { %468 = vmatprep.subr.bf16.mxu0 %v512_v7  ;;  %495 = vmatprep.subr.bf16.mxu1 %v512_v7 }
  0x17   :  { %469 = vmatpush3.bf16.msra.mxu0 %v512_v7  ;;  %503 = vmatpush3.bf16.msra.mxu1 %v512_v7 }
  0x18   :  { %470 = vmatprep.subr.bf16.mxu0 %v513_v8  ;;  %496 = vmatprep.subr.bf16.mxu1 %v513_v8 }
  0x1b   :  { %471 = vmatpush3.bf16.msra.mxu0 %v513_v8  ;;  %504 = vmatpush3.bf16.msra.mxu1 %v513_v8 }
  0x1c   :  { %472 = vmatprep.subr.bf16.mxu0 %v514_v9  ;;  %497 = vmatprep.subr.bf16.mxu1 %v514_v9 }
  0x1f   :  { %473 = vmatpush3.bf16.msra.mxu0 %v514_v9  ;;  %505 = vmatpush3.bf16.msra.mxu1 %v514_v9 }
  0x22   :  { %475 = vmatmul.mubr.bf16.vlgmr.msra.gmra.mxu0 %v516_v10  ;;  %483 = vmatmul.mubr.bf16.vlgmr.msra.gmra.mxu1 %v520_v11 }
  0x23   :  { %478 = vmatprep.mubr.bf16.mxu0 %v517_v12  ;;  %486 = vmatprep.mubr.bf16.mxu1 %v521_v13 }
  0x2a   :  { %479 = vmatmul.mubr.bf16.gmra.mxu0 %v518_v14  ;;  %487 = vmatmul.mubr.bf16.gmra.mxu1 %v522_v15 }
  0xe2   :  { %v476_v17 = vpop.f32.mrf.mxu0  ;;  %v484_v18 = vpop.f32.mrf.mxu1 }
  0xe3   :  { %336 = vst [vmem:[%s667_s2 + $0x10] sm:$0xff] %v476_v17  ;;  %344 = vst [vmem:[%s667_s2 + $0x50] sm:$0xff] %v484_v18  ;;  %v377_v30 = vmul.f32 %v476_v17, %v476_v17  ;;  %v385_v60 = vmul.f32 %v484_v18, %v484_v18 }
  0xe4   :  { %v220_v19 = vpop.f32.mrf.mxu0  ;;  %v252_v20 = vpop.f32.mrf.mxu1 }
  0xe5   :  { %334 = vst [vmem:[%s667_s2] sm:$0xff] %v220_v19  ;;  %342 = vst [vmem:[%s667_s2 + $0x40] sm:$0xff] %v252_v20  ;;  %v375_v25 = vmul.f32 %v220_v19, %v220_v19  ;;  %v383_v54 = vmul.f32 %v252_v20, %v252_v20 }
  0xe6   :  { %v477_v21 = vpop.f32.mrf.mxu0  ;;  %v485_v22 = vpop.f32.mrf.mxu1 }
  0xe7   :  { %337 = vst [vmem:[%s667_s2 + $0x18] sm:$0xff] %v477_v21  ;;  %345 = vst [vmem:[%s667_s2 + $0x58] sm:$0xff] %v485_v22  ;;  %v378_v35 = vmul.f32 %v477_v21, %v477_v21  ;;  %v386_v63 = vmul.f32 %v485_v22, %v485_v22 }
  0xe8   :  { %v223_v23 = vpop.f32.mrf.mxu0  ;;  %v255_v24 = vpop.f32.mrf.mxu1 }
  0xe9   :  { %335 = vst [vmem:[%s667_s2 + $0x8] sm:$0xff] %v223_v23  ;;  %v351_v26 = vadd.f32 %v223_v23, %v220_v19  ;;  %v376_v27 = vmul.f32 %v223_v23, %v223_v23  ;;  %343 = vst [vmem:[%s667_s2 + $0x48] sm:$0xff] %v255_v24  ;;  %v384_v58 = vmul.f32 %v255_v24, %v255_v24 }
  0xea   :  { %v480_v28 = vpop.f32.mrf.mxu0  ;;  %v488_v29 = vpop.f32.mrf.mxu1 }
  0xeb   :  { %v352_v31 = vadd.f32 %v476_v17, %v351_v26  ;;  %v391_v32 = vadd.f32 %v376_v27, %v375_v25  ;;  %340 = vst [vmem:[%s667_s2 + $0x30] sm:$0xff] %v480_v28  ;;  %348 = vst [vmem:[%s667_s2 + $0x70] sm:$0xff] %v488_v29  ;;  %v381_v48 = vmul.f32 %v480_v28, %v480_v28  ;;  %v374_v27 = vld [vmem:[%s666_s4] sm:$0x1] }
  0xec   :  { %v236_v33 = vpop.f32.mrf.mxu0  ;;  %v268_v34 = vpop.f32.mrf.mxu1  ;;  %v389_v8 = vmul.f32 %v488_v29, %v488_v29 }
  0xed   :  { %v392_v36 = vadd.f32 %v391_v32, %v377_v30  ;;  %338 = vst [vmem:[%s667_s2 + $0x20] sm:$0xff] %v236_v33  ;;  %v353_v37 = vadd.f32 %v477_v21, %v352_v31  ;;  %346 = vst [vmem:[%s667_s2 + $0x60] sm:$0xff] %v268_v34  ;;  %v379_v41 = vmul.f32 %v236_v33, %v236_v33 }
  0xee   :  { %v481_v38 = vpop.f32.mrf.mxu0  ;;  %v489_v39 = vpop.f32.mrf.mxu1  ;;  %v387_v3 = vmul.f32 %v268_v34, %v268_v34 }
  0xef   :  { %v354_v40 = vadd.f32 %v353_v37, %v236_v33  ;;  %v393_v42 = vadd.f32 %v392_v36, %v378_v35  ;;  %341 = vst [vmem:[%s667_s2 + $0x38] sm:$0xff] %v481_v38  ;;  %349 = vst [vmem:[%s667_s2 + $0x78] sm:$0xff] %v489_v39  ;;  %v382_v51 = vmul.f32 %v481_v38, %v481_v38 }
  0xf0   :  { %v239_v43 = vpop.f32.mrf.mxu0  ;;  %v271_v44 = vpop.f32.mrf.mxu1  ;;  %v390_v11 = vmul.f32 %v489_v39, %v489_v39 }
  0xf1   :  { %v394_v45 = vadd.f32 %v393_v42, %v379_v41  ;;  %339 = vst [vmem:[%s667_s2 + $0x28] sm:$0xff] %v239_v43  ;;  %v355_v46 = vadd.f32 %v354_v40, %v239_v43  ;;  %v380_v47 = vmul.f32 %v239_v43, %v239_v43  ;;  %347 = vst [vmem:[%s667_s2 + $0x68] sm:$0xff] %v271_v44 }
  0xf2   :  { %v388_v7 = vmul.f32 %v271_v44, %v271_v44 }
  0xf3   :  { %v356_v49 = vadd.f32 %v480_v28, %v355_v46  ;;  %v395_v50 = vadd.f32 %v394_v45, %v380_v47 }
  0xf5   :  { %v357_v52 = vadd.f32 %v481_v38, %v356_v49  ;;  %v396_v53 = vadd.f32 %v395_v50, %v381_v48 }
  0xf7   :  { %v397_v55 = vadd.f32 %v396_v53, %v382_v51  ;;  %v358_v56 = vadd.f32 %v357_v52, %v252_v20 }
  0xf9   :  { %v359_v57 = vadd.f32 %v358_v56, %v255_v24  ;;  %v398_v59 = vadd.f32 %v397_v55, %v383_v54  ;;  %v350_v24 = vld [vmem:[%s665_s3] sm:$0x1] }
  0xfb   :  { %v360_v61 = vadd.f32 %v484_v18, %v359_v57  ;;  %v399_v62 = vadd.f32 %v398_v59, %v384_v58 }
  0xfd   :  { %v400_v0 = vadd.f32 %v399_v62, %v385_v60  ;;  %v361_v1 = vadd.f32 %v485_v22, %v360_v61 }
  0xff   :  { %v362_v2 = vadd.f32 %v361_v1, %v268_v34  ;;  %v401_v4 = vadd.f32 %v400_v0, %v386_v63 }
 0x101   :  { %v402_v5 = vadd.f32 %v401_v4, %v387_v3  ;;  %v363_v6 = vadd.f32 %v362_v2, %v271_v44 }
 0x103   :  { %v364_v9 = vadd.f32 %v488_v29, %v363_v6  ;;  %v403_v10 = vadd.f32 %v402_v5, %v388_v7 }
 0x105   :  { %v365_v12 = vadd.f32 %v489_v39, %v364_v9  ;;  %v404_v13 = vadd.f32 %v403_v10, %v389_v8 }
 0x107   :  { %v366_v14 = vrot.slane %v365_v12, 4  ;;  %v405_v15 = vadd.f32 %v404_v13, %v390_v11 }
 0x109   :  { %v367_v16 = vadd.f32 %v366_v14, %v365_v12  ;;  %v406_v17 = vrot.slane %v405_v15, 4 }
 0x10b   :  { %v368_v18 = vrot.slane %v367_v16, 2  ;;  %v407_v19 = vadd.f32 %v406_v17, %v405_v15 }
 0x10d   :  { %v369_v20 = vadd.f32 %v368_v18, %v367_v16  ;;  %v408_v21 = vrot.slane %v407_v19, 2 }
 0x10f   :  { %v370_v22 = vrot.slane %v369_v20, 1  ;;  %v409_v23 = vadd.f32 %v408_v21, %v407_v19 }
 0x111   :  { %v371_v25 = vadd.f32 %v370_v22, %v369_v20  ;;  %v410_v26 = vrot.slane %v409_v23, 1 }
 0x113   :  { %v372_v28 = vadd.f32 %v371_v25, %v350_v24  ;;  %v411_v29 = vadd.f32 %v410_v26, %v409_v23 }
 0x115   :  { %373 = vst [vmem:[%s665_s3] sm:$0x1] %v372_v28  ;;  %v412_v30 = vadd.f32 %v411_v29, %v374_v27 }
 0x117   :  { %413 = vst [vmem:[%s666_s4] sm:$0x1] %v412_v30 }

// kernel: _lambda_.18
= control target key start
LH: loop header
LB: loop body
LE: loop exit
PB: predicated region body
PF: predicated region fallthrough
CT: control target
= control target key end

     0   :  { %s305_s0 = inlined_call_operand.vmem [shape: f32[128,128], index: 0, kind: input, shape index: {}]   ;;  %s306_s1 = inlined_call_operand.vmem [shape: f32[1,128], index: 1, kind: input, shape index: {}]   ;;  %s307_s2 = inlined_call_operand.vmem [shape: f32[1,128], index: 2, kind: input, shape index: {}]   ;;  %s308_s3 = inlined_call_operand.vmem [shape: f32[128,128], index: 3, kind: output, shape index: {}]  }
   0x1   :  { %v14_v0 = vld [vmem:[%s305_s0] sm:$0xff]  ;;  %v15_v4 = vld [vmem:[%s305_s0 + $0x8] sm:$0xff]  ;;  %v16_v5 = vld [vmem:[%s305_s0 + $0x10] sm:$0xff] }
   0x2   :  { %v172_v1 = vld [vmem:[%s306_s1] ss:$0 sm:$0xff]  ;;  %v17_v6 = vld [vmem:[%s305_s0 + $0x18] sm:$0xff]  ;;  %v19_v11 = vld [vmem:[%s305_s0 + $0x28] sm:$0xff] }
   0x3   :  { %v177_v2 = vld [vmem:[%s307_s2] ss:$0 sm:$0xff]  ;;  %v37_v3 = vmul.f32 %v172_v1, %v14_v0  ;;  %v38_v7 = vmul.f32 %v172_v1, %v15_v4  ;;  %v39_v8 = vmul.f32 %v172_v1, %v16_v5  ;;  %v40_v9 = vmul.f32 %v172_v1, %v17_v6  ;;  %v20_v12 = vld [vmem:[%s305_s0 + $0x30] sm:$0xff]  ;;  %v21_v17 = vld [vmem:[%s305_s0 + $0x38] sm:$0xff] }
   0x4   :  { %v18_v10 = vld [vmem:[%s305_s0 + $0x20] sm:$0xff]  ;;  %v42_v15 = vmul.f32 %v172_v1, %v19_v11  ;;  %v43_v16 = vmul.f32 %v172_v1, %v20_v12  ;;  %v44_v21 = vmul.f32 %v172_v1, %v21_v17  ;;  %v23_v30 = vld [vmem:[%s305_s0 + $0x48] sm:$0xff]  ;;  %v24_v31 = vld [vmem:[%s305_s0 + $0x50] sm:$0xff] }
   0x5   :  { %v60_v13 = vadd.f32 %v177_v2, %v37_v3  ;;  %v41_v14 = vmul.f32 %v172_v1, %v18_v10  ;;  %v61_v18 = vadd.f32 %v177_v2, %v38_v7  ;;  %v62_v19 = vadd.f32 %v177_v2, %v39_v8  ;;  %v22_v25 = vld [vmem:[%s305_s0 + $0x40] sm:$0xff]  ;;  %v25_v43 = vld [vmem:[%s305_s0 + $0x58] sm:$0xff]  ;;  %v27_v45 = vld [vmem:[%s305_s0 + $0x68] sm:$0xff] }
   0x6   :  { %v63_v20 = vadd.f32 %v177_v2, %v40_v9  ;;  %v65_v24 = vadd.f32 %v177_v2, %v42_v15  ;;  %v66_v37 = vadd.f32 %v177_v2, %v43_v16  ;;  %v67_v38 = vadd.f32 %v177_v2, %v44_v21  ;;  %v26_v44 = vld [vmem:[%s305_s0 + $0x60] sm:$0xff]  ;;  %v28_v56 = vld [vmem:[%s305_s0 + $0x70] sm:$0xff]  ;;  %v29_v4 = vld [vmem:[%s305_s0 + $0x78] sm:$0xff] }
   0x7   :  { %vm76_vm0 = vcmp.gt.f32.partialorder %v60_v13, 0.0  ;;  %v92_v22 = vmul.f32 0.1, %v60_v13  ;;  %v64_v23 = vadd.f32 %v177_v2, %v41_v14  ;;  %vm77_vm1 = vcmp.gt.f32.partialorder %v61_v18, 0.0 }
   0x8   :  { %v93_v26 = vmul.f32 0.1, %v61_v18  ;;  %vm78_vm2 = vcmp.gt.f32.partialorder %v62_v19, 0.0  ;;  %v94_v27 = vmul.f32 0.1, %v62_v19  ;;  %vm79_vm3 = vcmp.gt.f32.partialorder %v63_v20, 0.0 }
   0x9   :  { %v108_v28 = vsel %vm76_vm0, %v60_v13, %v92_v22  ;;  %v95_v29 = vmul.f32 0.1, %v63_v20  ;;  %vm80_vm4 = vcmp.gt.f32.partialorder %v64_v23, 0.0  ;;  %v96_v34 = vmul.f32 0.1, %v64_v23 }
   0xa   :  { %124 = vst [vmem:[%s308_s3] sm:$0xff] %v108_v28  ;;  %v109_v32 = vsel %vm77_vm1, %v61_v18, %v93_v26  ;;  %v110_v33 = vsel %vm78_vm2, %v62_v19, %v94_v27  ;;  %vm81_vm5 = vcmp.gt.f32.partialorder %v65_v24, 0.0  ;;  %v97_v36 = vmul.f32 0.1, %v65_v24 }
   0xb   :  { %125 = vst [vmem:[%s308_s3 + $0x8] sm:$0xff] %v109_v32  ;;  %126 = vst [vmem:[%s308_s3 + $0x10] sm:$0xff] %v110_v33  ;;  %v111_v35 = vsel %vm79_vm3, %v63_v20, %v95_v29  ;;  %v112_v39 = vsel %vm80_vm4, %v64_v23, %v96_v34  ;;  %v45_v40 = vmul.f32 %v172_v1, %v22_v25  ;;  %vm82_vm6 = vcmp.gt.f32.partialorder %v66_v37, 0.0 }
   0xc   :  { %127 = vst [vmem:[%s308_s3 + $0x18] sm:$0xff] %v111_v35  ;;  %v46_v41 = vmul.f32 %v172_v1, %v23_v30  ;;  %v47_v42 = vmul.f32 %v172_v1, %v24_v31  ;;  %128 = vst [vmem:[%s308_s3 + $0x20] sm:$0xff] %v112_v39  ;;  %v113_v46 = vsel %vm81_vm5, %v65_v24, %v97_v36  ;;  %v98_v47 = vmul.f32 0.1, %v66_v37 }
   0xd   :  { %vm83_vm7 = vcmp.gt.f32.partialorder %v67_v38, 0.0  ;;  %129 = vst [vmem:[%s308_s3 + $0x28] sm:$0xff] %v113_v46  ;;  %v99_v48 = vmul.f32 0.1, %v67_v38  ;;  %v68_v49 = vadd.f32 %v177_v2, %v45_v40  ;;  %v48_v53 = vmul.f32 %v172_v1, %v25_v43 }
   0xe   :  { %v69_v50 = vadd.f32 %v177_v2, %v46_v41  ;;  %v70_v51 = vadd.f32 %v177_v2, %v47_v42  ;;  %v114_v52 = vsel %vm82_vm6, %v66_v37, %v98_v47  ;;  %v49_v54 = vmul.f32 %v172_v1, %v26_v44 }
   0xf   :  { %v50_v55 = vmul.f32 %v172_v1, %v27_v45  ;;  %130 = vst [vmem:[%s308_s3 + $0x30] sm:$0xff] %v114_v52  ;;  %v115_v57 = vsel %vm83_vm7, %v67_v38, %v99_v48  ;;  %vm84_vm8 = vcmp.gt.f32.partialorder %v68_v49, 0.0  ;;  %v100_v58 = vmul.f32 0.1, %v68_v49 }
  0x10   :  { %vm85_vm9 = vcmp.gt.f32.partialorder %v69_v50, 0.0  ;;  %131 = vst [vmem:[%s308_s3 + $0x38] sm:$0xff] %v115_v57  ;;  %v101_v59 = vmul.f32 0.1, %v69_v50  ;;  %vm86_vm10 = vcmp.gt.f32.partialorder %v70_v51, 0.0  ;;  %v71_v61 = vadd.f32 %v177_v2, %v48_v53 }
  0x11   :  { %v102_v60 = vmul.f32 0.1, %v70_v51  ;;  %v116_v62 = vsel %vm84_vm8, %v68_v49, %v100_v58  ;;  %v72_v63 = vadd.f32 %v177_v2, %v49_v54  ;;  %v73_v0 = vadd.f32 %v177_v2, %v50_v55 }
  0x12   :  { %v51_v3 = vmul.f32 %v172_v1, %v28_v56  ;;  %132 = vst [vmem:[%s308_s3 + $0x40] sm:$0xff] %v116_v62  ;;  %v117_v5 = vsel %vm85_vm9, %v69_v50, %v101_v59  ;;  %vm87_vm11 = vcmp.gt.f32.partialorder %v71_v61, 0.0  ;;  %v103_v7 = vmul.f32 0.1, %v71_v61 }
  0x13   :  { %v118_v6 = vsel %vm86_vm10, %v70_v51, %v102_v60  ;;  %133 = vst [vmem:[%s308_s3 + $0x48] sm:$0xff] %v117_v5  ;;  %vm88_vm12 = vcmp.gt.f32.partialorder %v72_v63, 0.0  ;;  %v104_v8 = vmul.f32 0.1, %v72_v63  ;;  %vm89_vm13 = vcmp.gt.f32.partialorder %v73_v0, 0.0 }
  0x14   :  { %134 = vst [vmem:[%s308_s3 + $0x50] sm:$0xff] %v118_v6  ;;  %v105_v9 = vmul.f32 0.1, %v73_v0  ;;  %v119_v10 = vsel %vm87_vm11, %v71_v61, %v103_v7  ;;  %v74_v11 = vadd.f32 %v177_v2, %v51_v3  ;;  %v52_v12 = vmul.f32 %v172_v1, %v29_v4 }
  0x15   :  { %135 = vst [vmem:[%s308_s3 + $0x58] sm:$0xff] %v119_v10  ;;  %v120_v13 = vsel %vm88_vm12, %v72_v63, %v104_v8 }
  0x16   :  { %v121_v14 = vsel %vm89_vm13, %v73_v0, %v105_v9  ;;  %136 = vst [vmem:[%s308_s3 + $0x60] sm:$0xff] %v120_v13  ;;  %vm90_vm14 = vcmp.gt.f32.partialorder %v74_v11, 0.0  ;;  %v106_v15 = vmul.f32 0.1, %v74_v11  ;;  %v75_v16 = vadd.f32 %v177_v2, %v52_v12 }
  0x17   :  { %137 = vst [vmem:[%s308_s3 + $0x68] sm:$0xff] %v121_v14 }
  0x18   :  { %v122_v17 = vsel %vm90_vm14, %v74_v11, %v106_v15  ;;  %vm91_vm15 = vcmp.gt.f32.partialorder %v75_v16, 0.0  ;;  %v107_v1 = vmul.f32 0.1, %v75_v16 }
  0x19   :  { %138 = vst [vmem:[%s308_s3 + $0x70] sm:$0xff] %v122_v17 }
  0x1a   :  { %v123_v18 = vsel %vm91_vm15, %v75_v16, %v107_v1 }
  0x1b   :  { %139 = vst [vmem:[%s308_s3 + $0x78] sm:$0xff] %v123_v18 }

// kernel: _lambda_.21
= control target key start
LH: loop header
LB: loop body
LE: loop exit
PB: predicated region body
PF: predicated region fallthrough
CT: control target
= control target key end

     0   :  { %s134_s0 = inlined_call_operand.vmem [shape: f32[8,1024], index: 0, kind: input, shape index: {}]   ;;  %s135_s1 = inlined_call_operand.vmem [shape: f32[8,1024], index: 1, kind: input, shape index: {}]   ;;  %s136_s2 = inlined_call_operand.vmem [shape: f32[8,1024], index: 2, kind: output, shape index: {}]  }
   0x1   :  { %v11_v0 = vld [vmem:[%s134_s0] sm:$0xff]  ;;  %v12_v2 = vld [vmem:[%s134_s0 + $0x8] sm:$0xff]  ;;  %v13_v5 = vld [vmem:[%s134_s0 + $0x10] sm:$0xff] }
   0x2   :  { %v19_v1 = vld [vmem:[%s135_s1] sm:$0xff]  ;;  %v20_v4 = vld [vmem:[%s135_s1 + $0x8] sm:$0xff]  ;;  %v21_v6 = vld [vmem:[%s135_s1 + $0x10] sm:$0xff] }
   0x3   :  { %v27_v3 = vadd.f32 %v19_v1, %v11_v0  ;;  %v28_v7 = vadd.f32 %v20_v4, %v12_v2  ;;  %v29_v8 = vadd.f32 %v21_v6, %v13_v5  ;;  %v14_v9 = vld [vmem:[%s134_s0 + $0x18] sm:$0xff]  ;;  %v15_v11 = vld [vmem:[%s134_s0 + $0x20] sm:$0xff]  ;;  %v16_v14 = vld [vmem:[%s134_s0 + $0x28] sm:$0xff] }
   0x4   :  { %v22_v10 = vld [vmem:[%s135_s1 + $0x18] sm:$0xff]  ;;  %v23_v13 = vld [vmem:[%s135_s1 + $0x20] sm:$0xff]  ;;  %v24_v15 = vld [vmem:[%s135_s1 + $0x28] sm:$0xff] }
   0x5   :  { %35 = vst [vmem:[%s136_s2] sm:$0xff] %v27_v3  ;;  %v30_v12 = vadd.f32 %v22_v10, %v14_v9  ;;  %36 = vst [vmem:[%s136_s2 + $0x8] sm:$0xff] %v28_v7  ;;  %v31_v16 = vadd.f32 %v23_v13, %v15_v11  ;;  %v32_v17 = vadd.f32 %v24_v15, %v16_v14  ;;  %v17_v18 = vld [vmem:[%s134_s0 + $0x30] sm:$0xff]  ;;  %v18_v20 = vld [vmem:[%s134_s0 + $0x38] sm:$0xff] }
   0x6   :  { %37 = vst [vmem:[%s136_s2 + $0x10] sm:$0xff] %v29_v8  ;;  %v25_v19 = vld [vmem:[%s135_s1 + $0x30] sm:$0xff]  ;;  %v26_v22 = vld [vmem:[%s135_s1 + $0x38] sm:$0xff] }
   0x7   :  { %38 = vst [vmem:[%s136_s2 + $0x18] sm:$0xff] %v30_v12  ;;  %v33_v21 = vadd.f32 %v25_v19, %v17_v18  ;;  %39 = vst [vmem:[%s136_s2 + $0x20] sm:$0xff] %v31_v16  ;;  %v34_v23 = vadd.f32 %v26_v22, %v18_v20 }
   0x8   :  { %40 = vst [vmem:[%s136_s2 + $0x28] sm:$0xff] %v32_v17 }
   0x9   :  { %41 = vst [vmem:[%s136_s2 + $0x30] sm:$0xff] %v33_v21  ;;  %42 = vst [vmem:[%s136_s2 + $0x38] sm:$0xff] %v34_v23 }

// kernel: _lambda_.22
= control target key start
LH: loop header
LB: loop body
LE: loop exit
PB: predicated region body
PF: predicated region fallthrough
CT: control target
= control target key end

     0   :  { %v381_v20 = vmov 0.0   ;;  %s497_s1 = inlined_call_operand.vmem [shape: bf16[256,128], index: 1, kind: input, shape index: {}]   ;;  %s498_s0 = inlined_call_operand.vmem [shape: bf16[32,256], index: 0, kind: input, shape index: {}]   ;;  %s499_s3 = inlined_call_operand.vmem [shape: f32[1,128], index: 3, kind: output, shape index: {1}]   ;;  %s500_s4 = inlined_call_operand.vmem [shape: f32[1,128], index: 4, kind: output, shape index: {2}]   ;;  %s501_s2 = inlined_call_operand.vmem [shape: f32[32,128], index: 2, kind: output, shape index: {0}]  }
   0x1   :  { %v359_v0 = vld [vmem:[%s497_s1 + $0x78] sm:$0xff]   ;;  %v361_v2 = vld [vmem:[%s497_s1 + $0x70] sm:$0xff]   ;;  %v363_v4 = vld [vmem:[%s497_s1 + $0x68] sm:$0xff]   ;;  %28 = vst [vmem:[%s499_s3] sm:$0x1] %v381_v20 }
   0x2   :  { %v360_v1 = vld [vmem:[%s497_s1 + $0x38] sm:$0xff]   ;;  %314 = vmatprep.subr.bf16.mxu0 %v359_v0  ;;  %342 = vmatprep.subr.bf16.mxu1 %v359_v0  ;;  %v362_v3 = vld [vmem:[%s497_s1 + $0x30] sm:$0xff]   ;;  %v364_v5 = vld [vmem:[%s497_s1 + $0x28] sm:$0xff]   ;;  %29 = vst [vmem:[%s500_s4] sm:$0x1] %v381_v20 }
   0x3   :  { %315 = vmatpush3.bf16.msra.mxu0 %v360_v1  ;;  %350 = vmatpush3.bf16.msra.mxu1 %v360_v1  ;;  %v365_v6 = vld [vmem:[%s497_s1 + $0x60] sm:$0xff]   ;;  %v367_v8 = vld [vmem:[%s497_s1 + $0x58] sm:$0xff]   ;;  %v369_v10 = vld [vmem:[%s497_s1 + $0x50] sm:$0xff]  }
   0x4   :  { %316 = vmatprep.subr.bf16.mxu0 %v361_v2  ;;  %343 = vmatprep.subr.bf16.mxu1 %v361_v2  ;;  %v366_v7 = vld [vmem:[%s497_s1 + $0x20] sm:$0xff]   ;;  %v368_v9 = vld [vmem:[%s497_s1 + $0x18] sm:$0xff]   ;;  %v370_v13 = vld [vmem:[%s497_s1 + $0x10] sm:$0xff]  }
   0x5   :  { %v377_v11 = vld [vmem:[%s498_s0 + $0x4] ss:$8 sps:$4 sm:$0xff]   ;;  %v380_v12 = vld [vmem:[%s498_s0 + $0x14] ss:$8 sps:$4 sm:$0xff]   ;;  %v375_v18 = vld [vmem:[%s498_s0] ss:$8 sps:$4 sm:$0xff]  }
   0x6   :  { %v371_v14 = vld [vmem:[%s497_s1 + $0x48] sm:$0xff]   ;;  %218 = vmatprep.mubr.bf16.mxu0 %v377_v11  ;;  %226 = vmatprep.mubr.bf16.mxu1 %v380_v12  ;;  %v373_v16 = vld [vmem:[%s497_s1 + $0x40] sm:$0xff]   ;;  %v378_v19 = vld [vmem:[%s498_s0 + $0x10] ss:$8 sps:$4 sm:$0xff]  }
   0x7   :  { %317 = vmatpush3.bf16.msra.mxu0 %v362_v3  ;;  %351 = vmatpush3.bf16.msra.mxu1 %v362_v3  ;;  %v372_v15 = vld [vmem:[%s497_s1 + $0x8] sm:$0xff]   ;;  %v374_v17 = vld [vmem:[%s497_s1] sm:$0xff]  }
   0x8   :  { %318 = vmatprep.subr.bf16.mxu0 %v363_v4  ;;  %344 = vmatprep.subr.bf16.mxu1 %v363_v4  ;;  %v254_v52 = vld [vmem:[%s499_s3] sm:$0x1] }
   0x9   :  { %v266_v55 = vld [vmem:[%s500_s4] sm:$0x1] }
   0xb   :  { %319 = vmatpush3.bf16.msra.mxu0 %v364_v5  ;;  %352 = vmatpush3.bf16.msra.mxu1 %v364_v5 }
   0xc   :  { %320 = vmatprep.subr.bf16.mxu0 %v365_v6  ;;  %345 = vmatprep.subr.bf16.mxu1 %v365_v6 }
   0xf   :  { %321 = vmatpush3.bf16.msra.mxu0 %v366_v7  ;;  %353 = vmatpush3.bf16.msra.mxu1 %v366_v7 }
  0x10   :  { %322 = vmatprep.subr.bf16.mxu0 %v367_v8  ;;  %346 = vmatprep.subr.bf16.mxu1 %v367_v8 }
  0x13   :  { %323 = vmatpush3.bf16.msra.mxu0 %v368_v9  ;;  %354 = vmatpush3.bf16.msra.mxu1 %v368_v9 }
  0x14   :  { %324 = vmatprep.subr.bf16.mxu0 %v369_v10  ;;  %347 = vmatprep.subr.bf16.mxu1 %v369_v10 }
  0x17   :  { %325 = vmatpush3.bf16.msra.mxu0 %v370_v13  ;;  %355 = vmatpush3.bf16.msra.mxu1 %v370_v13 }
  0x18   :  { %326 = vmatprep.subr.bf16.mxu0 %v371_v14  ;;  %348 = vmatprep.subr.bf16.mxu1 %v371_v14 }
  0x1b   :  { %327 = vmatpush3.bf16.msra.mxu0 %v372_v15  ;;  %356 = vmatpush3.bf16.msra.mxu1 %v372_v15 }
  0x1c   :  { %328 = vmatprep.subr.bf16.mxu0 %v373_v16  ;;  %349 = vmatprep.subr.bf16.mxu1 %v373_v16 }
  0x1f   :  { %329 = vmatpush3.bf16.msra.mxu0 %v374_v17  ;;  %357 = vmatpush3.bf16.msra.mxu1 %v374_v17 }
  0x22   :  { %219 = vmatmul.mubr.bf16.vlgmr.msra.gmra.mxu0 %v375_v18  ;;  %227 = vmatmul.mubr.bf16.vlgmr.msra.gmra.mxu1 %v378_v19 }
  0xe2   :  { %v330_v21 = vpop.f32.mrf.mxu0  ;;  %v336_v22 = vpop.f32.mrf.mxu1 }
  0xe4   :  { %v331_v23 = vpop.f32.mrf.mxu0  ;;  %v337_v24 = vpop.f32.mrf.mxu1 }
  0xe5   :  { %v332_v25 = vadd.f32 %v331_v23, %v330_v21  ;;  %v338_v26 = vadd.f32 %v337_v24, %v336_v22 }
  0xe6   :  { %v333_v27 = vpop.f32.mrf.mxu0  ;;  %v339_v28 = vpop.f32.mrf.mxu1 }
  0xe7   :  { %250 = vst [vmem:[%s501_s2] sm:$0xff] %v332_v25  ;;  %252 = vst [vmem:[%s501_s2 + $0x10] sm:$0xff] %v338_v26  ;;  %v267_v33 = vmul.f32 %v332_v25, %v332_v25  ;;  %v269_v36 = vmul.f32 %v338_v26, %v338_v26 }
  0xe8   :  { %v334_v29 = vpop.f32.mrf.mxu0  ;;  %v340_v30 = vpop.f32.mrf.mxu1 }
  0xe9   :  { %v335_v31 = vadd.f32 %v334_v29, %v333_v27  ;;  %v341_v32 = vadd.f32 %v340_v30, %v339_v28 }
  0xeb   :  { %251 = vst [vmem:[%s501_s2 + $0x8] sm:$0xff] %v335_v31  ;;  %v255_v34 = vadd.f32 %v335_v31, %v332_v25  ;;  %v268_v35 = vmul.f32 %v335_v31, %v335_v31  ;;  %253 = vst [vmem:[%s501_s2 + $0x18] sm:$0xff] %v341_v32  ;;  %v270_v40 = vmul.f32 %v341_v32, %v341_v32 }
  0xed   :  { %v271_v37 = vadd.f32 %v268_v35, %v267_v33  ;;  %v256_v38 = vadd.f32 %v338_v26, %v255_v34 }
  0xef   :  { %v257_v39 = vadd.f32 %v341_v32, %v256_v38  ;;  %v272_v41 = vadd.f32 %v271_v37, %v269_v36 }
  0xf1   :  { %v258_v42 = vrot.slane %v257_v39, 4  ;;  %v273_v43 = vadd.f32 %v272_v41, %v270_v40 }
  0xf3   :  { %v259_v44 = vadd.f32 %v258_v42, %v257_v39  ;;  %v274_v45 = vrot.slane %v273_v43, 4 }
  0xf5   :  { %v260_v46 = vrot.slane %v259_v44, 2  ;;  %v275_v47 = vadd.f32 %v274_v45, %v273_v43 }
  0xf7   :  { %v261_v48 = vadd.f32 %v260_v46, %v259_v44  ;;  %v276_v49 = vrot.slane %v275_v47, 2 }
  0xf9   :  { %v262_v50 = vrot.slane %v261_v48, 1  ;;  %v277_v51 = vadd.f32 %v276_v49, %v275_v47 }
  0xfb   :  { %v263_v53 = vadd.f32 %v262_v50, %v261_v48  ;;  %v278_v54 = vrot.slane %v277_v51, 1 }
  0xfd   :  { %v264_v56 = vadd.f32 %v263_v53, %v254_v52  ;;  %v279_v57 = vadd.f32 %v278_v54, %v277_v51 }
  0xff   :  { %265 = vst [vmem:[%s499_s3] sm:$0x1] %v264_v56  ;;  %v280_v58 = vadd.f32 %v279_v57, %v266_v55 }
 0x101   :  { %281 = vst [vmem:[%s500_s4] sm:$0x1] %v280_v58 }

// kernel: _lambda_.23
= control target key start
LH: loop header
LB: loop body
LE: loop exit
PB: predicated region body
PF: predicated region fallthrough
CT: control target
= control target key end

     0   :  { %s112_s0 = inlined_call_operand.vmem [shape: f32[32,128], index: 0, kind: input, shape index: {}]   ;;  %s113_s1 = inlined_call_operand.vmem [shape: f32[1,128], index: 1, kind: input, shape index: {}]   ;;  %s114_s2 = inlined_call_operand.vmem [shape: f32[1,128], index: 2, kind: input, shape index: {}]   ;;  %s115_s3 = inlined_call_operand.vmem [shape: f32[32,128], index: 3, kind: output, shape index: {}]  }
   0x1   :  { %v14_v0 = vld [vmem:[%s112_s0] sm:$0xff]  ;;  %v15_v4 = vld [vmem:[%s112_s0 + $0x8] sm:$0xff]  ;;  %v16_v5 = vld [vmem:[%s112_s0 + $0x10] sm:$0xff] }
   0x2   :  { %v60_v1 = vld [vmem:[%s113_s1] ss:$0 sm:$0xff]  ;;  %v17_v6 = vld [vmem:[%s112_s0 + $0x18] sm:$0xff] }
   0x3   :  { %v61_v2 = vld [vmem:[%s114_s2] ss:$0 sm:$0xff]  ;;  %v25_v3 = vmul.f32 %v60_v1, %v14_v0  ;;  %v26_v7 = vmul.f32 %v60_v1, %v15_v4  ;;  %v27_v8 = vmul.f32 %v60_v1, %v16_v5  ;;  %v28_v9 = vmul.f32 %v60_v1, %v17_v6 }
   0x5   :  { %v36_v10 = vadd.f32 %v61_v2, %v25_v3  ;;  %v37_v11 = vadd.f32 %v61_v2, %v26_v7  ;;  %v38_v12 = vadd.f32 %v61_v2, %v27_v8  ;;  %v39_v13 = vadd.f32 %v61_v2, %v28_v9 }
   0x7   :  { %vm40_vm0 = vcmp.gt.f32.partialorder %v36_v10, 0.0  ;;  %v44_v14 = vmul.f32 0.1, %v36_v10  ;;  %vm41_vm1 = vcmp.gt.f32.partialorder %v37_v11, 0.0  ;;  %v45_v15 = vmul.f32 0.1, %v37_v11 }
   0x8   :  { %vm42_vm2 = vcmp.gt.f32.partialorder %v38_v12, 0.0  ;;  %v46_v16 = vmul.f32 0.1, %v38_v12  ;;  %vm43_vm3 = vcmp.gt.f32.partialorder %v39_v13, 0.0  ;;  %v47_v18 = vmul.f32 0.1, %v39_v13 }
   0x9   :  { %v48_v17 = vsel %vm40_vm0, %v36_v10, %v44_v14  ;;  %v49_v19 = vsel %vm41_vm1, %v37_v11, %v45_v15 }
   0xa   :  { %52 = vst [vmem:[%s115_s3] sm:$0xff] %v48_v17  ;;  %v50_v20 = vsel %vm42_vm2, %v38_v12, %v46_v16  ;;  %53 = vst [vmem:[%s115_s3 + $0x8] sm:$0xff] %v49_v19  ;;  %v51_v21 = vsel %vm43_vm3, %v39_v13, %v47_v18 }
   0xb   :  { %54 = vst [vmem:[%s115_s3 + $0x10] sm:$0xff] %v50_v20  ;;  %55 = vst [vmem:[%s115_s3 + $0x18] sm:$0xff] %v51_v21 }

// kernel: _lambda_.24
= control target key start
LH: loop header
LB: loop body
LE: loop exit
PB: predicated region body
PF: predicated region fallthrough
CT: control target
= control target key end

     0   :  { %v544_v30 = vmov 0.0   ;;  %s690_s1 = inlined_call_operand.vmem [shape: bf16[384,128], index: 1, kind: input, shape index: {}]   ;;  %s691_s0 = inlined_call_operand.vmem [shape: bf16[32,384], index: 0, kind: input, shape index: {}]   ;;  %s692_s3 = inlined_call_operand.vmem [shape: f32[1,128], index: 3, kind: output, shape index: {1}]   ;;  %s693_s4 = inlined_call_operand.vmem [shape: f32[1,128], index: 4, kind: output, shape index: {2}]   ;;  %s694_s2 = inlined_call_operand.vmem [shape: f32[32,128], index: 2, kind: output, shape index: {0}]  }
   0x1   :  { %v512_v0 = vld [vmem:[%s690_s1 + $0x78] sm:$0xff]   ;;  %v515_v3 = vld [vmem:[%s690_s1 + $0x70] sm:$0xff]   ;;  %v518_v6 = vld [vmem:[%s690_s1 + $0x68] sm:$0xff]   ;;  %28 = vst [vmem:[%s692_s3] sm:$0x1] %v544_v30 }
   0x2   :  { %v513_v1 = vld [vmem:[%s690_s1 + $0xb8] sm:$0xff]   ;;  %453 = vmatprep.subr.bf16.mxu0 %v512_v0  ;;  %v516_v4 = vld [vmem:[%s690_s1 + $0xb0] sm:$0xff]   ;;  %v519_v7 = vld [vmem:[%s690_s1 + $0xa8] sm:$0xff]   ;;  %29 = vst [vmem:[%s693_s4] sm:$0x1] %v544_v30 }
   0x3   :  { %v514_v2 = vld [vmem:[%s690_s1 + $0x38] sm:$0xff]   ;;  %491 = vmatprep.subr.bf16.mxu1 %v513_v1  ;;  %v517_v5 = vld [vmem:[%s690_s1 + $0x30] sm:$0xff]   ;;  %v520_v8 = vld [vmem:[%s690_s1 + $0x28] sm:$0xff]  }
   0x4   :  { %454 = vmatpush3.bf16.msra.mxu0 %v514_v2  ;;  %492 = vmatpush3.bf16.msra.mxu1 %v513_v1  ;;  %v521_v9 = vld [vmem:[%s690_s1 + $0x60] sm:$0xff]   ;;  %v524_v12 = vld [vmem:[%s690_s1 + $0x58] sm:$0xff]   ;;  %v527_v15 = vld [vmem:[%s690_s1 + $0x50] sm:$0xff]  }
   0x5   :  { %455 = vmatprep.subr.bf16.mxu0 %v515_v3  ;;  %493 = vmatprep.subr.bf16.mxu1 %v516_v4  ;;  %v522_v10 = vld [vmem:[%s690_s1 + $0xa0] sm:$0xff]   ;;  %v525_v13 = vld [vmem:[%s690_s1 + $0x98] sm:$0xff]   ;;  %v528_v16 = vld [vmem:[%s690_s1 + $0x90] sm:$0xff]  }
   0x6   :  { %v523_v11 = vld [vmem:[%s690_s1 + $0x20] sm:$0xff]   ;;  %v526_v14 = vld [vmem:[%s690_s1 + $0x18] sm:$0xff]   ;;  %v529_v17 = vld [vmem:[%s690_s1 + $0x10] sm:$0xff]  }
   0x7   :  { %v530_v18 = vld [vmem:[%s690_s1 + $0x48] sm:$0xff]   ;;  %v533_v21 = vld [vmem:[%s690_s1 + $0x40] sm:$0xff]  }
   0x8   :  { %456 = vmatpush3.bf16.msra.mxu0 %v517_v5  ;;  %494 = vmatpush3.bf16.msra.mxu1 %v516_v4  ;;  %v531_v19 = vld [vmem:[%s690_s1 + $0x88] sm:$0xff]   ;;  %v534_v22 = vld [vmem:[%s690_s1 + $0x80] sm:$0xff]  }
   0x9   :  { %457 = vmatprep.subr.bf16.mxu0 %v518_v6  ;;  %495 = vmatprep.subr.bf16.mxu1 %v519_v7  ;;  %v532_v20 = vld [vmem:[%s690_s1 + $0x8] sm:$0xff]   ;;  %v538_v23 = vld [vmem:[%s691_s0 + $0x4] ss:$12 sps:$4 sm:$0xff]   ;;  %v383_v6 = vld [vmem:[%s692_s3] sm:$0x1] }
   0xa   :  { %v539_v24 = vld [vmem:[%s691_s0 + $0x8] ss:$12 sps:$4 sm:$0xff]   ;;  %298 = vmatprep.mubr.bf16.mxu0 %v538_v23  ;;  %v535_v25 = vld [vmem:[%s690_s1] sm:$0xff]  }
   0xb   :  { %507 = vmatprep.mubr.bf16.mxu1 %v539_v24  ;;  %v536_v26 = vld [vmem:[%s691_s0] ss:$12 sps:$4 sm:$0xff]   ;;  %v541_v28 = vld [vmem:[%s691_s0 + $0x1c] ss:$12 sps:$4 sm:$0xff]   ;;  %v543_v29 = vld [vmem:[%s691_s0 + $0x18] ss:$12 sps:$4 sm:$0xff]  }
   0xc   :  { %458 = vmatpush3.bf16.msra.mxu0 %v520_v8  ;;  %496 = vmatpush3.bf16.msra.mxu1 %v519_v7  ;;  %v540_v27 = vld [vmem:[%s691_s0 + $0x20] ss:$12 sps:$4 sm:$0xff]  }
   0xd   :  { %459 = vmatprep.subr.bf16.mxu0 %v521_v9  ;;  %497 = vmatprep.subr.bf16.mxu1 %v522_v10  ;;  %v395_v9 = vld [vmem:[%s693_s4] sm:$0x1] }
  0x10   :  { %460 = vmatpush3.bf16.msra.mxu0 %v523_v11  ;;  %498 = vmatpush3.bf16.msra.mxu1 %v522_v10 }
  0x11   :  { %461 = vmatprep.subr.bf16.mxu0 %v524_v12  ;;  %499 = vmatprep.subr.bf16.mxu1 %v525_v13 }
  0x14   :  { %462 = vmatpush3.bf16.msra.mxu0 %v526_v14  ;;  %500 = vmatpush3.bf16.msra.mxu1 %v525_v13 }
  0x15   :  { %463 = vmatprep.subr.bf16.mxu0 %v527_v15  ;;  %501 = vmatprep.subr.bf16.mxu1 %v528_v16 }
  0x18   :  { %464 = vmatpush3.bf16.msra.mxu0 %v529_v17  ;;  %502 = vmatpush3.bf16.msra.mxu1 %v528_v16 }
  0x19   :  { %465 = vmatprep.subr.bf16.mxu0 %v530_v18  ;;  %503 = vmatprep.subr.bf16.mxu1 %v531_v19 }
  0x1c   :  { %466 = vmatpush3.bf16.msra.mxu0 %v532_v20  ;;  %504 = vmatpush3.bf16.msra.mxu1 %v531_v19 }
  0x1d   :  { %467 = vmatprep.subr.bf16.mxu0 %v533_v21  ;;  %505 = vmatprep.subr.bf16.mxu1 %v534_v22 }
  0x20   :  { %468 = vmatpush3.bf16.msra.mxu0 %v535_v25  ;;  %506 = vmatpush3.bf16.msra.mxu1 %v534_v22 }
  0x23   :  { %299 = vmatmul.mubr.bf16.vlgmr.msra.gmra.mxu0 %v536_v26  ;;  %508 = vmatmul.mubr.bf16.vlgmr.msra.gmra.mxu1 %v540_v27 }
  0x24   :  { %306 = vmatprep.mubr.bf16.mxu0 %v541_v28 }
  0x2b   :  { %307 = vmatmul.mubr.bf16.gmra.mxu0 %v543_v29 }
  0xe3   :  { %v469_v31 = vpop.f32.mrf.mxu0  ;;  %v509_v32 = vpop.f32.mrf.mxu1 }
  0xe5   :  { %v470_v33 = vpop.f32.mrf.mxu0  ;;  %v349_v34 = vpop.f32.mrf.mxu1 }
  0xe6   :  { %v471_v35 = vadd.f32 %v470_v33, %v469_v31 }
  0xe7   :  { %v472_v36 = vpop.f32.mrf.mxu0  ;;  %v510_v37 = vpop.f32.mrf.mxu1 }
  0xe8   :  { %v350_v38 = vadd.f32 %v471_v35, %v349_v34 }
  0xe9   :  { %v473_v39 = vpop.f32.mrf.mxu0  ;;  %v352_v41 = vpop.f32.mrf.mxu1 }
  0xea   :  { %379 = vst [vmem:[%s694_s2] sm:$0xff] %v350_v38  ;;  %v474_v40 = vadd.f32 %v473_v39, %v472_v36  ;;  %v396_v50 = vmul.f32 %v350_v38, %v350_v38 }
  0xeb   :  { %v475_v42 = vpop.f32.mrf.mxu0 }
  0xec   :  { %v353_v43 = vadd.f32 %v474_v40, %v352_v41 }
  0xed   :  { %v476_v44 = vpop.f32.mrf.mxu0 }
  0xee   :  { %380 = vst [vmem:[%s694_s2 + $0x8] sm:$0xff] %v353_v43  ;;  %v477_v45 = vadd.f32 %v476_v44, %v475_v42  ;;  %v397_v47 = vmul.f32 %v353_v43, %v353_v43  ;;  %v384_v51 = vadd.f32 %v353_v43, %v350_v38 }
  0xef   :  { %v478_v46 = vpop.f32.mrf.mxu0 }
  0xf0   :  { %v358_v48 = vadd.f32 %v509_v32, %v477_v45  ;;  %v400_v54 = vadd.f32 %v397_v47, %v396_v50 }
  0xf1   :  { %v479_v49 = vpop.f32.mrf.mxu0 }
  0xf2   :  { %381 = vst [vmem:[%s694_s2 + $0x10] sm:$0xff] %v358_v48  ;;  %v398_v52 = vmul.f32 %v358_v48, %v358_v48  ;;  %v480_v53 = vadd.f32 %v479_v49, %v478_v46  ;;  %v385_v55 = vadd.f32 %v384_v51, %v358_v48 }
  0xf4   :  { %v361_v56 = vadd.f32 %v510_v37, %v480_v53  ;;  %v401_v57 = vadd.f32 %v400_v54, %v398_v52 }
  0xf6   :  { %382 = vst [vmem:[%s694_s2 + $0x18] sm:$0xff] %v361_v56  ;;  %v386_v58 = vadd.f32 %v385_v55, %v361_v56  ;;  %v399_v59 = vmul.f32 %v361_v56, %v361_v56 }
  0xf8   :  { %v387_v60 = vrot.slane %v386_v58, 4  ;;  %v402_v61 = vadd.f32 %v401_v57, %v399_v59 }
  0xfa   :  { %v388_v62 = vadd.f32 %v387_v60, %v386_v58  ;;  %v403_v63 = vrot.slane %v402_v61, 4 }
  0xfc   :  { %v389_v0 = vrot.slane %v388_v62, 2  ;;  %v404_v1 = vadd.f32 %v403_v63, %v402_v61 }
  0xfe   :  { %v390_v2 = vadd.f32 %v389_v0, %v388_v62  ;;  %v405_v3 = vrot.slane %v404_v1, 2 }
 0x100   :  { %v391_v4 = vrot.slane %v390_v2, 1  ;;  %v406_v5 = vadd.f32 %v405_v3, %v404_v1 }
 0x102   :  { %v392_v7 = vadd.f32 %v391_v4, %v390_v2  ;;  %v407_v8 = vrot.slane %v406_v5, 1 }
 0x104   :  { %v393_v10 = vadd.f32 %v392_v7, %v383_v6  ;;  %v408_v11 = vadd.f32 %v407_v8, %v406_v5 }
 0x106   :  { %394 = vst [vmem:[%s692_s3] sm:$0x1] %v393_v10  ;;  %v409_v12 = vadd.f32 %v408_v11, %v395_v9 }
 0x108   :  { %410 = vst [vmem:[%s693_s4] sm:$0x1] %v409_v12 }

// kernel: _lambda_.27
= control target key start
LH: loop header
LB: loop body
LE: loop exit
PB: predicated region body
PF: predicated region fallthrough
CT: control target
= control target key end

     0   :  { %s86_s0 = inlined_call_operand.vmem [shape: f32[16,128], index: 0, kind: input, shape index: {}]   ;;  %s87_s1 = inlined_call_operand.vmem [shape: f32[1,128], index: 1, kind: input, shape index: {}]   ;;  %s88_s2 = inlined_call_operand.vmem [shape: f32[1,128], index: 2, kind: input, shape index: {}]   ;;  %s89_s3 = inlined_call_operand.vmem [shape: f32[16,128], index: 3, kind: output, shape index: {}]  }
   0x1   :  { %v14_v0 = vld [vmem:[%s86_s0] sm:$0xff]  ;;  %v15_v4 = vld [vmem:[%s86_s0 + $0x8] sm:$0xff] }
   0x2   :  { %v46_v1 = vld [vmem:[%s87_s1] ss:$0 sm:$0xff] }
   0x3   :  { %v47_v2 = vld [vmem:[%s88_s2] ss:$0 sm:$0xff]  ;;  %v23_v3 = vmul.f32 %v46_v1, %v14_v0  ;;  %v24_v5 = vmul.f32 %v46_v1, %v15_v4 }
   0x5   :  { %v32_v6 = vadd.f32 %v47_v2, %v23_v3  ;;  %v33_v7 = vadd.f32 %v47_v2, %v24_v5 }
   0x7   :  { %vm34_vm0 = vcmp.gt.f32.partialorder %v32_v6, 0.0  ;;  %v36_v8 = vmul.f32 0.1, %v32_v6  ;;  %vm35_vm1 = vcmp.gt.f32.partialorder %v33_v7, 0.0  ;;  %v37_v9 = vmul.f32 0.1, %v33_v7 }
   0x9   :  { %v38_v10 = vsel %vm34_vm0, %v32_v6, %v36_v8  ;;  %v39_v11 = vsel %vm35_vm1, %v33_v7, %v37_v9 }
   0xa   :  { %40 = vst [vmem:[%s89_s3] sm:$0xff] %v38_v10  ;;  %41 = vst [vmem:[%s89_s3 + $0x8] sm:$0xff] %v39_v11 }

// kernel: _lambda_.26
= control target key start
LH: loop header
LB: loop body
LE: loop exit
PB: predicated region body
PF: predicated region fallthrough
CT: control target
= control target key end

     0   :  { %v316_v18 = vmov 0.0   ;;  %s420_s1 = inlined_call_operand.vmem [shape: bf16[256,128], index: 1, kind: input, shape index: {}]   ;;  %s421_s0 = inlined_call_operand.vmem [shape: bf16[16,256], index: 0, kind: input, shape index: {}]   ;;  %s422_s3 = inlined_call_operand.vmem [shape: f32[1,128], index: 3, kind: output, shape index: {1}]   ;;  %s423_s4 = inlined_call_operand.vmem [shape: f32[1,128], index: 4, kind: output, shape index: {2}]   ;;  %s424_s2 = inlined_call_operand.vmem [shape: f32[16,128], index: 2, kind: output, shape index: {0}]  }
   0x1   :  { %v297_v0 = vld [vmem:[%s420_s1 + $0x78] sm:$0xff]   ;;  %v299_v2 = vld [vmem:[%s420_s1 + $0x70] sm:$0xff]   ;;  %v301_v4 = vld [vmem:[%s420_s1 + $0x68] sm:$0xff]   ;;  %26 = vst [vmem:[%s422_s3] sm:$0x1] %v316_v18 }
   0x2   :  { %v298_v1 = vld [vmem:[%s420_s1 + $0x38] sm:$0xff]   ;;  %274 = vmatprep.subr.bf16.mxu0 %v297_v0  ;;  %v300_v3 = vld [vmem:[%s420_s1 + $0x30] sm:$0xff]   ;;  %v302_v5 = vld [vmem:[%s420_s1 + $0x28] sm:$0xff]   ;;  %27 = vst [vmem:[%s423_s4] sm:$0x1] %v316_v18 }
   0x3   :  { %275 = vmatpush3.bf16.msra.mxu0 %v298_v1  ;;  %v303_v6 = vld [vmem:[%s420_s1 + $0x60] sm:$0xff]   ;;  %v305_v8 = vld [vmem:[%s420_s1 + $0x58] sm:$0xff]   ;;  %v307_v10 = vld [vmem:[%s420_s1 + $0x50] sm:$0xff]  }
   0x4   :  { %276 = vmatprep.subr.bf16.mxu0 %v299_v2  ;;  %v304_v7 = vld [vmem:[%s420_s1 + $0x20] sm:$0xff]   ;;  %v306_v9 = vld [vmem:[%s420_s1 + $0x18] sm:$0xff]   ;;  %v308_v12 = vld [vmem:[%s420_s1 + $0x10] sm:$0xff]  }
   0x5   :  { %v315_v11 = vld [vmem:[%s421_s0 + $0x4] ss:$8 sps:$4 sm:$0xff]   ;;  %v313_v17 = vld [vmem:[%s421_s0] ss:$8 sps:$4 sm:$0xff]  }
   0x6   :  { %202 = vmatprep.mubr.bf16.mxu0 %v315_v11  ;;  %v309_v13 = vld [vmem:[%s420_s1 + $0x48] sm:$0xff]   ;;  %v311_v15 = vld [vmem:[%s420_s1 + $0x40] sm:$0xff]  }
   0x7   :  { %277 = vmatpush3.bf16.msra.mxu0 %v300_v3  ;;  %v310_v14 = vld [vmem:[%s420_s1 + $0x8] sm:$0xff]   ;;  %v312_v16 = vld [vmem:[%s420_s1] sm:$0xff]  }
   0x8   :  { %278 = vmatprep.subr.bf16.mxu0 %v301_v4  ;;  %v222_v38 = vld [vmem:[%s422_s3] sm:$0x1] }
   0x9   :  { %v232_v41 = vld [vmem:[%s423_s4] sm:$0x1] }
   0xb   :  { %279 = vmatpush3.bf16.msra.mxu0 %v302_v5 }
   0xc   :  { %280 = vmatprep.subr.bf16.mxu0 %v303_v6 }
   0xf   :  { %281 = vmatpush3.bf16.msra.mxu0 %v304_v7 }
  0x10   :  { %282 = vmatprep.subr.bf16.mxu0 %v305_v8 }
  0x13   :  { %283 = vmatpush3.bf16.msra.mxu0 %v306_v9 }
  0x14   :  { %284 = vmatprep.subr.bf16.mxu0 %v307_v10 }
  0x17   :  { %285 = vmatpush3.bf16.msra.mxu0 %v308_v12 }
  0x18   :  { %286 = vmatprep.subr.bf16.mxu0 %v309_v13 }
  0x1b   :  { %287 = vmatpush3.bf16.msra.mxu0 %v310_v14 }
  0x1c   :  { %288 = vmatprep.subr.bf16.mxu0 %v311_v15 }
  0x1f   :  { %289 = vmatpush3.bf16.msra.mxu0 %v312_v16 }
  0x22   :  { %203 = vmatmul.mubr.bf16.vlgmr.msra.gmra.mxu0 %v313_v17 }
  0xe2   :  { %v290_v19 = vpop.f32.mrf.mxu0 }
  0xe4   :  { %v291_v20 = vpop.f32.mrf.mxu0 }
  0xe5   :  { %v292_v21 = vadd.f32 %v291_v20, %v290_v19 }
  0xe6   :  { %v293_v22 = vpop.f32.mrf.mxu0 }
  0xe7   :  { %220 = vst [vmem:[%s424_s2] sm:$0xff] %v292_v21  ;;  %v233_v25 = vmul.f32 %v292_v21, %v292_v21 }
  0xe8   :  { %v294_v23 = vpop.f32.mrf.mxu0 }
  0xe9   :  { %v295_v24 = vadd.f32 %v294_v23, %v293_v22 }
  0xeb   :  { %221 = vst [vmem:[%s424_s2 + $0x8] sm:$0xff] %v295_v24  ;;  %v223_v26 = vadd.f32 %v295_v24, %v292_v21  ;;  %v234_v27 = vmul.f32 %v295_v24, %v295_v24 }
  0xed   :  { %v224_v28 = vrot.slane %v223_v26, 4  ;;  %v235_v29 = vadd.f32 %v234_v27, %v233_v25 }
  0xef   :  { %v225_v30 = vadd.f32 %v224_v28, %v223_v26  ;;  %v236_v31 = vrot.slane %v235_v29, 4 }
  0xf1   :  { %v226_v32 = vrot.slane %v225_v30, 2  ;;  %v237_v33 = vadd.f32 %v236_v31, %v235_v29 }
  0xf3   :  { %v227_v34 = vadd.f32 %v226_v32, %v225_v30  ;;  %v238_v35 = vrot.slane %v237_v33, 2 }
  0xf5   :  { %v228_v36 = vrot.slane %v227_v34, 1  ;;  %v239_v37 = vadd.f32 %v238_v35, %v237_v33 }
  0xf7   :  { %v229_v39 = vadd.f32 %v228_v36, %v227_v34  ;;  %v240_v40 = vrot.slane %v239_v37, 1 }
  0xf9   :  { %v230_v42 = vadd.f32 %v229_v39, %v222_v38  ;;  %v241_v43 = vadd.f32 %v240_v40, %v239_v37 }
  0xfb   :  { %231 = vst [vmem:[%s422_s3] sm:$0x1] %v230_v42  ;;  %v242_v44 = vadd.f32 %v241_v43, %v232_v41 }
  0xfd   :  { %243 = vst [vmem:[%s423_s4] sm:$0x1] %v242_v44 }

// kernel: _lambda_.28
= control target key start
LH: loop header
LB: loop body
LE: loop exit
PB: predicated region body
PF: predicated region fallthrough
CT: control target
= control target key end

     0   :  { %v210_v0 = vmov 0.0   ;;  %vm211_vm0 = vmmov 0   ;;  %s268_s1 = inlined_call_operand.vmem [shape: bf16[128,128], index: 1, kind: input, shape index: {}]   ;;  %s269_s0 = inlined_call_operand.vmem [shape: bf16[16,128], index: 0, kind: input, shape index: {}]   ;;  %s270_s2 = inlined_call_operand.vmem [shape: f32[1,128], index: 2, kind: input, shape index: {}]   ;;  %s271_s3 = inlined_call_operand.vmem [shape: f32[16,128], index: 3, kind: output, shape index: {}]  }
   0x1   :  { %179 = vmatprep.subr.bf16.mxu0 %v210_v0  ;;  %v201_v1 = vld [vmem:[%s268_s1 + $0x38] sm:$0xff]   ;;  %195 = vmatprep.mubr.msk.bf16.mxu0 %vm211_vm0, %v210_v0  ;;  %v202_v2 = vld [vmem:[%s268_s1 + $0x30] sm:$0xff]   ;;  %v203_v3 = vld [vmem:[%s268_s1 + $0x28] sm:$0xff]  }
   0x2   :  { %180 = vmatpush3.bf16.msra.mxu0 %v201_v1  ;;  %v204_v4 = vld [vmem:[%s268_s1 + $0x20] sm:$0xff]   ;;  %v205_v5 = vld [vmem:[%s268_s1 + $0x18] sm:$0xff]   ;;  %v206_v6 = vld [vmem:[%s268_s1 + $0x10] sm:$0xff]  }
   0x3   :  { %181 = vmatprep.subr.bf16.mxu0 %v210_v0  ;;  %v207_v7 = vld [vmem:[%s268_s1 + $0x8] sm:$0xff]   ;;  %v208_v8 = vld [vmem:[%s268_s1] sm:$0xff]  }
   0x4   :  { %v209_v9 = vld [vmem:[%s269_s0] sm:$0xff]  }
   0x5   :  { %v169_v10 = vld [vmem:[%s270_s2] ss:$0 sm:$0xff] }
   0x6   :  { %182 = vmatpush3.bf16.msra.mxu0 %v202_v2 }
   0x7   :  { %183 = vmatprep.subr.bf16.mxu0 %v210_v0 }
   0xa   :  { %184 = vmatpush3.bf16.msra.mxu0 %v203_v3 }
   0xb   :  { %185 = vmatprep.subr.bf16.mxu0 %v210_v0 }
   0xe   :  { %186 = vmatpush3.bf16.msra.mxu0 %v204_v4 }
   0xf   :  { %187 = vmatprep.subr.bf16.mxu0 %v210_v0 }
  0x12   :  { %188 = vmatpush3.bf16.msra.mxu0 %v205_v5 }
  0x13   :  { %189 = vmatprep.subr.bf16.mxu0 %v210_v0 }
  0x16   :  { %190 = vmatpush3.bf16.msra.mxu0 %v206_v6 }
  0x17   :  { %191 = vmatprep.subr.bf16.mxu0 %v210_v0 }
  0x1a   :  { %192 = vmatpush3.bf16.msra.mxu0 %v207_v7 }
  0x1b   :  { %193 = vmatprep.subr.bf16.mxu0 %v210_v0 }
  0x1e   :  { %194 = vmatpush3.bf16.msra.mxu0 %v208_v8 }
  0x21   :  { %196 = vmatmul.mubr.bf16.vlgmr.msra.gmra.mxu0 %v209_v9 }
  0xe1   :  { %v129_v11 = vpop.f32.mrf.mxu0 }
  0xe2   :  { %v152_v12 = vadd.f32 %v169_v10, %v129_v11 }
  0xe3   :  { %v197_v13 = vpop.f32.mrf.mxu0 }
  0xe4   :  { %154 = vst [vmem:[%s271_s3] sm:$0xff] %v152_v12 }
  0xe5   :  { %v132_v14 = vpop.f32.mrf.mxu0 }
  0xe6   :  { %v153_v15 = vadd.f32 %v169_v10, %v132_v14 }
  0xe7   :  { %v198_v16 = vpop.f32.mrf.mxu0 }
  0xe8   :  { %155 = vst [vmem:[%s271_s3 + $0x8] sm:$0xff] %v153_v15 }

// kernel: mul.0
= control target key start
LH: loop header
LB: loop body
LE: loop exit
PB: predicated region body
PF: predicated region fallthrough
CT: control target
= control target key end

     0   :  { %s34_s0 = inlined_call_operand.vmem [shape: f32[8,2], index: 0, kind: input, shape index: {}]   ;;  %s35_s1 = inlined_call_operand.vmem [shape: f32[8,2], index: 1, kind: input, shape index: {}]   ;;  %s36_s2 = inlined_call_operand.vmem [shape: f32[8,2], index: 2, kind: output, shape index: {}]  }
   0x1   :  { %v3_v0 = vld [vmem:[%s34_s0] sm:$0x3] }
   0x2   :  { %v4_v1 = vld [vmem:[%s35_s1] sm:$0x3] }
   0x3   :  { %v7_v2 = vmul.f32 %v4_v1, %v3_v0 }
   0x5   :  { %9 = vst [vmem:[%s36_s2] sm:$0x3] %v7_v2 }

// kernel: _lambda_.29
= control target key start
LH: loop header
LB: loop body
LE: loop exit
PB: predicated region body
PF: predicated region fallthrough
CT: control target
= control target key end

     0   :  { %v9_v4 = vlaneseq  ;;  %s55_s0 = inlined_call_operand.vmem [shape: f32[8,128], index: 0, kind: input, shape index: {}]   ;;  %s56_s1 = inlined_call_operand.vmem [shape: f32[8,128], index: 1, kind: output, shape index: {}]  }
   0x1   :  { %v8_v0 = vld [vmem:[%s55_s0] sm:$0xff] }
   0x2   :  { %v32_v1 = vmul.f32 -1.442695, %v8_v0  ;;  %v24_v2 = vmul.f32 1.442695, %v8_v0  ;;  %v10_v6 = vshrl.u32 %v9_v4, 7 }
   0x4   :  { %33 = vpow2.f32 %v32_v1  ;;  %vm17_vm0 = vcmp.eq.s32.totalorder %v10_v6, 0  ;;  %vm18_vm1 = vcmp.eq.s32.totalorder %v10_v6, 1  ;;  %vm20_vm3 = vcmp.ge.s32.totalorder %v10_v6, 4 }
   0x5   :  { %35 = vpow2.f32 %v24_v2  ;;  %vm19_vm2 = vmor %vm17_vm0, %vm18_vm1  ;;  %vm23_vm5 = vcmp.eq.s32.totalorder %v10_v6, 2 }
   0x6   :  { %vm21_vm4 = vmor %vm19_vm2, %vm20_vm3 }
  0x11   :  { %v34_v3 = vpop.eup %33 }
  0x12   :  { %v14_v5 = vadd.f32 1.0, %v34_v3  ;;  %v36_v7 = vpop.eup %35 }
  0x14   :  { %37 = vrcp.f32 %v14_v5 }
  0x21   :  { %v38_v8 = vpop.eup %37 }
  0x22   :  { %v22_v9 = vsel %vm21_vm4, %v38_v8, %v8_v0 }
  0x23   :  { %v26_v10 = vsel %vm23_vm5, %v36_v7, %v22_v9 }
  0x24   :  { %27 = vst [vmem:[%s56_s1] sm:$0xff] %v26_v10 }

</bundles_post_ra>
